<compile_context>
chip_gen: v5e
topology: v5e:2x2
jax: 0.10.0
libtpu: 0.0.40
codegen_flags: <defaults>
</compile_context>

<pallas_src>
from functools import partial

import jax
import jax.numpy as jnp
from jax.experimental import pallas as pl
from jax.experimental.pallas import tpu as pltpu


def _round_up(v, m):
    return ((v + m - 1) // m) * m


# ---------------------------------------------------------------------------
# Kernel: one full ResidualLayer (Snake -> conv chain over all dilations + residual)
# for one (batch, time-tile) grid point.
# ---------------------------------------------------------------------------
def residual_layer_kernel(x_ref, a_ref, ia_ref, w_ref, b_ref, o_ref, tail_ref, *,
                          dilations, kernel_size, t_tile, halo, fuse_taps):
    """Refs:
      x_ref  : (1, T_TILE, Cp)    input tile (also the residual branch)
      a_ref  : (D, 1, Cp)         Snake alpha per dilation step
      ia_ref : (D, 1, Cp)         1/(alpha + 1e-9) per dilation step
      w_ref  : (D, K*Cp, Cp)      [fuse_taps] or (D, K, Cp, Cp) conv weights [k, c_in, c_out]
      b_ref  : (D, 1, Cp)         conv bias per dilation step
      o_ref  : (1, T_TILE, Cp)    output tile
      tail_ref : (max(halo,1), Cp) VMEM carry of the last `halo` raw input rows
                 of the previous tile (causal left context for the whole chain).
    """
    t = pl.program_id(1)
    K = kernel_size
    nd = len(dilations)

    # Reset the causal history at the start of every batch element.
    @pl.when(t == 0)
    def _():
        tail_ref[...] = jnp.zeros_like(tail_ref)

    x_tile = x_ref[0].astype(jnp.float32)                      # (T_TILE, Cp)

    if halo > 0:
        h = jnp.concatenate([tail_ref[...], x_tile], axis=0)   # (halo + T_TILE, Cp)
        # Carry the last `halo` raw rows (window ending at this tile's end) forward.
        tail_ref[...] = h[t_tile:, :]
    else:
        h = x_tile

    consumed = 0
    for i, d in enumerate(dilations):
        a = a_ref[i]                                           # (1, Cp)
        ia = ia_ref[i]                                         # (1, Cp)
        # Snake activation (f32).
        s = h + ia * jnp.sin(a * h) ** 2

        rf = (K - 1) * d
        new_len = s.shape[0] - rf
        s = s.astype(w_ref.dtype)                              # bf16 (or f32) MXU inputs

        if fuse_taps:
            # One K*Cp-deep contraction: operand (new_len, K*Cp) @ (K*Cp, Cp).
            op = jnp.concatenate(
                [s[k * d:k * d + new_len, :] for k in range(K)], axis=-1)
            h = jnp.dot(op, w_ref[i], preferred_element_type=jnp.float32)
        else:
            h = jnp.dot(s[0:new_len, :], w_ref[i, 0],
                        preferred_element_type=jnp.float32)
            for k in range(1, K):
                h = h + jnp.dot(s[k * d:k * d + new_len, :], w_ref[i, k],
                                preferred_element_type=jnp.float32)
        h = h + b_ref[i]
        consumed += rf

        if i < nd - 1:
            # Rows whose global time index is < 0 are the causal zero-history of the
            # NEXT conv in the chain: force them to zero (the bias above made them
            # non-zero).  No-op for tiles past the left boundary.
            g0 = t * t_tile - (halo - consumed)                # global index of local row 0
            row = jax.lax.broadcasted_iota(jnp.int32, (new_len, 1), 0)
            h = jnp.where(row + g0 < 0, 0.0, h)

    assert h.shape[0] == t_tile
    o_ref[0] = (h + x_tile).astype(o_ref.dtype)


# ---------------------------------------------------------------------------
# Per-layer wrapper
# ---------------------------------------------------------------------------
def _residual_layer(y, layer_params, dilations, kernel_size, t_tile,
                    compute_dtype, fuse_taps):
    """y: (N, Tp, Cp) channels-last, Cp % 128 == 0, Tp % t_tile == 0."""
    N, Tp, Cp = y.shape
    K = kernel_size
    D = len(dilations)
    halo = sum((K - 1) * d for d in dilations)
    if fuse_taps is None:
        fuse_taps = Cp <= 128   # fold taps to fill the 256-wide MXU when C is narrow

    # Stack + channel-pad parameters for this layer.
    alphas, inv_alphas, ws, bs = [], [], [], []
    for alpha, w, b in layer_params:
        C = alpha.shape[0]
        a_p = jnp.ones((Cp,), jnp.float32).at[:C].set(alpha.astype(jnp.float32))
        alphas.append(a_p)
        inv_alphas.append(1.0 / (a_p + 1e-9))
        w_p = jnp.zeros((K, Cp, Cp), jnp.float32).at[:, :C, :C].set(
            w.astype(jnp.float32))
        ws.append(w_p.reshape(K * Cp, Cp) if fuse_taps else w_p)
        bs.append(jnp.zeros((Cp,), jnp.float32).at[:C].set(b.astype(jnp.float32)))

    a_all = jnp.stack(alphas)[:, None, :]                     # (D, 1, Cp) f32
    ia_all = jnp.stack(inv_alphas)[:, None, :]                # (D, 1, Cp) f32
    w_all = jnp.stack(ws).astype(compute_dtype)               # (D, K*Cp, Cp) or (D, K, Cp, Cp)
    b_all = jnp.stack(bs)[:, None, :]                         # (D, 1, Cp) f32

    kern = partial(residual_layer_kernel,
                   dilations=tuple(dilations), kernel_size=K,
                   t_tile=t_tile, halo=halo, fuse_taps=fuse_taps)

    if fuse_taps:
        w_spec = pl.BlockSpec((D, K * Cp, Cp), lambda n, t: (0, 0, 0))
    else:
        w_spec = pl.BlockSpec((D, K, Cp, Cp), lambda n, t: (0, 0, 0, 0))

    grid = (N, Tp // t_tile)
    return pl.pallas_call(
        kern,
        out_shape=jax.ShapeDtypeStruct((N, Tp, Cp), y.dtype),
        grid_spec=pltpu.PrefetchScalarGridSpec(
            num_scalar_prefetch=0,
            grid=grid,
            in_specs=[
                pl.BlockSpec((1, t_tile, Cp), lambda n, t: (n, t, 0)),   # x (tile)
                pl.BlockSpec((D, 1, Cp), lambda n, t: (0, 0, 0)),        # alpha
                pl.BlockSpec((D, 1, Cp), lambda n, t: (0, 0, 0)),        # 1/alpha
                w_spec,                                                  # weights
                pl.BlockSpec((D, 1, Cp), lambda n, t: (0, 0, 0)),        # bias
            ],
            out_specs=pl.BlockSpec((1, t_tile, Cp), lambda n, t: (n, t, 0)),
            scratch_shapes=[pltpu.VMEM((max(halo, 1), Cp), jnp.float32)],
        ),
        compiler_params=pltpu.CompilerParams(
            # N is independent (megacore-parallel); the T-tile axis carries the
            # causal-history scratch and must run in order.
            dimension_semantics=("parallel", "arbitrary"),
            vmem_limit_bytes=32 * 1024 * 1024,
        ),
    )(y, a_all, ia_all, w_all, b_all)


# ---------------------------------------------------------------------------
# Full ResidualBlock forward
# ---------------------------------------------------------------------------
def residual_block_forward(x_nct, params, dilations_list, *,
                           t_tile=256, compute_dtype=jnp.bfloat16, fuse_taps=None):
    """x_nct: (N, C, T) (PyTorch NCW). Returns (N, C, T)."""
    N, C, T = x_nct.shape
    K = params[0][0][1].shape[0]

    Cp = _round_up(C, 128)                        # lane-dense channels
    tt = min(_round_up(t_tile, 8), _round_up(T, 8))
    Tp = _round_up(T, tt)                         # trailing time pad (causal => harmless)

    y = jnp.transpose(x_nct, (0, 2, 1))           # -> channels-last (N, T, C)
    y = jnp.pad(y, ((0, 0), (0, Tp - T), (0, Cp - C)))

    for layer_params, dils in zip(params, dilations_list):
        y = _residual_layer(y, layer_params, dils, K, tt, compute_dtype, fuse_taps)

    y = y[:, :T, :C]
    return jnp.transpose(y, (0, 2, 1))


# ---------------------------------------------------------------------------
# Pure-JAX reference (mirrors the PyTorch module, f32) and synthetic params
# ---------------------------------------------------------------------------
def ref_forward(x_nct, params, dilations_list, kernel_size):
    N, C, T = x_nct.shape
    y = x_nct
    for layer_params, dils in zip(params, dilations_list):
        h = y
        for (alpha, w, b), d in zip(layer_params, dils):
            a = alpha.reshape(1, C, 1)
            h = h + (1.0 / (a + 1e-9)) * jnp.sin(a * h) ** 2
            pad = (kernel_size - 1) * d
            hp = jnp.pad(h, ((0, 0), (0, 0), (pad, 0)))
            out = jnp.zeros_like(h)
            for k in range(kernel_size):
                out = out + jnp.einsum('nct,cd->ndt', hp[:, :, k * d:k * d + T], w[k])
            h = out + b.reshape(1, C, 1)
        y = y + h
    return y


def init_params(key, dim, kernel_size, dilations_list):
    params = []
    for dils in dilations_list:
        layer_p = []
        for _ in dils:
            key, k1, k2, k3 = jax.random.split(key, 4)
            alpha = jnp.ones((dim,), jnp.float32) + 0.1 * jax.random.normal(k3, (dim,), jnp.float32)
            w = 0.2 * jax.random.normal(k1, (kernel_size, dim, dim), jnp.float32)  # (K, C_in, C_out)
            b = 0.1 * jax.random.normal(k2, (dim,), jnp.float32)
            layer_p.append((alpha, w, b))
        params.append(layer_p)
    return params


if __name__ == "__main__":
    key = jax.random.PRNGKey(0)
    N, dim, T = 2, 8, 48
    kernel_size = 3
    dilations_list = ((1, 3, 9), (5,))     # halo of layer 0 (26) > T_TILE: exercises carry
    t_tile = 16                            # multiple T-tiles per batch element

    kx, kp = jax.random.split(key)
    x = jax.random.normal(kx, (N, dim, T), jnp.float32)        # PyTorch NCW layout
    params = init_params(kp, dim, kernel_size, dilations_list)

    ref = ref_forward(x, params, dilations_list, kernel_size)

    # 1) f32 compute path: validates tiling / halo-carry / causal-masking logic tightly.
    out_f32 = residual_block_forward(x, params, dilations_list,
                                     t_tile=t_tile, compute_dtype=jnp.float32)
    out_f32 = jax.block_until_ready(out_f32)
    assert out_f32.shape == (N, dim, T)
    assert jnp.allclose(out_f32, ref, atol=1e-3, rtol=1e-3), "f32 kernel mismatch vs reference"

    # 2) f32, tap-fusion disabled (path used when C > 128).
    out_nf = residual_block_forward(x, params, dilations_list,
                                    t_tile=t_tile, compute_dtype=jnp.float32,
                                    fuse_taps=False)
    out_nf = jax.block_until_ready(out_nf)
    assert jnp.allclose(out_nf, ref, atol=1e-3, rtol=1e-3), "unfused-tap kernel mismatch"

    # 3) Default (bf16 MXU inputs, f32 accumulate): the performance configuration.
    out_bf16 = residual_block_forward(x, params, dilations_list,
                                      t_tile=t_tile, compute_dtype=jnp.bfloat16)
    out_bf16 = jax.block_until_ready(out_bf16)
    assert out_bf16.shape == (N, dim, T)
    assert jnp.allclose(out_bf16, ref, atol=1e-1, rtol=1e-1), "bf16 kernel mismatch vs reference"

    print("KERNEL_OK")
</pallas_src>

<mosaic_0001>
module attributes {stable_mosaic.version = 11 : i64} {
  func.func @residual_layer_kernel(%arg0: i32, %arg1: i32, %arg2: memref<1x16x128xf32, #tpu.memory_space<vmem>>, %arg3: memref<3x1x128xf32, #tpu.memory_space<vmem>>, %arg4: memref<3x1x128xf32, #tpu.memory_space<vmem>>, %arg5: memref<3x384x128xf32, #tpu.memory_space<vmem>>, %arg6: memref<3x1x128xf32, #tpu.memory_space<vmem>>, %arg7: memref<1x16x128xf32, #tpu.memory_space<vmem>>, %arg8: memref<26x128xf32, #tpu.memory_space<vmem>>) attributes {dimension_semantics = [#tpu.dimension_semantics<parallel>, #tpu.dimension_semantics<arbitrary>], iteration_bounds = array<i64: 2, 3>, scalar_prefetch = 0 : i64, scratch_operands = 1 : i64, tpu.core_type = #tpu.core_type<tc>, window_params = [{transform_indices = @transform_0, window_bounds = array<i64: 1, 16, 128>}, {pipeline_mode = #tpu.pipeline_mode<synchronous>, transform_indices = @transform_1, window_bounds = array<i64: 3, 1, 128>}, {pipeline_mode = #tpu.pipeline_mode<synchronous>, transform_indices = @transform_2, window_bounds = array<i64: 3, 1, 128>}, {pipeline_mode = #tpu.pipeline_mode<synchronous>, transform_indices = @transform_3, window_bounds = array<i64: 3, 384, 128>}, {pipeline_mode = #tpu.pipeline_mode<synchronous>, transform_indices = @transform_4, window_bounds = array<i64: 3, 1, 128>}, {transform_indices = @transform_5, window_bounds = array<i64: 1, 16, 128>}]} {
    %c0_i32 = arith.constant 0 : i32
    %0 = arith.cmpi eq, %arg1, %c0_i32 : i32
    %1 = arith.extui %0 : i1 to i32
    %c0_i32_0 = arith.constant 0 : i32
    %2 = arith.cmpi ne, %1, %c0_i32_0 : i32
    scf.if %2 {
      %cst_51 = arith.constant 0.000000e+00 : f32
      %101 = vector.broadcast %cst_51 : f32 to vector<26x128xf32>
      %c0_52 = arith.constant 0 : index
      %c0_53 = arith.constant 0 : index
      %102 = vector.load %arg8[%c0_52, %c0_53] : memref<26x128xf32, #tpu.memory_space<vmem>>, vector<26x128xf32>
      tpu.vector_store %arg8[%c0_52, %c0_53], %101 {strides = array<i32>} : memref<26x128xf32, #tpu.memory_space<vmem>>, vector<26x128xf32>,
    } else {
    }
    %c0 = arith.constant 0 : index
    %c0_1 = arith.constant 0 : index
    %c0_2 = arith.constant 0 : index
    %3 = vector.load %arg2[%c0, %c0_1, %c0_2] : memref<1x16x128xf32, #tpu.memory_space<vmem>>, vector<1x16x128xf32>
    %4 = vector.shape_cast %3 : vector<1x16x128xf32> to vector<16x128xf32>
    %c0_3 = arith.constant 0 : index
    %c0_4 = arith.constant 0 : index
    %5 = vector.load %arg8[%c0_3, %c0_4] : memref<26x128xf32, #tpu.memory_space<vmem>>, vector<26x128xf32>
    %6 = tpu.concatenate %5, %4 in 0 : vector<26x128xf32>, vector<16x128xf32> -> vector<42x128xf32>
    %7 = vector.extract_strided_slice %6 {offsets = [16, 0], sizes = [26, 128], strides = [1, 1]} : vector<42x128xf32> to vector<26x128xf32>
    %c0_5 = arith.constant 0 : index
    %c0_6 = arith.constant 0 : index
    %8 = vector.load %arg8[%c0_5, %c0_6] : memref<26x128xf32, #tpu.memory_space<vmem>>, vector<26x128xf32>
    tpu.vector_store %arg8[%c0_5, %c0_6], %7 {strides = array<i32>} : memref<26x128xf32, #tpu.memory_space<vmem>>, vector<26x128xf32>,
    %c0_7 = arith.constant 0 : index
    %c0_8 = arith.constant 0 : index
    %c0_9 = arith.constant 0 : index
    %9 = vector.load %arg3[%c0_7, %c0_8, %c0_9] : memref<3x1x128xf32, #tpu.memory_space<vmem>>, vector<1x1x128xf32>
    %10 = vector.shape_cast %9 : vector<1x1x128xf32> to vector<1x128xf32>
    %c0_10 = arith.constant 0 : index
    %c0_11 = arith.constant 0 : index
    %c0_12 = arith.constant 0 : index
    %11 = vector.load %arg4[%c0_10, %c0_11, %c0_12] : memref<3x1x128xf32, #tpu.memory_space<vmem>>, vector<1x1x128xf32>
    %12 = vector.shape_cast %11 : vector<1x1x128xf32> to vector<1x128xf32>
    %13 = vector.broadcast %10 : vector<1x128xf32> to vector<42x128xf32>
    %14 = arith.mulf %13, %6 : vector<42x128xf32>
    %15 = math.sin %14 : vector<42x128xf32>
    %16 = arith.mulf %15, %15 : vector<42x128xf32>
    %17 = vector.broadcast %12 : vector<1x128xf32> to vector<42x128xf32>
    %18 = arith.mulf %17, %16 : vector<42x128xf32>
    %19 = arith.addf %6, %18 : vector<42x128xf32>
    %20 = vector.extract_strided_slice %19 {offsets = [0, 0], sizes = [40, 128], strides = [1, 1]} : vector<42x128xf32> to vector<40x128xf32>
    %21 = vector.extract_strided_slice %19 {offsets = [1, 0], sizes = [40, 128], strides = [1, 1]} : vector<42x128xf32> to vector<40x128xf32>
    %22 = vector.extract_strided_slice %19 {offsets = [2, 0], sizes = [40, 128], strides = [1, 1]} : vector<42x128xf32> to vector<40x128xf32>
    %23 = tpu.concatenate %20, %21, %22 in 1 : vector<40x128xf32>, vector<40x128xf32>, vector<40x128xf32> -> vector<40x384xf32>
    %c0_13 = arith.constant 0 : index
    %c0_14 = arith.constant 0 : index
    %c0_15 = arith.constant 0 : index
    %24 = vector.load %arg5[%c0_13, %c0_14, %c0_15] : memref<3x384x128xf32, #tpu.memory_space<vmem>>, vector<1x384x128xf32>
    %25 = vector.shape_cast %24 : vector<1x384x128xf32> to vector<384x128xf32>
    %cst = arith.constant dense<0.000000e+00> : vector<40x128xf32>
    %26 = tpu.matmul %23, %25, %cst {dimension_numbers = #tpu.dot_dimension_numbers<[1], [0], [0], [1], [0, 0, 1, 1], [], []>} : vector<40x384xf32>, vector<384x128xf32>, vector<40x128xf32> -> vector<40x128xf32>
    %c0_16 = arith.constant 0 : index
    %c0_17 = arith.constant 0 : index
    %c0_18 = arith.constant 0 : index
    %27 = vector.load %arg6[%c0_16, %c0_17, %c0_18] : memref<3x1x128xf32, #tpu.memory_space<vmem>>, vector<1x1x128xf32>
    %28 = vector.shape_cast %27 : vector<1x1x128xf32> to vector<1x128xf32>
    %29 = vector.broadcast %28 : vector<1x128xf32> to vector<40x128xf32>
    %30 = arith.addf %26, %29 : vector<40x128xf32>
    %c16_i32 = arith.constant 16 : i32
    %31 = arith.muli %arg1, %c16_i32 : i32
    %c24_i32 = arith.constant 24 : i32
    %32 = arith.subi %31, %c24_i32 : i32
    %33 = tpu.iota {dimensions = array<i32: 0>} : vector<40x1xi32>
    %34 = vector.broadcast %32 : i32 to vector<40x1xi32>
    %35 = arith.addi %33, %34 : vector<40x1xi32>
    %c0_i32_19 = arith.constant 0 : i32
    %36 = vector.broadcast %c0_i32_19 : i32 to vector<40x1xi32>
    %37 = arith.cmpi slt, %35, %36 : vector<40x1xi32>
    %cst_20 = arith.constant 0.000000e+00 : f32
    %38 = vector.shape_cast %37 : vector<40x1xi1> to vector<40x1xi1>
    %39 = vector.broadcast %38 : vector<40x1xi1> to vector<40x128xi1>
    %40 = vector.broadcast %cst_20 : f32 to vector<40x128xf32>
    %41 = arith.select %39, %40, %30 : vector<40x128xi1>, vector<40x128xf32>
    %c1 = arith.constant 1 : index
    %c0_21 = arith.constant 0 : index
    %c0_22 = arith.constant 0 : index
    %42 = vector.load %arg3[%c1, %c0_21, %c0_22] : memref<3x1x128xf32, #tpu.memory_space<vmem>>, vector<1x1x128xf32>
    %43 = vector.shape_cast %42 : vector<1x1x128xf32> to vector<1x128xf32>
    %c1_23 = arith.constant 1 : index
    %c0_24 = arith.constant 0 : index
    %c0_25 = arith.constant 0 : index
    %44 = vector.load %arg4[%c1_23, %c0_24, %c0_25] : memref<3x1x128xf32, #tpu.memory_space<vmem>>, vector<1x1x128xf32>
    %45 = vector.shape_cast %44 : vector<1x1x128xf32> to vector<1x128xf32>
    %46 = vector.broadcast %43 : vector<1x128xf32> to vector<40x128xf32>
    %47 = arith.mulf %46, %41 : vector<40x128xf32>
    %48 = math.sin %47 : vector<40x128xf32>
    %49 = arith.mulf %48, %48 : vector<40x128xf32>
    %50 = vector.broadcast %45 : vector<1x128xf32> to vector<40x128xf32>
    %51 = arith.mulf %50, %49 : vector<40x128xf32>
    %52 = arith.addf %41, %51 : vector<40x128xf32>
    %53 = vector.extract_strided_slice %52 {offsets = [0, 0], sizes = [34, 128], strides = [1, 1]} : vector<40x128xf32> to vector<34x128xf32>
    %54 = vector.extract_strided_slice %52 {offsets = [3, 0], sizes = [34, 128], strides = [1, 1]} : vector<40x128xf32> to vector<34x128xf32>
    %55 = vector.extract_strided_slice %52 {offsets = [6, 0], sizes = [34, 128], strides = [1, 1]} : vector<40x128xf32> to vector<34x128xf32>
    %56 = tpu.concatenate %53, %54, %55 in 1 : vector<34x128xf32>, vector<34x128xf32>, vector<34x128xf32> -> vector<34x384xf32>
    %c1_26 = arith.constant 1 : index
    %c0_27 = arith.constant 0 : index
    %c0_28 = arith.constant 0 : index
    %57 = vector.load %arg5[%c1_26, %c0_27, %c0_28] : memref<3x384x128xf32, #tpu.memory_space<vmem>>, vector<1x384x128xf32>
    %58 = vector.shape_cast %57 : vector<1x384x128xf32> to vector<384x128xf32>
    %cst_29 = arith.constant dense<0.000000e+00> : vector<34x128xf32>
    %59 = tpu.matmul %56, %58, %cst_29 {dimension_numbers = #tpu.dot_dimension_numbers<[1], [0], [0], [1], [0, 0, 1, 1], [], []>} : vector<34x384xf32>, vector<384x128xf32>, vector<34x128xf32> -> vector<34x128xf32>
    %c1_30 = arith.constant 1 : index
    %c0_31 = arith.constant 0 : index
    %c0_32 = arith.constant 0 : index
    %60 = vector.load %arg6[%c1_30, %c0_31, %c0_32] : memref<3x1x128xf32, #tpu.memory_space<vmem>>, vector<1x1x128xf32>
    %61 = vector.shape_cast %60 : vector<1x1x128xf32> to vector<1x128xf32>
    %62 = vector.broadcast %61 : vector<1x128xf32> to vector<34x128xf32>
    %63 = arith.addf %59, %62 : vector<34x128xf32>
    %c16_i32_33 = arith.constant 16 : i32
    %64 = arith.muli %arg1, %c16_i32_33 : i32
    %c18_i32 = arith.constant 18 : i32
    %65 = arith.subi %64, %c18_i32 : i32
    %66 = tpu.iota {dimensions = array<i32: 0>} : vector<34x1xi32>
    %67 = vector.broadcast %65 : i32 to vector<34x1xi32>
    %68 = arith.addi %66, %67 : vector<34x1xi32>
    %c0_i32_34 = arith.constant 0 : i32
    %69 = vector.broadcast %c0_i32_34 : i32 to vector<34x1xi32>
    %70 = arith.cmpi slt, %68, %69 : vector<34x1xi32>
    %cst_35 = arith.constant 0.000000e+00 : f32
    %71 = vector.shape_cast %70 : vector<34x1xi1> to vector<34x1xi1>
    %72 = vector.broadcast %71 : vector<34x1xi1> to vector<34x128xi1>
    %73 = vector.broadcast %cst_35 : f32 to vector<34x128xf32>
    %74 = arith.select %72, %73, %63 : vector<34x128xi1>, vector<34x128xf32>
    %c2 = arith.constant 2 : index
    %c0_36 = arith.constant 0 : index
    %c0_37 = arith.constant 0 : index
    %75 = vector.load %arg3[%c2, %c0_36, %c0_37] : memref<3x1x128xf32, #tpu.memory_space<vmem>>, vector<1x1x128xf32>
    %76 = vector.shape_cast %75 : vector<1x1x128xf32> to vector<1x128xf32>
    %c2_38 = arith.constant 2 : index
    %c0_39 = arith.constant 0 : index
    %c0_40 = arith.constant 0 : index
    %77 = vector.load %arg4[%c2_38, %c0_39, %c0_40] : memref<3x1x128xf32, #tpu.memory_space<vmem>>, vector<1x1x128xf32>
    %78 = vector.shape_cast %77 : vector<1x1x128xf32> to vector<1x128xf32>
    %79 = vector.broadcast %76 : vector<1x128xf32> to vector<34x128xf32>
    %80 = arith.mulf %79, %74 : vector<34x128xf32>
    %81 = math.sin %80 : vector<34x128xf32>
    %82 = arith.mulf %81, %81 : vector<34x128xf32>
    %83 = vector.broadcast %78 : vector<1x128xf32> to vector<34x128xf32>
    %84 = arith.mulf %83, %82 : vector<34x128xf32>
    %85 = arith.addf %74, %84 : vector<34x128xf32>
    %86 = vector.extract_strided_slice %85 {offsets = [0, 0], sizes = [16, 128], strides = [1, 1]} : vector<34x128xf32> to vector<16x128xf32>
    %87 = vector.extract_strided_slice %85 {offsets = [9, 0], sizes = [16, 128], strides = [1, 1]} : vector<34x128xf32> to vector<16x128xf32>
    %88 = vector.extract_strided_slice %85 {offsets = [18, 0], sizes = [16, 128], strides = [1, 1]} : vector<34x128xf32> to vector<16x128xf32>
    %89 = tpu.concatenate %86, %87, %88 in 1 : vector<16x128xf32>, vector<16x128xf32>, vector<16x128xf32> -> vector<16x384xf32>
    %c2_41 = arith.constant 2 : index
    %c0_42 = arith.constant 0 : index
    %c0_43 = arith.constant 0 : index
    %90 = vector.load %arg5[%c2_41, %c0_42, %c0_43] : memref<3x384x128xf32, #tpu.memory_space<vmem>>, vector<1x384x128xf32>
    %91 = vector.shape_cast %90 : vector<1x384x128xf32> to vector<384x128xf32>
    %cst_44 = arith.constant dense<0.000000e+00> : vector<16x128xf32>
    %92 = tpu.matmul %89, %91, %cst_44 {dimension_numbers = #tpu.dot_dimension_numbers<[1], [0], [0], [1], [0, 0, 1, 1], [], []>} : vector<16x384xf32>, vector<384x128xf32>, vector<16x128xf32> -> vector<16x128xf32>
    %c2_45 = arith.constant 2 : index
    %c0_46 = arith.constant 0 : index
    %c0_47 = arith.constant 0 : index
    %93 = vector.load %arg6[%c2_45, %c0_46, %c0_47] : memref<3x1x128xf32, #tpu.memory_space<vmem>>, vector<1x1x128xf32>
    %94 = vector.shape_cast %93 : vector<1x1x128xf32> to vector<1x128xf32>
    %95 = vector.broadcast %94 : vector<1x128xf32> to vector<16x128xf32>
    %96 = arith.addf %92, %95 : vector<16x128xf32>
    %97 = arith.addf %96, %4 : vector<16x128xf32>
    %c0_48 = arith.constant 0 : index
    %c0_49 = arith.constant 0 : index
    %c0_50 = arith.constant 0 : index
    %98 = vector.load %arg7[%c0_48, %c0_49, %c0_50] : memref<1x16x128xf32, #tpu.memory_space<vmem>>, vector<1x16x128xf32>
    %99 = vector.shape_cast %98 : vector<1x16x128xf32> to vector<16x128xf32>
    %100 = vector.shape_cast %97 : vector<16x128xf32> to vector<1x16x128xf32>
    tpu.vector_store %arg7[%c0_48, %c0_49, %c0_50], %100 {strides = array<i32>} : memref<1x16x128xf32, #tpu.memory_space<vmem>>, vector<1x16x128xf32>,
    return
  }
  func.func @transform_0(%arg0: i32, %arg1: i32) -> (i32, i32, i32) {
    %c0_i32 = arith.constant 0 : i32
    %c0_i32_0 = arith.constant 0 : i32
    return %arg0, %arg1, %c0_i32 : i32, i32, i32
  }
  func.func @transform_1(%arg0: i32, %arg1: i32) -> (i32, i32, i32) {
    %c0_i32 = arith.constant 0 : i32
    %c0_i32_0 = arith.constant 0 : i32
    %c0_i32_1 = arith.constant 0 : i32
    %c0_i32_2 = arith.constant 0 : i32
    return %c0_i32, %c0_i32_0, %c0_i32_1 : i32, i32, i32
  }
  func.func @transform_2(%arg0: i32, %arg1: i32) -> (i32, i32, i32) {
    %c0_i32 = arith.constant 0 : i32
    %c0_i32_0 = arith.constant 0 : i32
    %c0_i32_1 = arith.constant 0 : i32
    %c0_i32_2 = arith.constant 0 : i32
    return %c0_i32, %c0_i32_0, %c0_i32_1 : i32, i32, i32
  }
  func.func @transform_3(%arg0: i32, %arg1: i32) -> (i32, i32, i32) {
    %c0_i32 = arith.constant 0 : i32
    %c0_i32_0 = arith.constant 0 : i32
    %c0_i32_1 = arith.constant 0 : i32
    %c0_i32_2 = arith.constant 0 : i32
    return %c0_i32, %c0_i32_0, %c0_i32_1 : i32, i32, i32
  }
  func.func @transform_4(%arg0: i32, %arg1: i32) -> (i32, i32, i32) {
    %c0_i32 = arith.constant 0 : i32
    %c0_i32_0 = arith.constant 0 : i32
    %c0_i32_1 = arith.constant 0 : i32
    %c0_i32_2 = arith.constant 0 : i32
    return %c0_i32, %c0_i32_0, %c0_i32_1 : i32, i32, i32
  }
  func.func @transform_5(%arg0: i32, %arg1: i32) -> (i32, i32, i32) {
    %c0_i32 = arith.constant 0 : i32
    %c0_i32_0 = arith.constant 0 : i32
    return %arg0, %arg1, %c0_i32 : i32, i32, i32
  }
}

</mosaic_0001>

<bundles_post_ra>
// kernel: tpu_custom_call.1
= control target key start
LH: loop header
LB: loop body
LE: loop exit
PB: predicated region body
PF: predicated region fallthrough
CT: control target
= control target key end

     0   :  { %s6519_s0 = inlined_call_operand.hbm [shape: f32[2,48,128], index: 0, kind: input, shape index: {}]   ;;  %s6520_s1 = inlined_call_operand.hbm [shape: f32[3,1,128], index: 1, kind: input, shape index: {}]   ;;  %s6521_s2 = inlined_call_operand.hbm [shape: f32[3,1,128], index: 2, kind: input, shape index: {}]   ;;  %s6522_s3 = inlined_call_operand.hbm [shape: f32[3,384,128], index: 3, kind: input, shape index: {}]   ;;  %s6523_s4 = inlined_call_operand.vmem [shape: f32[3,1,128], index: 4, kind: input, shape index: {}]   ;;  %s6524_s5 = inlined_call_operand.hbm [shape: f32[2,48,128], index: 5, kind: output, shape index: {}]  }
   0x1   :  { %6539 = sst [smem:[#allocation21_spill]] %s6520_s1 }
   0x2   :  { %6540 = sst [smem:[#allocation22_spill]] %s6521_s2 }
   0x3   :  { %6541 = sst [smem:[#allocation23_spill]] %s6522_s3 }
   0x4   :  { %10 = vsyncpa [#allocation4], 0 }
   0x5   :  { %12 = vsyncpa [#allocation4 + $0x1], 0 }
   0x6   :  { %13 = vsyncpa [#allocation7], 0 }
   0x7   :  { %14 = vsyncpa [#allocation10], 0 }
   0x8   :  { %15 = vsyncpa [#allocation5], 0 }
   0x9   :  { %17 = vsyncpa [#allocation5 + $0x1], 0  ;;  %s4137_s18 = smov 0   ;;  %s4139_s19 = smov 0  }
   0xa   :  { %s4141_s20 = smov 0   ;;  %s4143_s21 = smov 0  }
   0xb   :  { %s4145_s22 = smov 0   ;;  %s4147_s23 = smov 0  }
   0xc   :  { %s4149_s24 = smov 0   ;;  %s4151_s25 = smov 0  }
   0xd LB: > { %6542 = sst [smem:[#allocation16_spill]] %s4060_s18  ;;  %s6525_s26 = sadd.s32 4294967295, %s4088_s25   ;;  %s4088_s25 = sphi %s4151_s25, %s23_s25   ;;  %s4084_s24 = sphi %s4149_s24, %s6602_s24   ;;  %s4080_s23 = sphi %s4147_s23, %s6601_s23   ;;  %s4076_s22 = sphi %s4145_s22, %s6600_s22   ;;  %s4072_s21 = sphi %s4143_s21, %s6599_s21   ;;  %s4068_s20 = sphi %s4141_s20, %s6598_s20   ;;  %s4064_s19 = sphi %s4139_s19, %s6597_s19   ;;  %s4060_s18 = sphi %s4137_s18, %s6596_s18  }
   0xe   : > { %s3631_s27 = sadd.s32 4294967294, %s4088_s25   ;;  %p57_p0 = scmp.ne.s32.totalorder %s4064_s19, %s4060_s18 }
   0xf   : > { %p4183_p1 = scmp.eq.s32.totalorder %s6525_s26, 0  ;;  %p173_p2 = scmp.eq.s32.totalorder %s3631_s27, 5 }
  0x10   : > { %p3632_p4 = scmp.ge.s32.totalorder %s4088_s25, 1  ;;  %p180_p6 = scmp.lt.s32.totalorder %s4088_s25, 7 }
  0x11   : > { %p4189_p3 = por %p4183_p1, %p57_p0  ;;  %p4194_p5 = por %p173_p2, %p57_p0 }
  0x12   : > { %s6547_s1 = sld [smem:[#allocation21_spill]]  ;;  %p4202_p7 = pnand %p3632_p4, %p180_p6 }
  0x13   : > { %s6545_s30 = scalar_select %p4194_p5, 1, 0 }
  0x14   : > { %p3739_p8 = pneg %p4202_p7  ;;  %s4090_s10 = smov [#allocation6]  }
  0x15   : > { %6546 = sst [smem:[#allocation17_spill]] %s6545_s30  ;;  %s193_s11 = sshll.u32 %s4090_s10, 4  ;;  %s194_s11 = int_to_ptr.vmem [resolvable:$true] %s193_s11 }
  0x16   : > { %p4210_p9 = pnand %p3739_p8, %p4183_p1  ;;  %s6550_s2 = sld [smem:[#allocation22_spill]] }
  0x17   : > { %s4091_s16 = smov 16   ;;  %s4092_s17 = smov 1  }
  0x18   : > { %s191_s8 = sshll.u32 %s6547_s1, 4  ;;  %s4093_s27 = smov [#allocation8]   ;;  %s192_s8 = int_to_ptr.hbm [resolvable:$true] %s191_s8 }
  0x19   : > { %3742 = dma.hbm_to_vmem [thread:$0]  (!%p4210_p9), %s192_s8, 48, %s194_s11, [#allocation7], %s4091_s16, %s4091_s16, %s4092_s17  }
  0x1a   : > { %s207_s6 = sshll.u32 %s4093_s27, 4  ;;  %s6551_s3 = sld [smem:[#allocation23_spill]]  ;;  %s208_s6 = int_to_ptr.vmem [resolvable:$true] %s207_s6 }
  0x1b   : > { %s4094_s14 = smov [#allocation9]   ;;  %s6526_s8 = smov 128  }
  0x1c   : > { %s205_s15 = sshll.u32 %s6550_s2, 4  ;;  %s221_s26 = sshll.u32 %s4094_s14, 4  ;;  %s206_s15 = int_to_ptr.hbm [resolvable:$true] %s205_s15  ;;  %s222_s26 = int_to_ptr.vmem [resolvable:$true] %s221_s26 }
  0x1d   : > { %3745 = dma.hbm_to_vmem [thread:$0]  (!%p4210_p9), %s206_s15, 48, %s208_s6, [#allocation7], %s4091_s16, %s4091_s16, %s4092_s17  }
  0x1e   : > { %s6527_s11 = smov 8   ;;  %s32_s27 = sadd.s32 1, %s4080_s23 }
  0x1f   : > { %p33_p10 = scmp.ge.s32.totalorder %s32_s27, 3  ;;  %s35_s7 = sadd.s32 1, %s4084_s24 }
  0x20   : > { %s219_s13 = sshll.u32 %s6551_s3, 4  ;;  %s6552_s10 = sadd.s32 4294967295, %s4088_s25   ;;  %s220_s13 = int_to_ptr.hbm [resolvable:$true] %s219_s13 }
  0x21   : > { %3748 = dma.hbm_to_vmem [thread:$0]  (!%p4210_p9), %s220_s13, 18432, %s222_s26, [#allocation10], %s6526_s8, %s6526_s8, %s6527_s11  }
  0x22   : > { %p167_p11 = scmp.eq.s32.totalorder %s6552_s10, 5  ;;  %p51_p12 = scmp.ne.s32.totalorder %s4068_s20, %s4064_s19 }
  0x23   : > { %s6604_s27 = smov (%p33_p10, %s32_s27), 0  ;;  %s6606_s7 = smov (!%p33_p10, %s35_s7), %s4084_s24 }
  0x24   : > { %6553 = sst [smem:[#allocation18_spill]] %s6604_s27  ;;  %s44_s12 = sadd.s32 1, %s4068_s20 }
  0x25   : > { %p52_p13 = scmp.eq.s32.totalorder %s4088_s25, 0  ;;  %p37_p0 = scmp.ge.s32.totalorder %s6606_s7, 2 }
  0x26   : > { %p4240_p2 = por %p167_p11, %p51_p12  ;;  %s40_s15 = ssub.s32 %s4080_s23, %s6604_s27 }
  0x27   : > { %p4246_p4 = por %p52_p13, %p51_p12  ;;  %s6608_s7 = smov (%p37_p0, %s6606_s7), 0 }
  0x28   : > { %s6554_s26 = scalar_select %p4240_p2, 1, 0 }
  0x29   : > { %6557 = sst [smem:[#allocation20_spill]] %s6608_s7  ;;  %p3760_p6 = scmp.lt.s32.totalorder %s4088_s25, 6 }
  0x2a   : > { %6555 = sst [smem:[#allocation19_spill]] %s6554_s26  ;;  %s238_s17 = sand.u32 1, %s4068_s20  }
  0x2b   : > { %s39_s6 = ssub.s32 %s4084_s24, %s6608_s7  ;;  %s3638_s13 = sshll.u32 %s4080_s23, 1 }
  0x2c   : > { %s41_s14 = sor.u32 %s40_s15, %s39_s6  ;;  %s3637_s10 = sshll.u32 %s238_s17, 4 }
  0x2d   : > { %p42_p8 = scmp.eq.s32.totalorder %s41_s14, 0  ;;  %s3721_s8 = smul.u32 6, %s4084_s24 }
  0x2e   : > { %s242_s11 = scalar_lea.vmem [#allocation3], %s3637_s10  ;;  %p3750_p9 = pnand %p3760_p6, %p4246_p4 }
  0x2f   : > { %s252_s1 = sshll.u32 %s242_s11, 4  ;;  %s247_s3 = sadd.s32 %s3721_s8, %s3638_s13  ;;  %s253_s1 = int_to_ptr.vmem [resolvable:$true] %s252_s1 }
  0x30   : > { %s4259_s2 = scalar_select %p42_p8, %s4068_s20, %s44_s12  }
  0x31   : > { %s3639_s27 = sshll.u32 %s247_s3, 3  ;;  %s239_s15 = scalar_lea.sflag [#allocation4], %s238_s17 }
  0x32   : > { %s249_s26 = scalar_lea.hbm %s6519_s0, %s3639_s27  ;;  %s6558_s6 = smov 8  }
  0x33   : > { %s250_s7 = sshll.u32 %s249_s26, 4  ;;  %s6559_s14 = smov 128   ;;  %s251_s7 = int_to_ptr.hbm [resolvable:$true] %s250_s7 }
  0x34   : > { %3752 = dma.hbm_to_vmem [thread:$0]  (!%p3750_p9), %s251_s7, 256, %s253_s1, %s239_s15, %s6559_s14, %s6559_s14, %s6558_s6  }
  0x35   : > { %264 = sbr.rel (%p4202_p7) target bundleno = 1108 (0x454), region = 40  ;;  %s4274_s3 = sand.u32 (!%p4202_p7), 1, %s4064_s19  }
  0x36   : > { %s3641_s8 = sshll.u32 (!%p4202_p7), %s4274_s3, 4  ;;  %s267_s18 = scalar_lea.sflag (!%p4202_p7), [#allocation4], %s4274_s3 }
  0x37   : > { %s4278_s30 = scalar_lea.vmem (!%p4202_p7), [#allocation3], %s3641_s8 }
  0x3a   : > { %4043 = dma.done.wait (%p4189_p3), %s267_s18, 256  }
  0x3b   : > { %4045 = vsyncadd (%p4189_p3), %s267_s18, 4294967040 }
  0x3c   : > { %4047 = dma.done.wait (%p4183_p1), [#allocation7], 96  }
  0x3d   : > { %4049 = vsyncadd (%p4183_p1), [#allocation7], 4294967200 }
  0x3e   : > { %4051 = dma.done.wait (%p4183_p1), [#allocation10], 18432  }
  0x3f   : > { %4053 = vsyncadd (%p4183_p1), [#allocation10], 4294948864  ;;  %s4292_s1 = scalar_lea.vmem [#allocation11], %s3641_s8  ;;  %p3646_p7 = scmp.ne.s32.totalorder %s4072_s21, 0 }
  0x41   : > { %318 = sbr.rel (%p3646_p7) target bundleno = 75 (0x4b), region = 60 }
  0x46   : > { %v4097_v0 = vmov 0.0  }
  0x47   : > { %319 = vst [vmem:[#allocation2 + $0x10] sm:$0xff] %v4097_v0 }
  0x48   : > { %320 = vst [vmem:[#allocation2] sm:$0xff] %v4097_v0 }
  0x49   : > { %321 = vst [vmem:[#allocation2 + $0x18] sm:$0xff] %v4097_v0 }
  0x4a   : > { %322 = vst [vmem:[#allocation2 + $0x8] sm:$0x3] %v4097_v0 }
  0x4b PF: > { %v1392_v1 = vld [vmem:[#allocation9 + $0x178] sm:$0xff]  ;;  %v1391_v3 = vld [vmem:[#allocation9 + $0x170] sm:$0xff]  ;;  %v1390_v6 = vld [vmem:[#allocation9 + $0x168] sm:$0xff]  ;;  %s3665_s28 = sshll.u32 %s4072_s21, 4  ;;  %s3722_s17 = smul.u32 6, %s4076_s22 }
  0x4c   : > { %v1360_v2 = vld [vmem:[#allocation9 + $0x78] sm:$0xff]  ;;  %1461 = vmatpush.msra.mxu2 %v1392_v1  ;;  %v1359_v4 = vld [vmem:[#allocation9 + $0x70] sm:$0xff]  ;;  %v1358_v7 = vld [vmem:[#allocation9 + $0x68] sm:$0xff]  ;;  %s3666_s29 = sadd.s32 4294967272, %s3665_s28  ;;  %s3683_s27 = sadd.s32 4294967278, %s3665_s28 }
  0x4d   : > { %1397 = vmatpush.msra.mxu0 %v1360_v2  ;;  %v1376_v5 = vld [vmem:[#allocation9 + $0xf8] sm:$0xff]  ;;  %v1375_v8 = vld [vmem:[#allocation9 + $0xf0] sm:$0xff]  ;;  %v1374_v9 = vld [vmem:[#allocation9 + $0xe8] sm:$0xff]  ;;  %s3701_s13 = sshll.u32 %s4072_s21, 1  ;;  %s3508_s22 = sshll.u32 %s4292_s1, 4  ;;  %s3509_s22 = int_to_ptr.vmem [resolvable:$true] %s3508_s22 }
  0x4e   : > { %1429 = vmatpush.msra.mxu1 %v1376_v5  ;;  %1462 = vmatpush.msra.mxu2 %v1391_v3  ;;  %v1389_v10 = vld [vmem:[#allocation9 + $0x160] sm:$0xff]  ;;  %v1388_v13 = vld [vmem:[#allocation9 + $0x158] sm:$0xff]  ;;  %v1387_v16 = vld [vmem:[#allocation9 + $0x150] sm:$0xff]  ;;  %s3505_s10 = sadd.s32 %s3722_s17, %s3701_s13  ;;  %s3494_s28 = scalar_lea.sflag [#allocation5], %s4274_s3 }
  0x4f   : > { %1398 = vmatpush.msra.mxu0 %v1359_v4  ;;  %v1357_v11 = vld [vmem:[#allocation9 + $0x60] sm:$0xff]  ;;  %v1356_v14 = vld [vmem:[#allocation9 + $0x58] sm:$0xff]  ;;  %v1355_v17 = vld [vmem:[#allocation9 + $0x50] sm:$0xff]  ;;  %s3702_s15 = sshll.u32 %s3505_s10, 3  ;;  %s4002_s7 = scalar_lea.hbm %s6524_s5, 96 }
  0x50   : > { %1430 = vmatpush.msra.mxu1 %v1375_v8  ;;  %1463 = vmatpush.msra.mxu2 %v1390_v6  ;;  %v1373_v12 = vld [vmem:[#allocation9 + $0xe0] sm:$0xff]  ;;  %v1372_v15 = vld [vmem:[#allocation9 + $0xd8] sm:$0xff]  ;;  %v1371_v18 = vld [vmem:[#allocation9 + $0xd0] sm:$0xff]  ;;  %s3507_s8 = scalar_lea.hbm %s6524_s5, %s3702_s15 }
  0x51   : > { %1399 = vmatpush.msra.mxu0 %v1358_v7  ;;  %v1386_v19 = vld [vmem:[#allocation9 + $0x148] sm:$0xff]  ;;  %v1385_v22 = vld [vmem:[#allocation9 + $0x140] sm:$0xff]  ;;  %v1384_v24 = vld [vmem:[#allocation9 + $0x138] sm:$0xff]  ;;  %s3510_s21 = sshll.u32 %s3507_s8, 4  ;;  %s3511_s21 = int_to_ptr.hbm [resolvable:$true] %s3510_s21 }
  0x52   : > { %1431 = vmatpush.msra.mxu1 %v1374_v9  ;;  %1464 = vmatpush.msra.mxu2 %v1389_v10  ;;  %v1354_v20 = vld [vmem:[#allocation9 + $0x48] sm:$0xff]  ;;  %v1353_v23 = vld [vmem:[#allocation9 + $0x40] sm:$0xff]  ;;  %v1352_v25 = vld [vmem:[#allocation9 + $0x38] sm:$0xff] }
  0x53   : > { %1400 = vmatpush.msra.mxu0 %v1357_v11  ;;  %v1370_v21 = vld [vmem:[#allocation9 + $0xc8] sm:$0xff]  ;;  %v1369_v26 = vld [vmem:[#allocation9 + $0xc0] sm:$0xff]  ;;  %v1383_v27 = vld [vmem:[#allocation9 + $0x130] sm:$0xff] }
  0x54   : > { %1432 = vmatpush.msra.mxu1 %v1373_v12  ;;  %1465 = vmatpush.msra.mxu2 %v1388_v13  ;;  %v1351_v28 = vld [vmem:[#allocation9 + $0x30] sm:$0xff]  ;;  %v1368_v29 = vld [vmem:[#allocation9 + $0xb8] sm:$0xff]  ;;  %v4295_v30 = vld [vmem:[#allocation2 + $0x10] sm:$0xff]  ;;  %v4098_v13 = vmov 683565275  }
  0x55   : > { %1401 = vmatpush.msra.mxu0 %v1356_v14  ;;  %v4297_v31 = vld [vmem:[#allocation2] sm:$0xff]  ;;  %v1382_v32 = vld [vmem:[#allocation9 + $0x128] sm:$0xff]  ;;  %v327_v35 = vld [vmem:[#allocation2 + $0x18] sm:$0xff] }
  0x56   : > { %1433 = vmatpush.msra.mxu1 %v1372_v15  ;;  %1466 = vmatpush.msra.mxu2 %v1387_v16  ;;  %v1350_v33 = vld [vmem:[#allocation9 + $0x28] sm:$0xff]  ;;  %v4299_v34 = vld [vmem:[#allocation6] ss:$0 sm:$0xff]  ;;  %v1367_v36 = vld [vmem:[#allocation9 + $0xb0] sm:$0xff]  ;;  %339 = vst [vmem:[#allocation2 + $0x10] sm:$0xff] %v327_v35 }
  0x57   : > { %1402 = vmatpush.msra.mxu0 %v1355_v17  ;;  %v4303_v37 = vmul.f32 %v4299_v34, %v4295_v30  ;;  %v4307_v38 = vmul.f32 %v4299_v34, %v4297_v31  ;;  %v1366_v39 = vld [vmem:[#allocation9 + $0xa8] sm:$0xff]  ;;  %v4310_v40 = vmul.f32 %v4299_v34, %v327_v35  ;;  %v1381_v41 = vld [vmem:[#allocation9 + $0x120] sm:$0xff]  ;;  %v1380_v48 = vld [vmem:[#allocation9 + $0x118] sm:$0xff]  ;;  %v4099_v15 = vmov 2475754826  }
  0x58   : > { %1434 = vmatpush.msra.mxu1 %v1371_v18  ;;  %1467 = vmatpush.msra.mxu2 %v1386_v19  ;;  %v1349_v42 = vld [vmem:[#allocation9 + $0x20] sm:$0xff]  ;;  %v1348_v49 = vld [vmem:[#allocation9 + $0x18] sm:$0xff]  ;;  %v1379_v55 = vld [vmem:[#allocation9 + $0x110] sm:$0xff]  ;;  %v4100_v17 = vmov 2131351028  }
  0x59   : > { %1403 = vmatpush.msra.mxu0 %v1354_v20  ;;  %v354_v43 = vand.u32 2147483647, %v4303_v37  ;;  %v357_v44 = vand.u32 2139095040, %v4303_v37  ;;  %v1365_v45 = vld [vmem:[#allocation9 + $0xa0] sm:$0xff]  ;;  %v509_v46 = vand.u32 2147483647, %v4307_v38 }
  0x5a   : > { %1435 = vmatpush.msra.mxu1 %v1370_v21  ;;  %1468 = vmatpush.msra.mxu2 %v1385_v22  ;;  %v512_v47 = vand.u32 2139095040, %v4307_v38  ;;  %v1364_v52 = vld [vmem:[#allocation9 + $0x98] sm:$0xff]  ;;  %v667_v54 = vand.u32 2139095040, %v4310_v40  ;;  %v1347_v56 = vld [vmem:[#allocation9 + $0x10] sm:$0xff]  ;;  %v1378_v62 = vld [vmem:[#allocation9 + $0x108] sm:$0xff] }
  0x5b   : > { %1404 = vmatpush.msra.mxu0 %v1353_v23  ;;  %v358_v50 = vshrl.u32 %v357_v44, 23  ;;  %v361_v51 = vand.u32 8388607, %v354_v43  ;;  %v1363_v58 = vld [vmem:[#allocation9 + $0x90] sm:$0xff]  ;;  %v516_v61 = vand.u32 8388607, %v509_v46 }
  0x5c   : > { %1436 = vmatpush.msra.mxu1 %v1369_v26  ;;  %1469 = vmatpush.msra.mxu2 %v1384_v24  ;;  %v513_v53 = vshrl.u32 %v512_v47, 23  ;;  %v1346_v63 = vld [vmem:[#allocation9 + $0x8] sm:$0xff]  ;;  %v668_v2 = vshrl.u32 %v667_v54, 23  ;;  %v1377_v3 = vld [vmem:[#allocation9 + $0x100] sm:$0xff]  ;;  %v6537_v19 = vmov 2102212464  }
  0x5d   : > { %1405 = vmatpush.msra.mxu0 %v1352_v25  ;;  %v3647_v57 = vadd.s32 4294967169, %v358_v50  ;;  %v362_v59 = vor.u32 8388608, %v361_v51  ;;  %v517_v6 = vor.u32 8388608, %v516_v61  ;;  %v4102_v21 = vmov 920167782  }
  0x5e   : > { %1437 = vmatpush.msra.mxu1 %v1368_v29  ;;  %1470 = vmatpush.msra.mxu2 %v1383_v27  ;;  %v3650_v60 = vadd.s32 4294967169, %v513_v53  ;;  %v4327_v11 = vadd.s32 4294967169, %v668_v2 }
  0x5f   : > { %1406 = vmatpush.msra.mxu0 %v1351_v28  ;;  %v364_v0 = vadd.s32 1, %v3647_v57  ;;  %v4321_v5 = vshll.u32 %v362_v59, 8  ;;  %v4335_v24 = vshll.u32 %v517_v6, 8 }
  0x60   : > { %1438 = vmatpush.msra.mxu1 %v1367_v36  ;;  %1471 = vmatpush.msra.mxu2 %v1382_v32  ;;  %v519_v1 = vadd.s32 1, %v3650_v60  ;;  %v6535_v32 = vmov 1326507024  }
  0x61   : > { %1407 = vmatpush.msra.mxu0 %v1350_v33  ;;  %vm365_vm0 = vcmp.gt.s32.totalorder %v364_v0, 0  ;;  %v403_v23 = vand.u32 65535, %v4321_v5  ;;  %v404_v28 = vshrl.u32 %v4321_v5, 16 }
  0x62   : > { %1439 = vmatpush.msra.mxu1 %v1366_v39  ;;  %1472 = vmatpush.msra.mxu2 %v1381_v41  ;;  %v366_v4 = vsel %vm365_vm0, %v364_v0, 0  ;;  %vm520_vm1 = vcmp.gt.s32.totalorder %v519_v1, 0 }
  0x63   : > { %1408 = vmatpush.msra.mxu0 %v1349_v42  ;;  %v368_v7 = vand.u32 31, %v366_v4  ;;  %v521_v8 = vsel %vm520_vm1, %v519_v1, 0  ;;  %v4323_v9 = vshrl.u32 %v366_v4, 5 }
  0x64   : > { %1440 = vmatpush.msra.mxu1 %v1365_v45  ;;  %1473 = vmatpush.msra.mxu2 %v1380_v48  ;;  %v4325_v10 = vand.u32 31, %v521_v8 }
  0x65   : > { %1409 = vmatpush.msra.mxu0 %v1348_v49  ;;  %v369_v12 = vsub.s32 32, %v368_v7  ;;  %v371_v14 = vshll.u32 %v4098_v13, %v368_v7  ;;  %v374_v16 = vshll.u32 %v4099_v15, %v368_v7  ;;  %v377_v18 = vshll.u32 %v4100_v17, %v368_v7 }
  0x66   : > { %1441 = vmatpush.msra.mxu1 %v1364_v52  ;;  %1474 = vmatpush.msra.mxu2 %v1379_v55  ;;  %v380_v20 = vshll.u32 %v6537_v19, %v368_v7  ;;  %v383_v22 = vshll.u32 %v4102_v21, %v368_v7  ;;  %vm386_vm2 = vcmp.lt.s32.totalorder %v4323_v9, 1  ;;  %vm389_vm3 = vcmp.lt.s32.totalorder %v4323_v9, 4 }
  0x67   : > { %1410 = vmatpush.msra.mxu0 %v1347_v56  ;;  %v372_v25 = vshrl.u32 %v4099_v15, %v369_v12  ;;  %v375_v26 = vshrl.u32 %v4100_v17, %v369_v12  ;;  %v378_v27 = vshrl.u32 %v6537_v19, %v369_v12  ;;  %v381_v29 = vshrl.u32 %v4102_v21, %v369_v12 }
  0x68   : > { %1442 = vmatpush.msra.mxu1 %v1363_v58  ;;  %1475 = vmatpush.msra.mxu2 %v1378_v62  ;;  %v384_v33 = vshrl.u32 %v6535_v32, %v369_v12  ;;  %v4346_v41 = vsub.s32 32, %v4325_v10  ;;  %v370_v42 = vshrl.u32 %v4098_v13, %v369_v12  ;;  %vm388_vm4 = vcmp.lt.s32.totalorder %v4323_v9, 3 }
  0x69   : > { %1411 = vmatpush.msra.mxu0 %v1346_v63  ;;  %v373_v35 = vor.u32 %v372_v25, %v371_v14  ;;  %v376_v36 = vor.u32 %v375_v26, %v374_v16  ;;  %v379_v39 = vor.u32 %v378_v27, %v377_v18  ;;  %v382_v44 = vor.u32 %v381_v29, %v380_v20 }
  0x6a   : > { %1476 = vmatpush.msra.mxu2 %v1377_v3  ;;  %v385_v45 = vor.u32 %v384_v33, %v383_v22  ;;  %vm387_vm5 = vcmp.lt.s32.totalorder %v4323_v9, 2  ;;  %v4355_v49 = vshrl.u32 %v521_v8, 5  ;;  %v526_v52 = vshll.u32 %v4098_v13, %v4325_v10 }
  0x6b   : > { %v394_v47 = vsel %vm386_vm2, %v373_v35, %v376_v36  ;;  %v398_v48 = vsel %vm386_vm2, %v376_v36, %v379_v39  ;;  %v395_v50 = vsel %vm389_vm3, %v382_v44, 920167782  ;;  %v529_v53 = vshll.u32 %v4099_v15, %v4325_v10 }
  0x6c   : > { %v399_v51 = vsel %vm389_vm3, %v385_v45, 1326507024  ;;  %v391_v54 = vsel %vm389_vm3, %v379_v39, 2102212464  ;;  %v396_v55 = vsel %vm388_vm4, %v379_v39, %v395_v50  ;;  %v527_v57 = vshrl.u32 %v4099_v15, %v4346_v41 }
  0x6d   : > { %v400_v56 = vsel %vm388_vm4, %v382_v44, %v399_v51  ;;  %v390_v58 = vsel %vm386_vm2, %v370_v42, %v373_v35  ;;  %v397_v59 = vsel %vm387_vm5, %v394_v47, %v396_v55  ;;  %v530_v61 = vshrl.u32 %v4100_v17, %v4346_v41 }
  0x6e   : > { %v401_v60 = vsel %vm387_vm5, %v398_v48, %v400_v56  ;;  %v427_v0 = vand.u32 65535, %v397_v59  ;;  %v428_v1 = vshrl.u32 %v397_v59, 16  ;;  %v392_v2 = vsel %vm388_vm4, %v376_v36, %v391_v54 }
  0x6f   : > { %v405_v62 = vand.u32 65535, %v401_v60  ;;  %v406_v63 = vshrl.u32 %v401_v60, 16  ;;  %v4383_v3 = vor.u32 %v527_v57, %v526_v52  ;;  %v4385_v4 = vor.u32 %v530_v61, %v529_v53 }
  0x70   : > { %v532_v6 = vshll.u32 %v4100_v17, %v4325_v10  ;;  %v533_v14 = vshrl.u32 %v6537_v19, %v4346_v41  ;;  %v429_v18 = vmul.u32 %v427_v0, %v403_v23  ;;  %v430_v20 = vmul.u32 %v428_v1, %v403_v23 }
  0x71   : > { %v407_v7 = vmul.u32 %v405_v62, %v403_v23  ;;  %v408_v8 = vmul.u32 %v406_v63, %v403_v23  ;;  %v409_v12 = vmul.u32 %v405_v62, %v404_v28  ;;  %v410_v16 = vmul.u32 %v406_v63, %v404_v28 }
  0x72   : > { %v431_v22 = vmul.u32 %v427_v0, %v404_v28  ;;  %v432_v29 = vmul.u32 %v428_v1, %v404_v28  ;;  %v433_v35 = vshll.u32 %v430_v20, 16  ;;  %v434_v36 = vshrl.u32 %v430_v20, 16 }
  0x73   : > { %v411_v25 = vshll.u32 %v408_v8, 16  ;;  %v412_v26 = vshrl.u32 %v408_v8, 16  ;;  %v413_v27 = vshll.u32 %v409_v12, 16  ;;  %v414_v33 = vshrl.u32 %v409_v12, 16 }
  0x74   : > { %v435_v39 = vshll.u32 %v431_v22, 16  ;;  %v436_v44 = vshrl.u32 %v431_v22, 16  ;;  %v535_v45 = vshll.u32 %v6537_v19, %v4325_v10  ;;  %v4104_v47 = vmov 0  }
  0x75   : > { %vm415_vm6 = vc.u32 %v407_v7, %v411_v25  ;;  %v417_v42 = vadd.s32 %v411_v25, %v407_v7  ;;  %vm437_vm7 = vc.u32 %v429_v18, %v433_v35  ;;  %v439_v23 = vadd.s32 %v433_v35, %v429_v18 }
  0x76   : > { %v416_v48 = vsel %vm415_vm6, 1, %v4104_v47  ;;  %v536_v50 = vshrl.u32 %v4102_v21, %v4346_v41  ;;  %v438_v28 = vsel %vm437_vm7, 1, %v4104_v47  ;;  %v538_v52 = vshll.u32 %v4102_v21, %v4325_v10 }
  0x77   : > { %v418_v51 = vadd.s32 %v416_v48, %v410_v16  ;;  %vm419_vm8 = vc.u32 %v417_v42, %v413_v27  ;;  %v440_v54 = vadd.s32 %v438_v28, %v432_v29  ;;  %vm441_vm9 = vc.u32 %v439_v23, %v435_v39 }
  0x78   : > { %v420_v53 = vsel %vm419_vm8, 1, %v4104_v47  ;;  %v534_v55 = vor.u32 %v533_v14, %v532_v6  ;;  %v442_v57 = vsel %vm441_vm9, 1, %v4104_v47  ;;  %v537_v59 = vor.u32 %v536_v50, %v535_v45 }
  0x79   : > { %v422_v56 = vadd.s32 %v420_v53, %v418_v51  ;;  %v539_v60 = vshrl.u32 %v6535_v32, %v4346_v41  ;;  %v4403_v61 = vadd.s32 %v439_v23, %v435_v39  ;;  %v444_v62 = vadd.s32 %v442_v57, %v440_v54 }
  0x7a   : > { %vm541_vm10 = vcmp.lt.s32.totalorder %v4355_v49, 1  ;;  %vm543_vm11 = vcmp.lt.s32.totalorder %v4355_v49, 3  ;;  %vm542_vm12 = vcmp.lt.s32.totalorder %v4355_v49, 2  ;;  %vm544_vm13 = vcmp.lt.s32.totalorder %v4355_v49, 4 }
  0x7b   : > { %v423_v10 = vadd.s32 %v422_v56, %v412_v26  ;;  %v540_v63 = vor.u32 %v539_v60, %v538_v52  ;;  %v393_v0 = vsel %vm387_vm5, %v390_v58, %v392_v2  ;;  %v445_v1 = vadd.s32 %v444_v62, %v434_v36 }
  0x7c   : > { %v549_v6 = vsel %vm541_vm10, %v4383_v3, %v4385_v4  ;;  %v550_v7 = vsel %vm544_vm13, %v537_v59, 920167782  ;;  %v553_v14 = vsel %vm541_vm10, %v4385_v4, %v534_v55  ;;  %v558_v9 = vand.u32 65535, %v4335_v24 }
  0x7d   : > { %v4417_v8 = vadd.s32 %v423_v10, %v414_v33  ;;  %v551_v12 = vsel %vm543_vm11, %v534_v55, %v550_v7  ;;  %v446_v58 = vadd.s32 %v445_v1, %v436_v44  ;;  %v554_v16 = vsel %vm544_vm13, %v540_v63, 1326507024 }
  0x7e   : > { %v552_v2 = vsel %vm542_vm12, %v549_v6, %v551_v12  ;;  %v559_v18 = vshrl.u32 %v4335_v24, 16  ;;  %v447_v20 = vmul.u32 %v4321_v5, %v393_v0  ;;  %v555_v22 = vsel %vm543_vm11, %v537_v59, %v554_v16 }
  0x7f   : > { %vm449_vm14 = vc.u32 %v4417_v8, %v4403_v61  ;;  %v582_v25 = vand.u32 65535, %v552_v2  ;;  %v450_v26 = vadd.s32 1, %v446_v58  ;;  %v556_v27 = vsel %vm542_vm12, %v553_v14, %v555_v22 }
  0x80   : > { %v583_v29 = vshrl.u32 %v552_v2, 16  ;;  %v674_v33 = vadd.s32 1, %v4327_v11  ;;  %v560_v35 = vand.u32 65535, %v556_v27  ;;  %v561_v36 = vshrl.u32 %v556_v27, 16 }
  0x81   : > { %v451_v39 = vsel %vm449_vm14, %v450_v26, %v446_v58  ;;  %v525_v5 = vshrl.u32 %v4098_v13, %v4346_v41  ;;  %v586_v44 = vmul.u32 %v582_v25, %v559_v18  ;;  %v584_v50 = vmul.u32 %v582_v25, %v558_v9 }
  0x82   : > { %v585_v42 = vmul.u32 %v583_v29, %v558_v9  ;;  %v452_v45 = vadd.s32 %v451_v39, %v447_v20  ;;  %v562_v48 = vmul.u32 %v560_v35, %v558_v9  ;;  %v563_v23 = vmul.u32 %v561_v36, %v558_v9 }
  0x83   : > { %v564_v51 = vmul.u32 %v560_v35, %v559_v18  ;;  %v664_v52 = vand.u32 2147483647, %v4310_v40  ;;  %vm675_vm15 = vcmp.gt.s32.totalorder %v674_v33, 0  ;;  %v546_v11 = vsel %vm544_vm13, %v534_v55, 2102212464 }
  0x84   : > { %v588_v28 = vshll.u32 %v585_v42, 16  ;;  %v453_v53 = vadd.s32 536870912, %v452_v45  ;;  %v565_v54 = vmul.u32 %v561_v36, %v559_v18  ;;  %v566_v56 = vshll.u32 %v563_v23, 16 }
  0x85   : > { %v545_v41 = vsel %vm541_vm10, %v525_v5, %v4383_v3  ;;  %v568_v57 = vshll.u32 %v564_v51, 16  ;;  %v587_v59 = vmul.u32 %v583_v29, %v559_v18  ;;  %v590_v60 = vshll.u32 %v586_v44, 16 }
  0x86   : > { %v454_v62 = vshrl.u32 %v453_v53, 30  ;;  %vm570_vm0 = vc.u32 %v562_v48, %v566_v56  ;;  %v572_v10 = vadd.s32 %v566_v56, %v562_v48  ;;  %vm592_vm1 = vc.u32 %v584_v50, %v588_v28 }
  0x87   : > { %v547_v63 = vsel %vm543_vm11, %v4385_v4, %v546_v11  ;;  %v571_v0 = vsel %vm570_vm0, 1, %v4104_v47  ;;  %v593_v55 = vsel %vm592_vm1, 1, %v4104_v47  ;;  %v594_v1 = vadd.s32 %v588_v28, %v584_v50 }
  0x88   : > { %v455_v6 = vshll.u32 %v454_v62, 30  ;;  %v567_v7 = vshrl.u32 %v563_v23, 16  ;;  %v573_v12 = vadd.s32 %v571_v0, %v565_v54  ;;  %vm574_vm2 = vc.u32 %v572_v10, %v568_v57 }
  0x89   : > { %v575_v3 = vsel %vm574_vm2, 1, %v4104_v47  ;;  %v589_v14 = vshrl.u32 %v585_v42, 16  ;;  %v595_v9 = vadd.s32 %v593_v55, %v587_v59  ;;  %vm596_vm3 = vc.u32 %v594_v1, %v590_v60 }
  0x8a   : > { %v456_v58 = vsub.s32 %v452_v45, %v455_v6  ;;  %v569_v2 = vshrl.u32 %v564_v51, 16  ;;  %v577_v16 = vadd.s32 %v575_v3, %v573_v12  ;;  %v597_v18 = vsel %vm596_vm3, 1, %v4104_v47 }
  0x8b   : > { %v478_v4 = vsub.s32 4, %v454_v62  ;;  %v591_v20 = vshrl.u32 %v586_v44, 16  ;;  %v599_v22 = vadd.s32 %v597_v18, %v595_v9  ;;  %v676_v25 = vsel %vm675_vm15, %v674_v33, 0 }
  0x8c   : > { %vm457_vm4 = vcmp.lt.s32.totalorder %v456_v58, 0  ;;  %v458_v26 = vsub.s32 0, %v456_v58  ;;  %v578_v27 = vadd.s32 %v577_v16, %v567_v7  ;;  %v4454_v29 = vadd.s32 %v594_v1, %v590_v60 }
  0x8d   : > { %vm356_vm5 = vcmp.lt.s32.totalorder %v4303_v37, 0  ;;  %v548_v35 = vsel %vm542_vm12, %v545_v41, %v547_v63  ;;  %v600_v36 = vadd.s32 %v599_v22, %v589_v14  ;;  %v671_v42 = vand.u32 8388607, %v664_v52 }
  0x8e   : > { %v459_v39 = vsel %vm457_vm4, %v458_v26, %v456_v58  ;;  %v4459_v5 = vadd.s32 %v578_v27, %v569_v2  ;;  %v678_v44 = vand.u32 31, %v676_v25  ;;  %v479_v33 = vsel %vm356_vm5, %v478_v4, %v454_v62 }
  0x8f   : > { %v460_v45 = vclz %v459_v39  ;;  %v601_v48 = vadd.s32 %v600_v36, %v591_v20  ;;  %v602_v23 = vmul.u32 %v4335_v24, %v548_v35  ;;  %vm4470_vm7 = vcmp.le.f32.partialorder %v354_v43, 0.7853982 }
  0x90   : > { %vm604_vm6 = vc.u32 %v4459_v5, %v4454_v29  ;;  %v448_v28 = vadd.s32 %v4403_v61, %v4417_v8  ;;  %v481_v53 = vsel %vm4470_vm7, 0, %v479_v33  ;;  %v672_v11 = vor.u32 8388608, %v671_v42 }
  0x91   : > { %v3648_v50 = vadd.s32 4294967294, %v460_v45  ;;  %v605_v51 = vadd.s32 1, %v601_v48  ;;  %v679_v54 = vsub.s32 32, %v678_v44  ;;  %v4478_v56 = vshrl.u32 %v676_v25, 5 }
  0x92   : > { %v681_v41 = vshll.u32 %v4098_v13, %v678_v44  ;;  %v684_v59 = vshll.u32 %v4099_v15, %v678_v44  ;;  %v687_v60 = vshll.u32 %v4100_v17, %v678_v44  ;;  %v690_v8 = vshll.u32 %v6537_v19, %v678_v44 }
  0x93   : > { %vm3649_vm8 = vcmp.lt.s32.totalorder %v3648_v50, 0  ;;  %v606_v24 = vsel %vm604_vm6, %v605_v51, %v601_v48  ;;  %v682_v0 = vshrl.u32 %v4099_v15, %v679_v54  ;;  %v685_v55 = vshrl.u32 %v4100_v17, %v679_v54 }
  0x94   : > { %v463_v43 = vsel %vm3649_vm8, 0, %v3648_v50  ;;  %v607_v57 = vadd.s32 %v606_v24, %v602_v23  ;;  %v688_v1 = vshrl.u32 %v6537_v19, %v679_v54  ;;  %v691_v12 = vshrl.u32 %v4102_v21, %v679_v54 }
  0x95   : > { %v464_v62 = vsub.s32 32, %v463_v43  ;;  %v465_v10 = vshll.u32 %v456_v58, %v463_v43  ;;  %v468_v61 = vsub.s32 4294967266, %v463_v43  ;;  %v693_v3 = vshll.u32 %v4102_v21, %v678_v44 }
  0x96   : > { %v608_v63 = vadd.s32 536870912, %v607_v57  ;;  %v694_v9 = vshrl.u32 %v6535_v32, %v679_v54  ;;  %vm696_vm9 = vcmp.lt.s32.totalorder %v4478_v56, 1  ;;  %v4491_v58 = vshll.u32 %v672_v11, 8 }
  0x97   : > { %v466_v6 = vshrl.u32 %v448_v28, %v464_v62  ;;  %v469_v7 = vadd.s32 127, %v468_v61  ;;  %v692_v18 = vor.u32 %v691_v12, %v690_v8  ;;  %vm699_vm10 = vcmp.lt.s32.totalorder %v4478_v56, 4 }
  0x98   : > { %v609_v14 = vshrl.u32 %v608_v63, 30  ;;  %vm511_vm11 = vcmp.lt.s32.totalorder %v4307_v38, 0  ;;  %v683_v20 = vor.u32 %v682_v0, %v681_v41  ;;  %v686_v22 = vor.u32 %v685_v55, %v684_v59 }
  0x99   : > { %v467_v2 = vor.u32 %v466_v6, %v465_v10  ;;  %v470_v16 = vshll.u32 %v469_v7, 23  ;;  %v689_v25 = vor.u32 %v688_v1, %v687_v60  ;;  %v695_v35 = vor.u32 %v694_v9, %v693_v3 }
  0x9a   : > { %v610_v4 = vshll.u32 %v609_v14, 30  ;;  %vm698_vm12 = vcmp.lt.s32.totalorder %v4478_v56, 3  ;;  %vm697_vm13 = vcmp.lt.s32.totalorder %v4478_v56, 2  ;;  %v705_v39 = vsel %vm699_vm10, %v692_v18, 920167782 }
  0x9b   : > { %v471_v26 = vor.u32 4788187, %v470_v16  ;;  %v474_v27 = vcvt.s32.f32 %v467_v2  ;;  %v713_v42 = vand.u32 65535, %v4491_v58  ;;  %v498_v45 = vadd.s32 3, %v481_v53 }
  0x9c   : > { %v4496_v36 = vsub.s32 %v607_v57, %v610_v4  ;;  %vm4504_vm14 = vcmp.le.f32.partialorder %v509_v46, 0.7853982  ;;  %v633_v48 = vsub.s32 4, %v609_v14  ;;  %v680_v23 = vshrl.u32 %v4098_v13, %v679_v54 }
  0x9d   : > { %v472_v44 = vand.u32 2147483647, %v471_v26  ;;  %v704_v51 = vsel %vm696_vm9, %v683_v20, %v686_v22  ;;  %v706_v28 = vsel %vm698_vm12, %v689_v25, %v705_v39  ;;  %v701_v46 = vsel %vm699_vm10, %v689_v25, 2102212464 }
  0x9e   : > { %vm612_vm15 = vcmp.lt.s32.totalorder %v4496_v36, 0  ;;  %v613_v50 = vsub.s32 0, %v4496_v36  ;;  %v708_v11 = vsel %vm696_vm9, %v686_v22, %v689_v25  ;;  %v709_v54 = vsel %vm699_vm10, %v695_v35, 1326507024 }
  0x9f   : > { %v475_v53 = vmul.f32 %v474_v27, %v472_v44  ;;  %v603_v24 = vadd.s32 %v4454_v29, %v4459_v5  ;;  %v710_v43 = vsel %vm698_vm12, %v692_v18, %v709_v54  ;;  %v714_v57 = vshrl.u32 %v4491_v58, 16 }
  0xa0   : > { %v614_v41 = vsel %vm612_vm15, %v613_v50, %v4496_v36  ;;  %v707_v62 = vsel %vm697_vm13, %v704_v51, %v706_v28  ;;  %v711_v10 = vsel %vm697_vm13, %v708_v11, %v710_v43  ;;  %v700_v61 = vsel %vm696_vm9, %v680_v23, %v683_v20 }
  0xa1   : > { %v476_v59 = vxor.u32 2147483648, %v475_v53  ;;  %v615_v60 = vclz %v614_v41  ;;  %v702_v29 = vsel %vm698_vm12, %v686_v22, %v701_v46  ;;  %v715_v5 = vand.u32 65535, %v711_v10 }
  0xa2   : > { %v716_v8 = vshrl.u32 %v711_v10, 16  ;;  %v4537_v0 = vand.u32 3, %v498_v45  ;;  %v4541_v1 = vsel %vm511_vm11, %v633_v48, %v609_v14  ;;  %v737_v12 = vand.u32 65535, %v707_v62 }
  0xa3   : > { %v477_v63 = vsel %vm356_vm5, %v476_v59, %v475_v53  ;;  %v3651_v55 = vadd.s32 4294967294, %v615_v60  ;;  %v738_v3 = vshrl.u32 %v707_v62, 16  ;;  %v4552_v2 = vsel %vm697_vm13, %v700_v61, %v702_v29 }
  0xa4   : > { %v4546_v6 = vsel %vm4470_vm7, %v4303_v37, %v477_v63  ;;  %v718_v7 = vmul.u32 %v716_v8, %v713_v42  ;;  %v717_v16 = vmul.u32 %v715_v5, %v713_v42  ;;  %v636_v14 = vsel %vm4504_vm14, 0, %v4541_v1 }
  0xa5   : > { %v482_v9 = vmul.f32 %v4546_v6, %v4546_v6  ;;  %vm3652_vm0 = vcmp.lt.s32.totalorder %v3651_v55, 0  ;;  %v4557_v49 = vmul.u32 %v715_v5, %v714_v57  ;;  %v720_v35 = vmul.u32 %v716_v8, %v714_v57 }
  0xa6   : > { %v618_v18 = vsel %vm3652_vm0, 0, %v3651_v55  ;;  %v721_v4 = vshll.u32 %v718_v7, 16  ;;  %v739_v39 = vmul.u32 %v737_v12, %v713_v42  ;;  %v4560_v56 = vmul.u32 %v738_v3, %v713_v42 }
  0xa7   : > { %v483_v20 = vmul.f32 -0.001358992, %v482_v9  ;;  %v490_v22 = vmul.f32 -0.00019511016, %v482_v9  ;;  %v619_v25 = vsub.s32 32, %v618_v18  ;;  %v620_v26 = vshll.u32 %v4496_v36, %v618_v18 }
  0xa8   : > { %v623_v27 = vsub.s32 4294967266, %v618_v18  ;;  %vm725_vm1 = vc.u32 %v717_v16, %v721_v4  ;;  %vm504_vm2 = vcmp.eq.s32.totalorder %v4537_v0, 2  ;;  %v723_v50 = vshll.u32 %v4557_v49, 16 }
  0xa9   : > { %v484_v44 = vadd.f32 0.041655596, %v483_v20  ;;  %v491_v45 = vadd.f32 0.008332121, %v490_v22  ;;  %v621_v48 = vshrl.u32 %v603_v24, %v619_v25  ;;  %v4564_v51 = vmul.u32 %v737_v12, %v714_v57 }
  0xaa   : > { %v624_v23 = vadd.s32 127, %v623_v27  ;;  %v742_v28 = vmul.u32 %v738_v3, %v714_v57  ;;  %v726_v11 = vsel %vm725_vm1, 1, %v4104_v47  ;;  %vm501_vm3 = vcmp.eq.s32.totalorder %v4537_v0, 0 }
  0xab   : > { %v485_v53 = vmul.f32 %v484_v44, %v482_v9  ;;  %v492_v46 = vmul.f32 %v491_v45, %v482_v9  ;;  %v622_v36 = vor.u32 %v621_v48, %v620_v26  ;;  %v727_v54 = vadd.s32 %v721_v4, %v717_v16  ;;  %v323_v4 = vld [vmem:[%s4278_s30] sm:$0xff] }
  0xac   : > { %v625_v42 = vshll.u32 %v624_v23, 23  ;;  %v728_v41 = vadd.s32 %v726_v11, %v720_v35  ;;  %v743_v24 = vshll.u32 %v4560_v56, 16  ;;  %vm500_vm4 = vcmp.lt.s32.totalorder %v4537_v0, 2 }
  0xad   : > { %v486_v43 = vadd.f32 -0.4999988, %v485_v53  ;;  %v493_v59 = vadd.f32 -0.16666654, %v492_v46  ;;  %v722_v60 = vshrl.u32 %v718_v7, 16  ;;  %vm331_vm5 = vcmask 1041408  }
  0xae   : > { %v626_v62 = vor.u32 4788187, %v625_v42  ;;  %v629_v57 = vcvt.s32.f32 %v622_v36  ;;  %vm729_vm6 = vc.u32 %v727_v54, %v723_v50  ;;  %v745_v10 = vshll.u32 %v4564_v51, 16  ;;  %v1362_v46 = vld [vmem:[#allocation9 + $0x88] sm:$0xff]  ;;  %v1361_v36 = vld [vmem:[#allocation9 + $0x80] sm:$0xff] }
  0xaf   : > { %v487_v61 = vmul.f32 %v486_v43, %v482_v9  ;;  %v494_v29 = vmul.f32 %v493_v59, %v482_v9  ;;  %v724_v5 = vshrl.u32 %v4557_v49, 16  ;;  %v730_v8 = vsel %vm729_vm6, 1, %v4104_v47  ;;  %v324_v9 = vld [vmem:[%s4278_s30 + $0x8] sm:$0xff]  ;;  %1443 = vmatpush.msra.mxu1 %v1362_v46 }
  0xb0   : > { %v627_v63 = vand.u32 2147483647, %v626_v62  ;;  %v732_v55 = vadd.s32 %v730_v8, %v728_v41  ;;  %vm747_vm7 = vc.u32 %v739_v39, %v743_v24  ;;  %v749_v12 = vadd.s32 %v743_v24, %v739_v39 }
  0xb1   : > { %v488_v3 = vadd.f32 1.0, %v487_v61  ;;  %v495_v7 = vadd.f32 1.0, %v494_v29  ;;  %v744_v16 = vshrl.u32 %v4560_v56, 16  ;;  %v748_v18 = vsel %vm747_vm7, 1, %v4104_v47  ;;  %1444 = vmatpush.msra.mxu1 %v1361_v36 }
  0xb2   : > { %v630_v20 = vmul.f32 %v629_v57, %v627_v63  ;;  %v733_v22 = vadd.s32 %v732_v55, %v722_v60  ;;  %v750_v25 = vadd.s32 %v748_v18, %v742_v28  ;;  %vm751_vm8 = vc.u32 %v749_v12, %v745_v10  ;;  %v328_v28 = vld [vmem:[#allocation2 + $0x8] sm:$0x3] }
  0xb3   : > { %v496_v49 = vmul.f32 %v495_v7, %v4546_v6  ;;  %v505_v26 = vxor.u32 2147483648, %v488_v3  ;;  %v746_v27 = vshrl.u32 %v4564_v51, 16  ;;  %v752_v35 = vsel %vm751_vm8, 1, %v4104_v47  ;;  %v1345_v51 = vld [vmem:[#allocation9] sm:$0xff] }
  0xb4   : > { %v631_v39 = vxor.u32 2147483648, %v630_v20  ;;  %v4580_v44 = vadd.s32 %v749_v12, %v745_v10  ;;  %v754_v45 = vadd.s32 %v752_v35, %v750_v25  ;;  %v332_v56 = vrot.slane %v323_v4, 6  ;;  %1412 = vmatpush.msra.mxu0 %v1345_v51 }
  0xb5   : > { %v502_v48 = vxor.u32 2147483648, %v496_v49  ;;  %v506_v23 = vsel %vm504_vm2, %v505_v26, %v496_v49  ;;  %v4584_v50 = vadd.s32 %v733_v22, %v724_v5  ;;  %v4586_v53 = vrot.slane %v324_v9, 6 }
  0xb6   : > { %vm497_vm9 = vweird.f32 %v4303_v37  ;;  %v632_v6 = vsel %vm511_vm11, %v631_v39, %v630_v20  ;;  %v755_v11 = vadd.s32 %v754_v45, %v744_v16  ;;  %v757_v42 = vmul.u32 %v4491_v58, %v4552_v2  ;;  %v4605_v2 = vld [vmem:[#allocation8] ss:$0 sm:$0xff] }
  0xb7   : > { %v503_v54 = vsel %vm501_vm3, %v488_v3, %v502_v48  ;;  %v635_v41 = vsel %vm4504_vm14, %v4307_v38, %v632_v6  ;;  %v653_v24 = vadd.s32 3, %v636_v14  ;;  %342 = vst [vmem:[#allocation2 + $0x8] sm:$0x3] %v4586_v53  ;;  %v4608_v60 = vsel %vm331_vm5, %v328_v28, %v332_v56 }
  0xb8   : > { %v507_v43 = vsel %vm500_vm4, %v503_v54, %v506_v23  ;;  %v637_v58 = vmul.f32 %v635_v41, %v635_v41  ;;  %v756_v59 = vadd.s32 %v755_v11, %v746_v27  ;;  %vm759_vm10 = vc.u32 %v4584_v50, %v4580_v44  ;;  %340 = vst [vmem:[#allocation2] sm:$0xff] %v4608_v60 }
  0xb9   : > { %v508_v33 = vsel %vm497_vm9, nan, %v507_v43  ;;  %v4617_v0 = vmul.f32 %v4299_v34, %v4608_v60  ;;  %v334_v1 = vsel %vm331_vm5, %v332_v56, %v4586_v53  ;;  %v654_v16 = vand.u32 3, %v653_v24 }
  0xba   : > { %v638_v14 = vmul.f32 -0.001358992, %v637_v58  ;;  %v645_v62 = vmul.f32 -0.00019511016, %v637_v58  ;;  %v1284_v57 = vmul.f32 %v508_v33, %v508_v33  ;;  %v760_v10 = vadd.s32 1, %v756_v59  ;;  %341 = vst [vmem:[#allocation2 + $0x18] sm:$0xff] %v334_v1 }
  0xbb   : > { %v819_v37 = vand.u32 2147483647, %v4617_v0  ;;  %v822_v61 = vand.u32 2139095040, %v4617_v0  ;;  %v4631_v49 = vmul.f32 %v4299_v34, %v334_v1  ;;  %vm652_vm11 = vweird.f32 %v4307_v38 }
  0xbc   : > { %v639_v29 = vadd.f32 0.041655596, %v638_v14  ;;  %v646_v5 = vadd.f32 0.008332121, %v645_v62  ;;  %v1293_v8 = vmul.f32 %v4605_v2, %v1284_v57  ;;  %v761_v63 = vsel %vm759_vm10, %v760_v10, %v756_v59 }
  0xbd   : > { %v762_v55 = vadd.s32 %v761_v63, %v757_v42  ;;  %v823_v12 = vshrl.u32 %v822_v61, 23  ;;  %v826_v22 = vand.u32 8388607, %v819_v37  ;;  %vm655_vm12 = vcmp.lt.s32.totalorder %v654_v16, 2 }
  0xbe   : > { %v640_v3 = vmul.f32 %v639_v29, %v637_v58  ;;  %v647_v7 = vmul.f32 %v646_v5, %v637_v58  ;;  %v4625_v18 = vadd.f32 %v1293_v8, %v4295_v30  ;;  %v974_v30 = vand.u32 2147483647, %v4631_v49 }
  0xbf   : > { %v763_v4 = vadd.s32 536870912, %v762_v55  ;;  %v3656_v20 = vadd.s32 4294967169, %v823_v12  ;;  %vm656_vm13 = vcmp.eq.s32.totalorder %v654_v16, 0  ;;  %v827_v56 = vor.u32 8388608, %v826_v22 }
  0xc0   : > { %v641_v25 = vadd.f32 -0.4999988, %v640_v3  ;;  %v648_v9 = vadd.f32 -0.16666654, %v647_v7  ;;  %1413 = vmatmul.f32.vlgmr.msra.gmra.mxu0 %v4625_v18  ;;  %vm666_vm15 = vcmp.lt.s32.totalorder %v4310_v40, 0  ;;  %v977_v34 = vand.u32 2139095040, %v4631_v49 }
  0xc1   : > { %v764_v26 = vshrl.u32 %v763_v4, 30  ;;  %v829_v27 = vadd.s32 1, %v3656_v20  ;;  %vm659_vm0 = vcmp.eq.s32.totalorder %v654_v16, 2  ;;  %v758_v6 = vadd.s32 %v4580_v44, %v4584_v50 }
  0xc2   : > { %v642_v35 = vmul.f32 %v641_v25, %v637_v58  ;;  %v649_v39 = vmul.f32 %v648_v9, %v637_v58  ;;  %v1329_v42 = vrot.slane %v4625_v18, 2  ;;  %v4644_v54 = vand.u32 8388607, %v974_v30 }
  0xc3   : > { %v765_v45 = vshll.u32 %v764_v26, 30  ;;  %vm830_vm14 = vcmp.gt.s32.totalorder %v829_v27, 0  ;;  %v4650_v58 = vshll.u32 %v827_v56, 8  ;;  %v1312_v59 = vrot.slane %v4625_v18, 1 }
  0xc4   : > { %v643_v48 = vadd.f32 1.0, %v642_v35  ;;  %v650_v23 = vadd.f32 1.0, %v649_v39  ;;  %v831_v28 = vsel %vm830_vm14, %v829_v27, 0  ;;  %vm4655_vm2 = vcmp.le.f32.partialorder %v664_v52, 0.7853982 }
  0xc5   : > { %v4639_v51 = vsub.s32 %v762_v55, %v765_v45  ;;  %v833_v46 = vand.u32 31, %v831_v28  ;;  %v978_v33 = vshrl.u32 %v977_v34, 23  ;;  %v788_v14 = vsub.s32 4, %v764_v26 }
  0xc6   : > { %v651_v36 = vmul.f32 %v650_v23, %v635_v41  ;;  %v660_v11 = vxor.u32 2147483648, %v643_v48  ;;  %vm1328_vm3 = vcmask 1045504   ;;  %vm1311_vm4 = vcmask 1046528  }
  0xc7   : > { %vm767_vm1 = vcmp.lt.s32.totalorder %v4639_v51, 0  ;;  %v768_v24 = vsub.s32 0, %v4639_v51  ;;  %v4648_v43 = vsub.s32 32, %v833_v46  ;;  %v836_v62 = vshll.u32 %v4098_v13, %v833_v46 }
  0xc8   : > { %v657_v44 = vxor.u32 2147483648, %v651_v36  ;;  %v661_v50 = vsel %vm659_vm0, %v660_v11, %v651_v36  ;;  %v839_v57 = vshll.u32 %v4099_v15, %v833_v46  ;;  %v845_v8 = vshll.u32 %v6537_v19, %v833_v46 }
  0xc9   : > { %v769_v1 = vsel %vm767_vm1, %v768_v24, %v4639_v51  ;;  %v837_v29 = vshrl.u32 %v4099_v15, %v4648_v43  ;;  %v840_v52 = vshrl.u32 %v4100_v17, %v4648_v43  ;;  %v846_v63 = vshrl.u32 %v4102_v21, %v4648_v43 }
  0xca   : > { %v658_v10 = vsel %vm656_vm13, %v643_v48, %v657_v44  ;;  %v770_v61 = vclz %v769_v1  ;;  %v4672_v55 = vand.u32 65535, %v4650_v58  ;;  %v4676_v7 = vshrl.u32 %v831_v28, 5 }
  0xcb   : > { %v662_v5 = vsel %vm655_vm12, %v658_v10, %v661_v50  ;;  %v4679_v4 = vshrl.u32 %v4650_v58, 16  ;;  %v789_v16 = vsel %vm666_vm15, %v788_v14, %v764_v26  ;;  %v842_v22 = vshll.u32 %v4100_v17, %v833_v46 }
  0xcc   : > { %v663_v12 = vsel %vm652_vm11, nan, %v662_v5  ;;  %v3654_v3 = vadd.s32 4294967294, %v770_v61  ;;  %v843_v25 = vshrl.u32 %v6537_v19, %v4648_v43  ;;  %v838_v9 = vor.u32 %v837_v29, %v836_v62 }
  0xcd   : > { %v1285_v20 = vmul.f32 %v663_v12, %v663_v12  ;;  %v841_v27 = vor.u32 %v840_v52, %v839_v57  ;;  %v848_v38 = vshll.u32 %v4102_v21, %v833_v46  ;;  %v847_v45 = vor.u32 %v846_v63, %v845_v8 }
  0xce   : > { %vm3655_vm6 = vcmp.lt.s32.totalorder %v3654_v3, 0  ;;  %v849_v56 = vshrl.u32 %v6535_v32, %v4648_v43  ;;  %vm851_vm7 = vcmp.lt.s32.totalorder %v4676_v7, 1  ;;  %v791_v34 = vsel %vm4655_vm2, 0, %v789_v16 }
  0xcf   : > { %v1294_v35 = vmul.f32 %v4605_v2, %v1285_v20  ;;  %v773_v39 = vsel %vm3655_vm6, 0, %v3654_v3  ;;  %v844_v46 = vor.u32 %v843_v25, %v842_v22  ;;  %vm852_vm8 = vcmp.lt.s32.totalorder %v4676_v7, 2 }
  0xd0   : > { %v774_v48 = vsub.s32 32, %v773_v39  ;;  %v775_v26 = vshll.u32 %v4639_v51, %v773_v39  ;;  %v778_v23 = vsub.s32 4294967266, %v773_v39  ;;  %vm853_vm9 = vcmp.lt.s32.totalorder %v4676_v7, 3 }
  0xd1   : > { %v4693_v28 = vadd.f32 %v1294_v35, %v4297_v31  ;;  %vm854_vm10 = vcmp.lt.s32.totalorder %v4676_v7, 4  ;;  %v850_v31 = vor.u32 %v849_v56, %v848_v38  ;;  %v859_v44 = vsel %vm851_vm7, %v838_v9, %v841_v27 }
  0xd2   : > { %v776_v36 = vshrl.u32 %v758_v6, %v774_v48  ;;  %v779_v11 = vadd.s32 127, %v778_v23  ;;  %v860_v6 = vsel %vm854_vm10, %v847_v45, 920167782  ;;  %v3659_v14 = vadd.s32 4294967169, %v978_v33 }
  0xd3   : > { %v1330_v51 = vrot.slane %v4693_v28, 2  ;;  %v1313_v24 = vrot.slane %v4693_v28, 1  ;;  %1416 = vmatmul.f32.gmra.mxu0 %v4693_v28  ;;  %v808_v10 = vadd.s32 3, %v791_v34  ;;  %v861_v61 = vsel %vm853_vm9, %v844_v46, %v860_v6 }
  0xd4   : > { %v777_v50 = vor.u32 %v776_v36, %v775_v26  ;;  %v780_v1 = vshll.u32 %v779_v11, 23  ;;  %v862_v33 = vsel %vm852_vm8, %v859_v44, %v861_v61  ;;  %v863_v18 = vsel %vm851_vm7, %v841_v27, %v844_v46 }
  0xd5   : > { %v1331_v62 = vsel %vm1328_vm3, %v1329_v42, %v1330_v51  ;;  %v1314_v57 = vsel %vm1311_vm4, %v1312_v59, %v1313_v24  ;;  %v835_v42 = vshrl.u32 %v4098_v13, %v4648_v43  ;;  %v864_v59 = vsel %vm854_vm10, %v850_v31, 1326507024 }
  0xd6   : > { %1477 = vmatmul.f32.vlgmr.msra.gmra.mxu2 %v1331_v62  ;;  %1445 = vmatmul.f32.vlgmr.msra.gmra.mxu1 %v1314_v57  ;;  %v781_v29 = vor.u32 4788187, %v780_v1  ;;  %v784_v52 = vcvt.s32.f32 %v777_v50  ;;  %v892_v5 = vand.u32 65535, %v862_v33  ;;  %v893_v8 = vshrl.u32 %v862_v33, 16 }
  0xd7   : > { %v856_v12 = vsel %vm854_vm10, %v844_v46, 2102212464  ;;  %v865_v3 = vsel %vm853_vm9, %v847_v45, %v864_v59  ;;  %v982_v20 = vor.u32 8388608, %v4644_v54  ;;  %v4735_v35 = vand.u32 3, %v808_v10 }
  0xd8   : > { %v782_v63 = vand.u32 2147483647, %v781_v29  ;;  %v866_v16 = vsel %vm852_vm8, %v863_v18, %v865_v3  ;;  %v894_v22 = vmul.u32 %v892_v5, %v4672_v55  ;;  %v895_v43 = vmul.u32 %v893_v8, %v4672_v55 }
  0xd9   : > { %v896_v25 = vmul.u32 %v892_v5, %v4679_v4  ;;  %v870_v39 = vand.u32 65535, %v866_v16  ;;  %v871_v56 = vshrl.u32 %v866_v16, 16  ;;  %v855_v48 = vsel %vm851_vm7, %v835_v42, %v838_v9 }
  0xda   : > { %v785_v38 = vmul.f32 %v784_v52, %v782_v63  ;;  %v857_v45 = vsel %vm853_vm9, %v841_v27, %v856_v12  ;;  %v898_v26 = vshll.u32 %v895_v43, 16  ;;  %v984_v23 = vadd.s32 1, %v3659_v14 }
  0xdb   : > { %v872_v46 = vmul.u32 %v870_v39, %v4672_v55  ;;  %v873_v36 = vmul.u32 %v871_v56, %v4672_v55  ;;  %v874_v11 = vmul.u32 %v870_v39, %v4679_v4  ;;  %v897_v31 = vmul.u32 %v893_v8, %v4679_v4 }
  0xdc   : > { %v786_v34 = vxor.u32 2147483648, %v785_v38  ;;  %v900_v44 = vshll.u32 %v896_v25, 16  ;;  %vm902_vm11 = vc.u32 %v894_v22, %v898_v26  ;;  %v904_v50 = vadd.s32 %v898_v26, %v894_v22 }
  0xdd   : > { %v875_v1 = vmul.u32 %v871_v56, %v4679_v4  ;;  %v876_v27 = vshll.u32 %v873_v36, 16  ;;  %v899_v6 = vshrl.u32 %v895_v43, 16  ;;  %v878_v62 = vshll.u32 %v874_v11, 16 }
  0xde   : > { %v787_v9 = vsel %vm666_vm15, %v786_v34, %v785_v38  ;;  %v901_v55 = vshrl.u32 %v896_v25, 16  ;;  %vm985_vm12 = vcmp.gt.s32.totalorder %v984_v23, 0  ;;  %v903_v61 = vsel %vm902_vm11, 1, %v4104_v47 }
  0xdf   : > { %v790_v14 = vsel %vm4655_vm2, %v4310_v40, %v787_v9  ;;  %vm880_vm13 = vc.u32 %v872_v46, %v876_v27  ;;  %v882_v10 = vadd.s32 %v876_v27, %v872_v46  ;;  %v877_v29 = vshrl.u32 %v873_v36, 16 }
  0xe0   : > { %v792_v57 = vmul.f32 %v790_v14, %v790_v14  ;;  %v881_v52 = vsel %vm880_vm13, 1, %v4104_v47  ;;  %v905_v33 = vadd.s32 %v903_v61, %v897_v31  ;;  %vm906_vm14 = vc.u32 %v904_v50, %v900_v44 }
  0xe1   : > { %v883_v42 = vadd.s32 %v881_v52, %v875_v1  ;;  %vm884_vm15 = vc.u32 %v882_v10, %v878_v62  ;;  %v879_v59 = vshrl.u32 %v874_v11, 16  ;;  %v907_v5 = vsel %vm906_vm14, 1, %v4104_v47 }
  0xe2   : > { %v793_v4 = vmul.f32 -0.001358992, %v792_v57  ;;  %v800_v18 = vmul.f32 -0.00019511016, %v792_v57  ;;  %v885_v41 = vsel %vm884_vm15, 1, %v4104_v47  ;;  %v986_v8 = vsel %vm985_vm12, %v984_v23, 0 }
  0xe3   : > { %v887_v3 = vadd.s32 %v885_v41, %v883_v42  ;;  %v909_v16 = vadd.s32 %v907_v5, %v905_v33  ;;  %vm814_vm0 = vcmp.eq.s32.totalorder %v4735_v35, 2  ;;  %v858_v22 = vsel %vm852_vm8, %v855_v48, %v857_v45 }
  0xe4   : > { %v794_v63 = vadd.f32 0.041655596, %v793_v4  ;;  %v801_v12 = vadd.f32 0.008332121, %v800_v18  ;;  %v4759_v43 = vadd.s32 %v904_v50, %v900_v44  ;;  %v988_v25 = vand.u32 31, %v986_v8 }
  0xe5   : > { %v888_v56 = vadd.s32 %v887_v3, %v877_v29  ;;  %v910_v26 = vadd.s32 %v909_v16, %v899_v6  ;;  %vm810_vm1 = vcmp.lt.s32.totalorder %v4735_v35, 2  ;;  %v4769_v45 = vshrl.u32 %v986_v8, 5 }
  0xe6   : > { %v795_v38 = vmul.f32 %v794_v63, %v792_v57  ;;  %v802_v39 = vmul.f32 %v801_v12, %v792_v57  ;;  %v4761_v34 = vsub.s32 32, %v988_v25  ;;  %v991_v23 = vshll.u32 %v4098_v13, %v988_v25 }
  0xe7   : > { %v994_v46 = vshll.u32 %v4099_v15, %v988_v25  ;;  %v997_v36 = vshll.u32 %v4100_v17, %v988_v25  ;;  %v4767_v7 = vadd.s32 %v888_v56, %v879_v59  ;;  %v911_v48 = vadd.s32 %v910_v26, %v901_v55 }
  0xe8   : > { %v796_v11 = vadd.f32 -0.4999988, %v795_v38  ;;  %v803_v31 = vadd.f32 -0.16666654, %v802_v39  ;;  %v992_v44 = vshrl.u32 %v4099_v15, %v4761_v34  ;;  %v995_v50 = vshrl.u32 %v4100_v17, %v4761_v34 }
  0xe9   : > { %v998_v9 = vshrl.u32 %v6537_v19, %v4761_v34  ;;  %v912_v6 = vmul.u32 %v4650_v58, %v858_v22  ;;  %vm914_vm2 = vc.u32 %v4767_v7, %v4759_v43  ;;  %v915_v62 = vadd.s32 1, %v911_v48 }
  0xea   : > { %v797_v1 = vmul.f32 %v796_v11, %v792_v57  ;;  %v804_v27 = vmul.f32 %v803_v31, %v792_v57  ;;  %v4780_v55 = vor.u32 %v992_v44, %v991_v23  ;;  %v4782_v10 = vor.u32 %v995_v50, %v994_v46 }
  0xeb   : > { %v4784_v61 = vor.u32 %v998_v9, %v997_v36  ;;  %v1000_v33 = vshll.u32 %v6537_v19, %v988_v25  ;;  %v1001_v4 = vshrl.u32 %v4102_v21, %v4761_v34  ;;  %v916_v57 = vsel %vm914_vm2, %v915_v62, %v911_v48 }
  0xec   : > { %v798_v29 = vadd.f32 1.0, %v797_v1  ;;  %v805_v52 = vadd.f32 1.0, %v804_v27  ;;  %v1003_v58 = vshll.u32 %v4102_v21, %v988_v25  ;;  %v1004_v18 = vshrl.u32 %v6535_v32, %v4761_v34 }
  0xed   : > { %vm1006_vm6 = vcmp.lt.s32.totalorder %v4769_v45, 1  ;;  %v917_v41 = vadd.s32 %v916_v57, %v912_v6  ;;  %v1002_v5 = vor.u32 %v1001_v4, %v1000_v33  ;;  %vm811_vm7 = vcmp.eq.s32.totalorder %v4735_v35, 0 }
  0xee   : > { %v806_v42 = vmul.f32 %v805_v52, %v790_v14  ;;  %v815_v59 = vxor.u32 2147483648, %v798_v29  ;;  %v1005_v8 = vor.u32 %v1004_v18, %v1003_v58  ;;  %vm1008_vm8 = vcmp.lt.s32.totalorder %v4769_v45, 3 }
  0xef   : > { %vm1009_vm9 = vcmp.lt.s32.totalorder %v4769_v45, 4  ;;  %v918_v3 = vadd.s32 536870912, %v917_v41  ;;  %vm1007_vm10 = vcmp.lt.s32.totalorder %v4769_v45, 2  ;;  %vm807_vm11 = vweird.f32 %v4310_v40 }
  0xf0   : > { %v812_v63 = vxor.u32 2147483648, %v806_v42  ;;  %v816_v12 = vsel %vm814_vm0, %v815_v59, %v806_v42  ;;  %v1014_v14 = vsel %vm1006_vm6, %v4780_v55, %v4782_v10  ;;  %v1015_v16 = vsel %vm1009_vm9, %v1002_v5, 920167782 }
  0xf1   : > { %v4808_v22 = vshll.u32 %v982_v20, 8  ;;  %v4810_v38 = vshrl.u32 %v918_v3, 30  ;;  %v1016_v39 = vsel %vm1008_vm8, %v4784_v61, %v1015_v16  ;;  %v1018_v40 = vsel %vm1006_vm6, %v4782_v10, %v4784_v61 }
  0xf2   : > { %v813_v25 = vsel %vm811_vm7, %v798_v29, %v812_v63  ;;  %v1017_v54 = vsel %vm1007_vm10, %v1014_v14, %v1016_v39  ;;  %v1019_v20 = vsel %vm1009_vm9, %v1005_v8, 1326507024  ;;  %v3855_v29 = vld [vmem:[#allocation2 + $0x10] sm:$0xff]  ;;  %v913_v16 = vadd.s32 %v4759_v43, %v4767_v7 }
  0xf3   : > { %v817_v56 = vsel %vm810_vm1, %v813_v25, %v816_v12  ;;  %v920_v23 = vshll.u32 %v4810_v38, 30  ;;  %v1020_v46 = vsel %vm1008_vm8, %v1002_v5, %v1019_v20  ;;  %v1024_v36 = vshrl.u32 %v4808_v22, 16 }
  0xf4   : > { %v818_v26 = vsel %vm807_vm11, nan, %v817_v56  ;;  %v1021_v31 = vsel %vm1007_vm10, %v1018_v40, %v1020_v46  ;;  %v1023_v35 = vand.u32 65535, %v4808_v22  ;;  %v1048_v50 = vshrl.u32 %v1017_v54, 16 }
  0xf5   : > { %v1286_v11 = vmul.f32 %v818_v26, %v818_v26  ;;  %v921_v48 = vsub.s32 %v917_v41, %v920_v23  ;;  %v1025_v44 = vand.u32 65535, %v1021_v31  ;;  %v1026_v1 = vshrl.u32 %v1021_v31, 16 }
  0xf6   : > { %v1047_v62 = vand.u32 65535, %v1017_v54  ;;  %v1050_v18 = vmul.u32 %v1048_v50, %v1023_v35  ;;  %v1052_v28 = vmul.u32 %v1048_v50, %v1024_v36  ;;  %v990_v43 = vshrl.u32 %v4098_v13, %v4761_v34 }
  0xf7   : > { %v1295_v9 = vmul.f32 %v4605_v2, %v1286_v11  ;;  %vm922_vm12 = vcmp.lt.s32.totalorder %v921_v48, 0  ;;  %v923_v27 = vsub.s32 0, %v921_v48  ;;  %v4833_v6 = vmul.u32 %v1025_v44, %v1024_v36 }
  0xf8   : > { %v1027_v33 = vmul.u32 %v1025_v44, %v1023_v35  ;;  %v1028_v4 = vmul.u32 %v1026_v1, %v1023_v35  ;;  %v1030_v58 = vmul.u32 %v1026_v1, %v1024_v36  ;;  %v1051_v63 = vmul.u32 %v1047_v62, %v1024_v36 }
  0xf9   : > { %v4835_v52 = vadd.f32 %v3855_v29, %v1295_v9  ;;  %v924_v57 = vsel %vm922_vm12, %v923_v27, %v921_v48  ;;  %v1033_v8 = vshll.u32 %v4833_v6, 16  ;;  %v1049_v40 = vmul.u32 %v1047_v62, %v1023_v35  ;;  %v3856_v35 = vld [vmem:[#allocation6] ss:$0 sm:$0xff] }
  0xfa   : > { %v925_v41 = vclz %v924_v57  ;;  %v1031_v5 = vshll.u32 %v1028_v4, 16  ;;  %v1032_v56 = vshrl.u32 %v1028_v4, 16  ;;  %v1053_v54 = vshll.u32 %v1050_v18, 16 }
  0xfb   : > { %v1332_v42 = vrot.slane %v4835_v52, 2  ;;  %v1315_v59 = vrot.slane %v4835_v52, 1  ;;  %1419 = vmatmul.f32.gmra.mxu0 %v4835_v52  ;;  %v1055_v26 = vshll.u32 %v1051_v63, 16  ;;  %v1011_v7 = vsel %vm1009_vm9, %v4784_v61, 2102212464 }
  0xfc   : > { %v3657_v14 = vadd.s32 4294967294, %v925_v41  ;;  %vm1035_vm13 = vc.u32 %v1027_v33, %v1031_v5  ;;  %v1037_v39 = vadd.s32 %v1031_v5, %v1027_v33  ;;  %v4861_v44 = vmul.f32 %v3856_v35, %v4586_v53 }
  0xfd   : > { %v1333_v12 = vsel %vm1328_vm3, %v1330_v51, %v1332_v42  ;;  %v1316_v3 = vsel %vm1311_vm4, %v1313_v24, %v1315_v59  ;;  %v1036_v25 = vsel %vm1035_vm13, 1, %v4104_v47  ;;  %vm1057_vm0 = vc.u32 %v1049_v40, %v1053_v54 }
  0xfe   : > { %1480 = vmatmul.f32.gmra.mxu2 %v1333_v12  ;;  %1448 = vmatmul.f32.gmra.mxu1 %v1316_v3  ;;  %vm3658_vm14 = vcmp.lt.s32.totalorder %v3657_v14, 0  ;;  %v1038_v51 = vadd.s32 %v1036_v25, %v1030_v58  ;;  %vm1039_vm15 = vc.u32 %v1037_v39, %v1033_v8  ;;  %v1059_v50 = vadd.s32 %v1053_v54, %v1049_v40 }
  0xff   : > { %v928_v20 = vsel %vm3658_vm14, 0, %v3657_v14  ;;  %v1040_v11 = vsel %vm1039_vm15, 1, %v4104_v47  ;;  %v1054_v27 = vshrl.u32 %v1050_v18, 16  ;;  %v1058_v62 = vsel %vm1057_vm0, 1, %v4104_v47 }
 0x100   : > { %v929_v24 = vsub.s32 32, %v928_v20  ;;  %v930_v23 = vshll.u32 %v921_v48, %v928_v20  ;;  %v933_v46 = vsub.s32 4294967266, %v928_v20  ;;  %v1042_v31 = vadd.s32 %v1040_v11, %v1038_v51 }
 0x101   : > { %v1034_v48 = vshrl.u32 %v4833_v6, 16  ;;  %v1060_v33 = vadd.s32 %v1058_v62, %v1052_v28  ;;  %vm1061_vm1 = vc.u32 %v1059_v50, %v1055_v26  ;;  %v1010_v61 = vsel %vm1006_vm6, %v990_v43, %v4780_v55 }
 0x102   : > { %v931_v9 = vshrl.u32 %v913_v16, %v929_v24  ;;  %v934_v36 = vadd.s32 127, %v933_v46  ;;  %v1043_v1 = vadd.s32 %v1042_v31, %v1032_v56  ;;  %v1012_v4 = vsel %vm1008_vm8, %v4782_v10, %v1011_v7 }
 0x103   : > { %v1062_v57 = vsel %vm1061_vm1, 1, %v4104_v47  ;;  %v1132_v6 = vand.u32 2139095040, %v4861_v44  ;;  %v1056_v41 = vshrl.u32 %v1051_v63, 16  ;;  %v943_v8 = vsub.s32 4, %v4810_v38 }
 0x104   : > { %v932_v34 = vor.u32 %v931_v9, %v930_v23  ;;  %v935_v29 = vshll.u32 %v934_v36, 23  ;;  %v1064_v5 = vadd.s32 %v1062_v57, %v1060_v33  ;;  %v4874_v12 = vadd.s32 %v1043_v1, %v1034_v48 }
 0x105   : > { %v4876_v3 = vadd.s32 %v1059_v50, %v1055_v26  ;;  %v1133_v14 = vshrl.u32 %v1132_v6, 23  ;;  %v1013_v16 = vsel %vm1007_vm10, %v1010_v61, %v1012_v4  ;;  %vm821_vm2 = vcmp.lt.s32.totalorder %v4617_v0, 0 }
 0x106   : > { %v936_v58 = vor.u32 4788187, %v935_v29  ;;  %v939_v18 = vcvt.s32.f32 %v932_v34  ;;  %v1065_v10 = vadd.s32 %v1064_v5, %v1054_v27  ;;  %v944_v63 = vsel %vm821_vm2, %v943_v8, %v4810_v38 }
 0x107   : > { %v3662_v25 = vadd.s32 4294967169, %v1133_v14  ;;  %v1067_v56 = vmul.u32 %v4808_v22, %v1013_v16  ;;  %vm1069_vm6 = vc.u32 %v4874_v12, %v4876_v3  ;;  %vm820_vm7 = vcmp.le.f32.partialorder %v819_v37, 0.7853982 }
 0x108   : > { %v937_v55 = vand.u32 2147483647, %v936_v58  ;;  %v1066_v40 = vadd.s32 %v1065_v10, %v1056_v41  ;;  %v946_v28 = vsel %vm820_vm7, 0, %v944_v63  ;;  %v1129_v37 = vand.u32 2147483647, %v4861_v44 }
 0x109   : > { %v1139_v51 = vadd.s32 1, %v3662_v25  ;;  %v963_v22 = vadd.s32 3, %v946_v28  ;;  %vm962_vm9 = vweird.f32 %v4617_v0 }
 0x10a   : > { %v940_v39 = vmul.f32 %v939_v18, %v937_v55  ;;  %v1070_v45 = vadd.s32 1, %v1066_v40  ;;  %v1136_v18 = vand.u32 8388607, %v1129_v37 }
 0x10b   : > { %vm1140_vm8 = vcmp.gt.s32.totalorder %v1139_v51, 0  ;;  %v964_v33 = vand.u32 3, %v963_v22 }
 0x10c   : > { %v941_v54 = vxor.u32 2147483648, %v940_v39  ;;  %v1071_v26 = vsel %vm1069_vm6, %v1070_v45, %v1066_v40  ;;  %v1141_v24 = vsel %vm1140_vm8, %v1139_v51, 0  ;;  %vm976_vm6 = vcmp.lt.s32.totalorder %v4631_v49, 0 }
 0x10d   : > { %v1072_v46 = vadd.s32 %v1071_v26, %v1067_v56  ;;  %v1143_v38 = vand.u32 31, %v1141_v24  ;;  %v4908_v41 = vshrl.u32 %v1141_v24, 5  ;;  %vm965_vm13 = vcmp.lt.s32.totalorder %v964_v33, 2 }
 0x10e   : > { %v942_v20 = vsel %vm821_vm2, %v941_v54, %v940_v39  ;;  %vm969_vm14 = vcmp.eq.s32.totalorder %v964_v33, 2  ;;  %vm966_vm1 = vcmp.eq.s32.totalorder %v964_v33, 0 }
 0x10f   : > { %v945_v23 = vsel %vm820_vm7, %v4617_v0, %v942_v20  ;;  %v1073_v43 = vadd.s32 536870912, %v1072_v46  ;;  %v4888_v7 = vsub.s32 32, %v1143_v38  ;;  %v1146_v9 = vshll.u32 %v4098_v13, %v1143_v38 }
 0x110   : > { %v947_v11 = vmul.f32 %v945_v23, %v945_v23  ;;  %v1149_v48 = vshll.u32 %v4099_v15, %v1143_v38  ;;  %v1152_v1 = vshll.u32 %v4100_v17, %v1143_v38  ;;  %v1155_v4 = vshll.u32 %v6537_v19, %v1143_v38 }
 0x111   : > { %v4892_v36 = vshrl.u32 %v1073_v43, 30  ;;  %v1147_v50 = vshrl.u32 %v4099_v15, %v4888_v7  ;;  %v1150_v34 = vshrl.u32 %v4100_v17, %v4888_v7  ;;  %v1153_v29 = vshrl.u32 %v6537_v19, %v4888_v7 }
 0x112   : > { %v948_v31 = vmul.f32 -0.001358992, %v947_v11  ;;  %v955_v35 = vmul.f32 -0.00019511016, %v947_v11  ;;  %v1156_v57 = vshrl.u32 %v4102_v21, %v4888_v7  ;;  %v1158_v14 = vshll.u32 %v4102_v21, %v1143_v38 }
 0x113   : > { %v1075_v61 = vshll.u32 %v4892_v36, 30  ;;  %v4910_v8 = vor.u32 %v1147_v50, %v1146_v9  ;;  %v1159_v55 = vshrl.u32 %v6535_v32, %v4888_v7  ;;  %v4915_v25 = vor.u32 %v1150_v34, %v1149_v48 }
 0x114   : > { %v949_v27 = vadd.f32 0.041655596, %v948_v31  ;;  %v956_v62 = vadd.f32 0.008332121, %v955_v35  ;;  %v4917_v39 = vor.u32 %v1153_v29, %v1152_v1  ;;  %v1157_v63 = vor.u32 %v1156_v57, %v1155_v4 }
 0x115   : > { %v1076_v5 = vsub.s32 %v1072_v46, %v1075_v61  ;;  %v1160_v56 = vor.u32 %v1159_v55, %v1158_v14  ;;  %vm1161_vm11 = vcmp.lt.s32.totalorder %v4908_v41, 1  ;;  %vm1164_vm12 = vcmp.lt.s32.totalorder %v4908_v41, 4 }
 0x116   : > { %v950_v6 = vmul.f32 %v949_v27, %v947_v11  ;;  %v957_v58 = vmul.f32 %v956_v62, %v947_v11  ;;  %v1137_v20 = vor.u32 8388608, %v1136_v18  ;;  %vm1163_vm15 = vcmp.lt.s32.totalorder %v4908_v41, 3 }
 0x117   : > { %vm1077_vm10 = vcmp.lt.s32.totalorder %v1076_v5, 0  ;;  %v1078_v40 = vsub.s32 0, %v1076_v5  ;;  %vm1162_vm0 = vcmp.lt.s32.totalorder %v4908_v41, 2  ;;  %v1169_v46 = vsel %vm1161_vm11, %v4910_v8, %v4915_v25 }
 0x118   : > { %v951_v16 = vadd.f32 -0.4999988, %v950_v6  ;;  %v958_v10 = vadd.f32 -0.16666654, %v957_v58  ;;  %v1170_v38 = vsel %vm1164_vm12, %v1157_v63, 920167782  ;;  %v1173_v35 = vsel %vm1161_vm11, %v4915_v25, %v4917_v39 }
 0x119   : > { %v1079_v45 = vsel %vm1077_vm10, %v1078_v40, %v1076_v5  ;;  %v1171_v9 = vsel %vm1163_vm15, %v4917_v39, %v1170_v38  ;;  %v4941_v48 = vshll.u32 %v1137_v20, 8  ;;  %v1068_v27 = vadd.s32 %v4876_v3, %v4874_v12 }
 0x11a   : > { %v952_v51 = vmul.f32 %v951_v16, %v947_v11  ;;  %v959_v54 = vmul.f32 %v958_v10, %v947_v11  ;;  %v1080_v24 = vclz %v1079_v45  ;;  %v1174_v11 = vsel %vm1164_vm12, %v1160_v56, 1326507024 }
 0x11b   : > { %v1175_v50 = vsel %vm1163_vm15, %v1157_v63, %v1174_v11  ;;  %v1172_v34 = vsel %vm1162_vm0, %v1169_v46, %v1171_v9  ;;  %v1179_v61 = vshrl.u32 %v4941_v48, 16  ;;  %v1178_v14 = vand.u32 65535, %v4941_v48 }
 0x11c   : > { %v953_v28 = vadd.f32 1.0, %v952_v51  ;;  %v960_v26 = vadd.f32 1.0, %v959_v54  ;;  %v3660_v31 = vadd.s32 4294967294, %v1080_v24  ;;  %v1176_v29 = vsel %vm1162_vm0, %v1173_v35, %v1175_v50 }
 0x11d   : > { %v1180_v16 = vand.u32 65535, %v1176_v29  ;;  %v1181_v40 = vshrl.u32 %v1176_v29, 16  ;;  %v1203_v63 = vshrl.u32 %v1172_v34, 16  ;;  %vm4958_vm7 = vcmp.le.f32.partialorder %v974_v30, 0.7853982 }
 0x11e   : > { %v961_v22 = vmul.f32 %v960_v26, %v945_v23  ;;  %v970_v43 = vxor.u32 2147483648, %v953_v28  ;;  %vm3661_vm2 = vcmp.lt.s32.totalorder %v3660_v31, 0  ;;  %v1202_v54 = vand.u32 65535, %v1172_v34 }
 0x11f   : > { %v1083_v62 = vsel %vm3661_vm2, 0, %v3660_v31  ;;  %v1184_v51 = vmul.u32 %v1180_v16, %v1179_v61  ;;  %v1145_v45 = vshrl.u32 %v4098_v13, %v4888_v7  ;;  %v1182_v20 = vmul.u32 %v1180_v16, %v1178_v14 }
 0x120   : > { %v967_v1 = vxor.u32 2147483648, %v961_v22  ;;  %v971_v23 = vsel %vm969_vm14, %v970_v43, %v961_v22  ;;  %v1084_v57 = vsub.s32 32, %v1083_v62  ;;  %v1085_v6 = vshll.u32 %v1076_v5, %v1083_v62 }
 0x121   : > { %v1088_v58 = vsub.s32 4294967266, %v1083_v62  ;;  %v1098_v46 = vsub.s32 4, %v4892_v36  ;;  %v1185_v38 = vmul.u32 %v1181_v40, %v1179_v61  ;;  %v1188_v22 = vshll.u32 %v1184_v51, 16 }
 0x122   : > { %v968_v4 = vsel %vm966_vm1, %v953_v28, %v967_v1  ;;  %v1086_v3 = vshrl.u32 %v1068_v27, %v1084_v57  ;;  %v1183_v28 = vmul.u32 %v1181_v40, %v1178_v14  ;;  %v1205_v43 = vmul.u32 %v1203_v63, %v1178_v14 }
 0x123   : > { %v972_v18 = vsel %vm965_vm13, %v968_v4, %v971_v23  ;;  %v1089_v55 = vadd.s32 127, %v1088_v58  ;;  %v1204_v9 = vmul.u32 %v1202_v54, %v1178_v14  ;;  %v1189_v14 = vshrl.u32 %v1184_v51, 16 }
 0x124   : > { %v973_v12 = vsel %vm962_vm9, nan, %v972_v18  ;;  %v1087_v33 = vor.u32 %v1086_v3, %v1085_v6  ;;  %v1186_v11 = vshll.u32 %v1183_v28, 16  ;;  %v1187_v35 = vshrl.u32 %v1183_v28, 16 }
 0x125   : > { %v1287_v10 = vmul.f32 %v973_v12, %v973_v12  ;;  %v1090_v56 = vshll.u32 %v1089_v55, 23  ;;  %v1208_v62 = vshll.u32 %v1205_v43, 16  ;;  %v1209_v12 = vshrl.u32 %v1205_v43, 16 }
 0x126   : > { %v1094_v24 = vcvt.s32.f32 %v1087_v33  ;;  %vm1190_vm8 = vc.u32 %v1182_v20, %v1186_v11  ;;  %v1192_v1 = vadd.s32 %v1186_v11, %v1182_v20 }
 0x127   : > { %v1296_v0 = vmul.f32 %v4605_v2, %v1287_v10  ;;  %v1091_v26 = vor.u32 4788187, %v1090_v56  ;;  %v1206_v2 = vmul.u32 %v1202_v54, %v1179_v61  ;;  %v1191_v27 = vsel %vm1190_vm8, 1, %v4104_v47 }
 0x128   : > { %v1193_v4 = vadd.s32 %v1191_v27, %v1185_v38  ;;  %vm1194_vm9 = vc.u32 %v1192_v1, %v1188_v22  ;;  %vm1212_vm10 = vc.u32 %v1204_v9, %v1208_v62  ;;  %v1214_v52 = vadd.s32 %v1208_v62, %v1204_v9 }
 0x129   : > { %v4967_v30 = vadd.f32 %v1296_v0, %v4608_v60  ;;  %v1092_v31 = vand.u32 2147483647, %v1091_v26  ;;  %v1207_v60 = vmul.u32 %v1203_v63, %v1179_v61  ;;  %v1099_v61 = vsel %vm976_vm6, %v1098_v46, %v4892_v36 }
 0x12a   : > { %v1195_v6 = vsel %vm1194_vm9, 1, %v4104_v47  ;;  %v1210_v58 = vshll.u32 %v1206_v2, 16  ;;  %v1213_v3 = vsel %vm1212_vm10, 1, %v4104_v47  ;;  %v1101_v33 = vsel %vm4958_vm7, 0, %v1099_v61 }
 0x12b   : > { %v1334_v50 = vrot.slane %v4967_v30, 2  ;;  %v1317_v7 = vrot.slane %v4967_v30, 1  ;;  %1422 = vmatmul.f32.gmra.mxu0 %v4967_v30  ;;  %v1095_v23 = vmul.f32 %v1094_v24, %v1092_v31  ;;  %v1197_v18 = vadd.s32 %v1195_v6, %v1193_v4 }
 0x12c   : > { %v1215_v16 = vadd.s32 %v1213_v3, %v1207_v60  ;;  %vm1216_vm13 = vc.u32 %v1214_v52, %v1210_v58  ;;  %v1211_v56 = vshrl.u32 %v1206_v2, 16  ;;  %v1218_v28 = vadd.s32 %v1214_v52, %v1210_v58 }
 0x12d   : > { %v1335_v34 = vsel %vm1328_vm3, %v1332_v42, %v1334_v50  ;;  %v1318_v29 = vsel %vm1311_vm4, %v1315_v59, %v1317_v7  ;;  %v1096_v57 = vxor.u32 2147483648, %v1095_v23  ;;  %v1166_v42 = vsel %vm1164_vm12, %v4917_v39, 2102212464 }
 0x12e   : > { %1483 = vmatmul.f32.gmra.mxu2 %v1335_v34  ;;  %1451 = vmatmul.f32.gmra.mxu1 %v1318_v29  ;;  %v1198_v55 = vadd.s32 %v1197_v18, %v1187_v35  ;;  %v1165_v39 = vsel %vm1161_vm11, %v1145_v45, %v4910_v8  ;;  %v1167_v40 = vsel %vm1163_vm15, %v4915_v25, %v1166_v42  ;;  %v1217_v63 = vsel %vm1216_vm13, 1, %v4104_v47 }
 0x12f   : > { %v1097_v59 = vsel %vm976_vm6, %v1096_v57, %v1095_v23  ;;  %v1219_v51 = vadd.s32 %v1217_v63, %v1215_v16  ;;  %v1168_v26 = vsel %vm1162_vm0, %v1165_v39, %v1167_v40  ;;  %v1118_v46 = vadd.s32 3, %v1101_v33 }
 0x130   : > { %v1100_v36 = vsel %vm4958_vm7, %v4631_v49, %v1097_v59  ;;  %v1199_v20 = vadd.s32 %v1198_v55, %v1189_v14  ;;  %v1222_v22 = vmul.u32 %v4941_v48, %v1168_v26  ;;  %vm1117_vm0 = vweird.f32 %v4631_v49  ;;  %v5009_v14 = vld [vmem:[#allocation8] ss:$0 sm:$0xff] }
 0x131   : > { %v1102_v10 = vmul.f32 %v1100_v36, %v1100_v36  ;;  %v1220_v24 = vadd.s32 %v1219_v51, %v1209_v12  ;;  %v1119_v35 = vand.u32 3, %v1118_v46  ;;  %vm1131_vm6 = vcmp.lt.s32.totalorder %v4861_v44, 0 }
 0x132   : > { %vm1224_vm11 = vc.u32 %v1199_v20, %v1218_v28  ;;  %v1223_v39 = vadd.s32 %v1218_v28, %v1199_v20  ;;  %vm5031_vm7 = vcmp.le.f32.partialorder %v1129_v37, 0.7853982 }
 0x133   : > { %v1103_v54 = vmul.f32 -0.001358992, %v1102_v10  ;;  %v1110_v0 = vmul.f32 -0.00019511016, %v1102_v10  ;;  %v1221_v38 = vadd.s32 %v1220_v24, %v1211_v56  ;;  %vm1124_vm12 = vcmp.eq.s32.totalorder %v1119_v35, 2 }
 0x134   : > { %vm1121_vm14 = vcmp.eq.s32.totalorder %v1119_v35, 0  ;;  %vm1120_vm15 = vcmp.lt.s32.totalorder %v1119_v35, 2 }
 0x135   : > { %v1104_v8 = vadd.f32 0.041655596, %v1103_v54  ;;  %v1111_v45 = vadd.f32 0.008332121, %v1110_v0  ;;  %v1225_v5 = vadd.s32 1, %v1221_v38 }
 0x137   : > { %v1105_v25 = vmul.f32 %v1104_v8, %v1102_v10  ;;  %v1112_v11 = vmul.f32 %v1111_v45, %v1102_v10  ;;  %v1226_v9 = vsel %vm1224_vm11, %v1225_v5, %v1221_v38  ;;  %v1495_v5 = vlaneseq }
 0x138   : > { %v1227_v23 = vadd.s32 %v1226_v9, %v1222_v22  ;;  %vm1272_vm11 = vweird.f32 %v4861_v44 }
 0x139   : > { %v1106_v43 = vadd.f32 -0.4999988, %v1105_v25  ;;  %v1113_v31 = vadd.f32 -0.16666654, %v1112_v11  ;;  %v5040_v11 = vld [vmem:[%s6523_s4] ss:$0 sm:$0xff] }
 0x13a   : > { %v1228_v60 = vadd.s32 536870912, %v1227_v23 }
 0x13b   : > { %v1107_v2 = vmul.f32 %v1106_v43, %v1102_v10  ;;  %v1114_v1 = vmul.f32 %v1113_v31, %v1102_v10  ;;  %v5045_v31 = vstv %s3666_s29  ;;  %s3996_s29 = sshra.s32 %s3511_s21, 4  ;;  %s3997_s29 = int_to_ptr.hbm [resolvable:$true] %s3996_s29 }
 0x13c   : > { %v1229_v29 = vshrl.u32 %v1228_v60, 30  ;;  %s3998_s9 = scalar_lea.hbm %s3997_s29, 16  ;;  %p4003_p11 = scmp.lt.s32.totalorder %s3997_s29, %s6524_s5 }
 0x13d   : > { %v1108_v41 = vadd.f32 1.0, %v1107_v2  ;;  %v1115_v27 = vadd.f32 1.0, %v1114_v1  ;;  %v1414_v22 = vpop.f32.mrf.mxu0  ;;  %v5048_v2 = vshrl.u32 %v1495_v5, 7  ;;  %p3999_p1 = scmp.ne.s32.totalorder %s3997_s29, %s3998_s9  ;;  %p4004_p12 = scmp.lt.s32.totalorder %s4002_s7, %s3998_s9 }
 0x13e   : > { %v1230_v57 = vshll.u32 %v1229_v29, 30  ;;  %v1253_v46 = vsub.s32 4, %v1229_v29  ;;  %v1415_v9 = vadd.f32 %v5040_v11, %v1414_v22 }
 0x13f   : > { %v1116_v62 = vmul.f32 %v1115_v27, %v1100_v36  ;;  %v1125_v34 = vxor.u32 2147483648, %v1108_v41  ;;  %v3858_v36 = vld [vmem:[#allocation2 + $0x18] sm:$0xff]  ;;  %p4000_p3 = pnand %p3999_p1, %p4240_p2  ;;  %p4005_p13 = por %p4004_p12, %p4003_p11 }
 0x140   : > { %v1231_v6 = vsub.s32 %v1227_v23, %v1230_v57  ;;  %v1254_v25 = vsel %vm1131_vm6, %v1253_v46, %v1229_v29 }
 0x141   : > { %v1122_v4 = vxor.u32 2147483648, %v1116_v62  ;;  %v1126_v48 = vsel %vm1124_vm12, %v1125_v34, %v1116_v62  ;;  %v1256_v1 = vsel %vm5031_vm7, 0, %v1254_v25  ;;  %v1502_v62 = vadd.s32 %v5045_v31, %v5048_v2  ;;  %v5054_v34 = vld [vmem:[#allocation6 + $0x1] ss:$0 sm:$0xff]  ;;  %p4001_p10 = pneg %p4000_p3 }
 0x142   : > { %vm1232_vm1 = vcmp.lt.s32.totalorder %v1231_v6, 0  ;;  %v1233_v18 = vsub.s32 0, %v1231_v6  ;;  %v1273_v57 = vadd.s32 3, %v1256_v1 }
 0x143   : > { %v1123_v61 = vsel %vm1121_vm14, %v1108_v41, %v1122_v4  ;;  %vm1507_vm8 = vcmp.lt.s32.totalorder %v1502_v62, 0  ;;  %p4006_p0 = pnand %p4005_p13, %p4001_p10 }
 0x144   : > { %v1127_v58 = vsel %vm1120_vm15, %v1123_v61, %v1126_v48  ;;  %v1234_v59 = vsel %vm1232_vm1, %v1233_v18, %v1231_v6 }
 0x145   : > { %v1128_v42 = vsel %vm1117_vm0, nan, %v1127_v58  ;;  %v1235_v3 = vclz %v1234_v59  ;;  %v1274_v59 = vand.u32 3, %v1273_v57 }
 0x146   : > { %v1288_v52 = vmul.f32 %v1128_v42, %v1128_v42 }
 0x147   : > { %v3663_v16 = vadd.s32 4294967294, %v1235_v3  ;;  %vm1279_vm9 = vcmp.eq.s32.totalorder %v1274_v59, 2  ;;  %vm1276_vm10 = vcmp.eq.s32.totalorder %v1274_v59, 0  ;;  %vm1275_vm13 = vcmp.lt.s32.totalorder %v1274_v59, 2 }
 0x148   : > { %v1297_v12 = vmul.f32 %v5009_v14, %v1288_v52 }
 0x149   : > { %vm3664_vm2 = vcmp.lt.s32.totalorder %v3663_v16, 0 }
 0x14a   : > { %v5012_v55 = vadd.f32 %v3858_v36, %v1297_v12  ;;  %v1238_v40 = vsel %vm3664_vm2, 0, %v3663_v16 }
 0x14b   : > { %v1239_v56 = vsub.s32 32, %v1238_v40  ;;  %v1240_v51 = vshll.u32 %v1231_v6, %v1238_v40  ;;  %v1243_v54 = vsub.s32 4294967266, %v1238_v40 }
 0x14c   : > { %v1336_v10 = vrot.slane %v5012_v55, 2  ;;  %v1319_v49 = vrot.slane %v5012_v55, 1  ;;  %1425 = vmatmul.f32.gmra.mxu0 %v5012_v55 }
 0x14d   : > { %v1241_v0 = vshrl.u32 %v1223_v39, %v1239_v56  ;;  %v1244_v20 = vadd.s32 127, %v1243_v54 }
 0x14e   : > { %v1337_v63 = vsel %vm1328_vm3, %v1334_v50, %v1336_v10  ;;  %v1320_v33 = vsel %vm1311_vm4, %v1317_v7, %v1319_v49 }
 0x14f   : > { %1486 = vmatmul.f32.gmra.mxu2 %v1337_v63  ;;  %1454 = vmatmul.f32.gmra.mxu1 %v1320_v33  ;;  %v1242_v28 = vor.u32 %v1241_v0, %v1240_v51  ;;  %v1245_v26 = vshll.u32 %v1244_v20, 23 }
 0x151   : > { %v1246_v24 = vor.u32 4788187, %v1245_v26  ;;  %v1249_v8 = vcvt.s32.f32 %v1242_v28 }
 0x153   : > { %v1247_v45 = vand.u32 2147483647, %v1246_v24  ;;  %v1446_v37 = vpop.f32.mrf.mxu1 }
 0x154   : > { %v1447_v60 = vadd.f32 %v1446_v37, %v1415_v9 }
 0x155   : > { %v1250_v50 = vmul.f32 %v1249_v8, %v1247_v45 }
 0x157   : > { %v1251_v7 = vxor.u32 2147483648, %v1250_v50 }
 0x159   : > { %v1252_v38 = vsel %vm1131_vm6, %v1251_v7, %v1250_v50  ;;  %v1478_v23 = vpop.f32.mrf.mxu2 }
 0x15a   : > { %v1255_v43 = vsel %vm5031_vm7, %v4861_v44, %v1252_v38  ;;  %v1479_v48 = vadd.f32 %v1478_v23, %v1447_v60 }
 0x15b   : > { %v1257_v35 = vmul.f32 %v1255_v43, %v1255_v43 }
 0x15c   : > { %v5056_v58 = vsel %vm1507_vm8, 0.0, %v1479_v48 }
 0x15d   : > { %v1258_v41 = vmul.f32 -0.001358992, %v1257_v35  ;;  %v1265_v27 = vmul.f32 -0.00019511016, %v1257_v35  ;;  %v5060_v42 = vmul.f32 %v5054_v34, %v5056_v58 }
 0x15f   : > { %v1259_v29 = vadd.f32 0.041655596, %v1258_v41  ;;  %v1266_v4 = vadd.f32 0.008332121, %v1265_v27  ;;  %v1542_v12 = vand.u32 2139095040, %v5060_v42 }
 0x160   : > { %v1539_v63 = vand.u32 2147483647, %v5060_v42 }
 0x161   : > { %v1260_v61 = vmul.f32 %v1259_v29, %v1257_v35  ;;  %v1267_v6 = vmul.f32 %v1266_v4, %v1257_v35  ;;  %v1543_v16 = vshrl.u32 %v1542_v12, 23 }
 0x162   : > { %v1546_v28 = vand.u32 8388607, %v1539_v63 }
 0x163   : > { %v1261_v18 = vadd.f32 -0.4999988, %v1260_v61  ;;  %v1268_v52 = vadd.f32 -0.16666654, %v1267_v6  ;;  %v3667_v33 = vadd.s32 4294967169, %v1543_v16 }
 0x164   : > { %v1547_v30 = vor.u32 8388608, %v1546_v28 }
 0x165   : > { %v1262_v3 = vmul.f32 %v1261_v18, %v1257_v35  ;;  %v1269_v36 = vmul.f32 %v1268_v52, %v1257_v35  ;;  %v1549_v54 = vadd.s32 1, %v3667_v33 }
 0x166   : > { %v5088_v62 = vshll.u32 %v1547_v30, 8 }
 0x167   : > { %v1263_v39 = vadd.f32 1.0, %v1262_v3  ;;  %v1270_v40 = vadd.f32 1.0, %v1269_v36  ;;  %vm1550_vm12 = vcmp.gt.s32.totalorder %v1549_v54, 0 }
 0x168   : > { %v1551_v24 = vsel %vm1550_vm12, %v1549_v54, 0 }
 0x169   : > { %v1271_v56 = vmul.f32 %v1270_v40, %v1255_v43  ;;  %v1280_v51 = vxor.u32 2147483648, %v1263_v39  ;;  %v1553_v45 = vand.u32 31, %v1551_v24  ;;  %v5069_v38 = vshrl.u32 %v1551_v24, 5 }
 0x16b   : > { %v1277_v0 = vxor.u32 2147483648, %v1271_v56  ;;  %v1281_v20 = vsel %vm1279_vm9, %v1280_v51, %v1271_v56  ;;  %v5067_v7 = vsub.s32 32, %v1553_v45  ;;  %v1556_v25 = vshll.u32 %v4098_v13, %v1553_v45 }
 0x16c   : > { %v1559_v22 = vshll.u32 %v4099_v15, %v1553_v45  ;;  %v1562_v44 = vshll.u32 %v4100_v17, %v1553_v45  ;;  %v1565_v35 = vshll.u32 %v6537_v19, %v1553_v45  ;;  %v1568_v23 = vshll.u32 %v4102_v21, %v1553_v45 }
 0x16d   : > { %v1278_v26 = vsel %vm1276_vm10, %v1263_v39, %v1277_v0  ;;  %v1557_v43 = vshrl.u32 %v4099_v15, %v5067_v7  ;;  %v1560_v37 = vshrl.u32 %v4100_v17, %v5067_v7  ;;  %v1563_v9 = vshrl.u32 %v6537_v19, %v5067_v7 }
 0x16e   : > { %v1282_v8 = vsel %vm1275_vm13, %v1278_v26, %v1281_v20  ;;  %v1566_v1 = vshrl.u32 %v4102_v21, %v5067_v7  ;;  %v1569_v41 = vshrl.u32 %v6535_v32, %v5067_v7  ;;  %vm1571_vm14 = vcmp.lt.s32.totalorder %v5069_v38, 1 }
 0x16f   : > { %v1283_v50 = vsel %vm1272_vm11, nan, %v1282_v8  ;;  %v1558_v27 = vor.u32 %v1557_v43, %v1556_v25  ;;  %v1561_v60 = vor.u32 %v1560_v37, %v1559_v22  ;;  %v1564_v29 = vor.u32 %v1563_v9, %v1562_v44 }
 0x170   : > { %v1289_v46 = vmul.f32 %v1283_v50, %v1283_v50  ;;  %v1567_v4 = vor.u32 %v1566_v1, %v1565_v35  ;;  %v1570_v48 = vor.u32 %v1569_v41, %v1568_v23  ;;  %vm1574_vm15 = vcmp.lt.s32.totalorder %v5069_v38, 4 }
 0x171   : > { %v1579_v6 = vsel %vm1571_vm14, %v1558_v27, %v1561_v60  ;;  %vm1573_vm0 = vcmp.lt.s32.totalorder %v5069_v38, 3  ;;  %v1583_v18 = vsel %vm1571_vm14, %v1561_v60, %v1564_v29  ;;  %vm1572_vm1 = vcmp.lt.s32.totalorder %v5069_v38, 2 }
 0x172   : > { %v1298_v5 = vmul.f32 %v5009_v14, %v1289_v46  ;;  %v1584_v52 = vsel %vm1574_vm15, %v1570_v48, 1326507024  ;;  %v1588_v39 = vand.u32 65535, %v5088_v62  ;;  %v1555_v35 = vshrl.u32 %v4098_v13, %v5067_v7 }
 0x173   : > { %v1585_v16 = vsel %vm1573_vm0, %v1567_v4, %v1584_v52 }
 0x174   : > { %v1304_v14 = vadd.f32 %v1298_v5, %v4586_v53  ;;  %v1580_v53 = vsel %vm1574_vm15, %v1567_v4, 920167782  ;;  %v1586_v55 = vsel %vm1572_vm1, %v1583_v18, %v1585_v16  ;;  %v1576_v5 = vsel %vm1574_vm15, %v1564_v29, 2102212464 }
 0x175   : > { %v1581_v3 = vsel %vm1573_vm0, %v1564_v29, %v1580_v53  ;;  %v1590_v33 = vand.u32 65535, %v1586_v55  ;;  %v1591_v56 = vshrl.u32 %v1586_v55, 16  ;;  %v1575_v4 = vsel %vm1571_vm14, %v1555_v35, %v1558_v27 }
 0x176   : > { %v1338_v57 = vrot.slane %v1304_v14, 2  ;;  %v1321_v61 = vrot.slane %v1304_v14, 1  ;;  %v1582_v36 = vsel %vm1572_vm1, %v1579_v6, %v1581_v3  ;;  %v1577_v29 = vsel %vm1573_vm0, %v1561_v60, %v1576_v5 }
 0x177   : > { %v1613_v40 = vshrl.u32 %v1582_v36, 16  ;;  %v1593_v0 = vmul.u32 %v1591_v56, %v1588_v39  ;;  %v1592_v24 = vmul.u32 %v1590_v33, %v1588_v39  ;;  %v1578_v18 = vsel %vm1572_vm1, %v1575_v4, %v1577_v29 }
 0x178   : > { %v1339_v59 = vsel %vm1328_vm3, %v1336_v10, %v1338_v57  ;;  %v1322_v12 = vsel %vm1311_vm4, %v1319_v49, %v1321_v61  ;;  %v1589_v10 = vshrl.u32 %v5088_v62, 16  ;;  %v1612_v49 = vand.u32 65535, %v1582_v36 }
 0x179   : > { %1489 = vmatmul.f32.gmra.mxu2 %v1339_v59  ;;  %1457 = vmatmul.f32.gmra.mxu1 %v1322_v12  ;;  %v1615_v51 = vmul.u32 %v1613_v40, %v1588_v39  ;;  %v1596_v8 = vshll.u32 %v1593_v0, 16  ;;  %v1597_v48 = vshrl.u32 %v1593_v0, 16  ;;  %v1632_v36 = vmul.u32 %v5088_v62, %v1578_v18 }
 0x17a   : > { %v1616_v54 = vmul.u32 %v1612_v49, %v1589_v10  ;;  %v1594_v20 = vmul.u32 %v1590_v33, %v1589_v10  ;;  %v1614_v28 = vmul.u32 %v1612_v49, %v1588_v39  ;;  %v1617_v45 = vmul.u32 %v1613_v40, %v1589_v10 }
 0x17b   : > { %v1618_v26 = vshll.u32 %v1615_v51, 16  ;;  %v1595_v50 = vmul.u32 %v1591_v56, %v1589_v10  ;;  %vm1600_vm6 = vc.u32 %v1592_v24, %v1596_v8  ;;  %v1602_v22 = vadd.s32 %v1596_v8, %v1592_v24  ;;  %v1417_v56 = vpop.f32.mrf.mxu0 }
 0x17c   : > { %v1620_v46 = vshll.u32 %v1616_v54, 16  ;;  %v1598_v25 = vshll.u32 %v1594_v20, 16  ;;  %v1601_v43 = vsel %vm1600_vm6, 1, %v4104_v47  ;;  %v1619_v41 = vshrl.u32 %v1615_v51, 16  ;;  %v1449_v51 = vpop.f32.mrf.mxu1 }
 0x17d   : > { %vm1622_vm2 = vc.u32 %v1614_v28, %v1618_v26  ;;  %v1624_v30 = vadd.s32 %v1618_v26, %v1614_v28  ;;  %v1603_v9 = vadd.s32 %v1601_v43, %v1595_v50  ;;  %v1621_v61 = vshrl.u32 %v1616_v54, 16 }
 0x17e   : > { %v1623_v44 = vsel %vm1622_vm2, 1, %v4104_v47  ;;  %vm1604_vm8 = vc.u32 %v1602_v22, %v1598_v25  ;;  %v1599_v53 = vshrl.u32 %v1594_v20, 16  ;;  %v5137_v54 = vadd.s32 8, %v5048_v2 }
 0x17f   : > { %v1625_v37 = vadd.s32 %v1623_v44, %v1617_v45  ;;  %vm1626_vm7 = vc.u32 %v1624_v30, %v1620_v46  ;;  %v1605_v23 = vsel %vm1604_vm8, 1, %v4104_v47  ;;  %v1628_v12 = vadd.s32 %v1624_v30, %v1620_v46 }
 0x180   : > { %v1627_v1 = vsel %vm1626_vm7, 1, %v4104_v47  ;;  %v1607_v57 = vadd.s32 %v1605_v23, %v1603_v9  ;;  %v1418_v62 = vadd.f32 %v5040_v11, %v1417_v56  ;;  %v1503_v20 = vadd.s32 %v5045_v31, %v5137_v54 }
 0x181   : > { %v1629_v14 = vadd.s32 %v1627_v1, %v1625_v37  ;;  %v1481_v0 = vpop.f32.mrf.mxu2  ;;  %vm1541_vm2 = vcmp.lt.s32.totalorder %v5060_v42, 0  ;;  %vm5194_vm6 = vcmp.le.f32.partialorder %v1539_v63, 0.7853982 }
 0x182   : > { %v1608_v7 = vadd.s32 %v1607_v57, %v1597_v48  ;;  %v1450_v26 = vadd.f32 %v1449_v51, %v1418_v62  ;;  %vm1508_vm11 = vcmp.lt.s32.totalorder %v1503_v20, 0 }
 0x183   : > { %v1630_v6 = vadd.s32 %v1629_v14, %v1619_v41 }
 0x184   : > { %v1609_v59 = vadd.s32 %v1608_v7, %v1599_v53  ;;  %v1482_v24 = vadd.f32 %v1481_v0, %v1450_v26 }
 0x185   : > { %v1631_v52 = vadd.s32 %v1630_v6, %v1621_v61 }
 0x186   : > { %vm1634_vm9 = vc.u32 %v1609_v59, %v1628_v12  ;;  %v5142_v45 = vsel %vm1508_vm11, 0.0, %v1482_v24  ;;  %v1633_v22 = vadd.s32 %v1628_v12, %v1609_v59 }
 0x187   : > { %v1635_v3 = vadd.s32 1, %v1631_v52  ;;  %v5146_v50 = vmul.f32 %v5054_v34, %v5142_v45 }
 0x189   : > { %v1636_v27 = vsel %vm1634_vm9, %v1635_v3, %v1631_v52  ;;  %v1697_v25 = vand.u32 2139095040, %v5146_v50  ;;  %v1694_v35 = vand.u32 2147483647, %v5146_v50 }
 0x18a   : > { %v1637_v16 = vadd.s32 %v1636_v27, %v1632_v36 }
 0x18b   : > { %v1698_v44 = vshrl.u32 %v1697_v25, 23  ;;  %v1701_v14 = vand.u32 8388607, %v1694_v35 }
 0x18c   : > { %v1638_v39 = vadd.s32 536870912, %v1637_v16 }
 0x18d   : > { %v3670_v37 = vadd.s32 4294967169, %v1698_v44  ;;  %v1702_v6 = vor.u32 8388608, %v1701_v14 }
 0x18e   : > { %v5133_v60 = vshrl.u32 %v1638_v39, 30 }
 0x18f   : > { %v1704_v1 = vadd.s32 1, %v3670_v37  ;;  %v5164_v56 = vshll.u32 %v1702_v6, 8 }
 0x190   : > { %v1640_v55 = vshll.u32 %v5133_v60, 30 }
 0x191   : > { %vm1705_vm12 = vcmp.gt.s32.totalorder %v1704_v1, 0 }
 0x192   : > { %v1641_v10 = vsub.s32 %v1637_v16, %v1640_v55  ;;  %v1706_v4 = vsel %vm1705_vm12, %v1704_v1, 0 }
 0x193   : > { %v1708_v29 = vand.u32 31, %v1706_v4  ;;  %v5152_v53 = vshrl.u32 %v1706_v4, 5 }
 0x194   : > { %v1643_v49 = vsub.s32 0, %v1641_v10  ;;  %vm1642_vm10 = vcmp.lt.s32.totalorder %v1641_v10, 0 }
 0x195   : > { %v1709_v61 = vsub.s32 32, %v1708_v29  ;;  %v1711_v7 = vshll.u32 %v4098_v13, %v1708_v29  ;;  %v1714_v18 = vshll.u32 %v4099_v15, %v1708_v29  ;;  %v1717_v12 = vshll.u32 %v4100_v17, %v1708_v29 }
 0x196   : > { %v1644_v40 = vsel %vm1642_vm10, %v1643_v49, %v1641_v10  ;;  %v1720_v36 = vshll.u32 %v6537_v19, %v1708_v29  ;;  %v1723_v16 = vshll.u32 %v4102_v21, %v1708_v29  ;;  %vm1726_vm14 = vcmp.lt.s32.totalorder %v5152_v53, 1 }
 0x197   : > { %v1645_v38 = vclz %v1644_v40  ;;  %v1712_v52 = vshrl.u32 %v4099_v15, %v1709_v61  ;;  %v1715_v59 = vshrl.u32 %v4100_v17, %v1709_v61  ;;  %v1718_v3 = vshrl.u32 %v6537_v19, %v1709_v61 }
 0x198   : > { %v1721_v27 = vshrl.u32 %v4102_v21, %v1709_v61  ;;  %v1724_v39 = vshrl.u32 %v6535_v32, %v1709_v61  ;;  %vm1729_vm15 = vcmp.lt.s32.totalorder %v5152_v53, 4  ;;  %vm1728_vm0 = vcmp.lt.s32.totalorder %v5152_v53, 3 }
 0x199   : > { %v3668_v33 = vadd.s32 4294967294, %v1645_v38  ;;  %v1713_v55 = vor.u32 %v1712_v52, %v1711_v7  ;;  %v1719_v49 = vor.u32 %v1718_v3, %v1717_v12  ;;  %vm1727_vm1 = vcmp.lt.s32.totalorder %v5152_v53, 2 }
 0x19a   : > { %v1722_v38 = vor.u32 %v1721_v27, %v1720_v36 }
 0x19b   : > { %vm3669_vm13 = vcmp.lt.s32.totalorder %v3668_v33, 0  ;;  %v1731_v37 = vsel %vm1729_vm15, %v1719_v49, 2102212464 }
 0x19c   : > { %v1648_v28 = vsel %vm3669_vm13, 0, %v3668_v33  ;;  %v1725_v33 = vor.u32 %v1724_v39, %v1723_v16  ;;  %v1735_v62 = vsel %vm1729_vm15, %v1722_v38, 920167782  ;;  %v5206_v39 = vadd.s32 16, %v5048_v2 }
 0x19d   : > { %v1653_v8 = vsub.s32 4294967266, %v1648_v28  ;;  %v1649_v46 = vsub.s32 32, %v1648_v28  ;;  %v1650_v9 = vshll.u32 %v1641_v10, %v1648_v28  ;;  %v1716_v10 = vor.u32 %v1715_v59, %v1714_v18 }
 0x19e   : > { %v1736_v20 = vsel %vm1728_vm0, %v1719_v49, %v1735_v62  ;;  %v1739_v28 = vsel %vm1729_vm15, %v1725_v33, 1326507024 }
 0x19f   : > { %v1654_v30 = vadd.s32 127, %v1653_v8  ;;  %v1651_v5 = vshrl.u32 %v1633_v22, %v1649_v46  ;;  %v1734_v51 = vsel %vm1726_vm14, %v1713_v55, %v1716_v10  ;;  %v1738_v0 = vsel %vm1726_vm14, %v1716_v10, %v1719_v49 }
 0x1a0   : > { %v1737_v24 = vsel %vm1727_vm1, %v1734_v51, %v1736_v20  ;;  %v1740_v8 = vsel %vm1728_vm0, %v1722_v38, %v1739_v28  ;;  %v1743_v46 = vand.u32 65535, %v5164_v56  ;;  %v1744_v22 = vshrl.u32 %v5164_v56, 16 }
 0x1a1   : > { %v1655_v43 = vshll.u32 %v1654_v30, 23  ;;  %v1652_v23 = vor.u32 %v1651_v5, %v1650_v9  ;;  %v1420_v30 = vpop.f32.mrf.mxu0  ;;  %v1741_v25 = vsel %vm1727_vm1, %v1738_v0, %v1740_v8  ;;  %v1767_v44 = vand.u32 65535, %v1737_v24 }
 0x1a2   : > { %v1768_v5 = vshrl.u32 %v1737_v24, 16  ;;  %v1745_v9 = vand.u32 65535, %v1741_v25  ;;  %v1746_v1 = vshrl.u32 %v1741_v25, 16  ;;  %v1732_v6 = vsel %vm1728_vm0, %v1716_v10, %v1731_v37 }
 0x1a3   : > { %v1656_v41 = vor.u32 4788187, %v1655_v43  ;;  %v1659_v57 = vcvt.s32.f32 %v1652_v23  ;;  %v1710_v43 = vshrl.u32 %v4098_v13, %v1709_v61  ;;  %v1771_v14 = vmul.u32 %v1767_v44, %v1744_v22 }
 0x1a4   : > { %v1749_v61 = vmul.u32 %v1745_v9, %v1744_v22  ;;  %v1769_v7 = vmul.u32 %v1767_v44, %v1743_v46  ;;  %v1772_v18 = vmul.u32 %v1768_v5, %v1744_v22  ;;  %v1747_v12 = vmul.u32 %v1745_v9, %v1743_v46 }
 0x1a5   : > { %v1657_v48 = vand.u32 2147483647, %v1656_v41  ;;  %v1770_v41 = vmul.u32 %v1768_v5, %v1743_v46  ;;  %v1750_v63 = vmul.u32 %v1746_v1, %v1744_v22  ;;  %v1775_v36 = vshll.u32 %v1771_v14, 16 }
 0x1a6   : > { %v1421_v16 = vadd.f32 %v5040_v11, %v1420_v30  ;;  %v1504_v24 = vadd.s32 %v5045_v31, %v5206_v39  ;;  %v5216_v44 = vadd.s32 24, %v5048_v2  ;;  %v1754_v9 = vshrl.u32 %v1749_v61, 16 }
 0x1a7   : > { %v1660_v40 = vmul.f32 %v1659_v57, %v1657_v48  ;;  %v1730_v48 = vsel %vm1726_vm14, %v1710_v43, %v1713_v55  ;;  %v1748_v57 = vmul.u32 %v1746_v1, %v1743_v46  ;;  %v1773_v52 = vshll.u32 %v1770_v41, 16 }
 0x1a8   : > { %v1753_v55 = vshll.u32 %v1749_v61, 16  ;;  %v1774_v33 = vshrl.u32 %v1770_v41, 16  ;;  %v1776_v43 = vshrl.u32 %v1771_v14, 16  ;;  %vm1509_vm13 = vcmp.lt.s32.totalorder %v1504_v24, 0 }
 0x1a9   : > { %v1661_v26 = vxor.u32 2147483648, %v1660_v40  ;;  %v1751_v3 = vshll.u32 %v1748_v57, 16  ;;  %vm1777_vm7 = vc.u32 %v1769_v7, %v1773_v52  ;;  %v1779_v27 = vadd.s32 %v1773_v52, %v1769_v7 }
 0x1aa   : > { %v1778_v10 = vsel %vm1777_vm7, 1, %v4104_v47  ;;  %v1752_v30 = vshrl.u32 %v1748_v57, 16  ;;  %v1733_v57 = vsel %vm1727_vm1, %v1730_v48, %v1732_v6 }
 0x1ab   : > { %v1452_v23 = vpop.f32.mrf.mxu1  ;;  %v1662_v29 = vsel %vm1541_vm2, %v1661_v26, %v1660_v40  ;;  %vm1755_vm8 = vc.u32 %v1747_v12, %v1751_v3  ;;  %v1757_v49 = vadd.s32 %v1751_v3, %v1747_v12  ;;  %v1423_v40 = vpop.f32.mrf.mxu0  ;;  %v1780_v51 = vadd.s32 %v1778_v10, %v1772_v18 }
 0x1ac   : > { %v1756_v38 = vsel %vm1755_vm8, 1, %v4104_v47  ;;  %vm1781_vm9 = vc.u32 %v1779_v27, %v1775_v36  ;;  %v1453_v20 = vadd.f32 %v1452_v23, %v1421_v16  ;;  %v1424_v8 = vadd.f32 %v5040_v11, %v1423_v40 }
 0x1ad   : > { %v1758_v62 = vadd.s32 %v1756_v38, %v1750_v63  ;;  %vm1759_vm10 = vc.u32 %v1757_v49, %v1753_v55  ;;  %v1782_v0 = vsel %vm1781_vm9, 1, %v4104_v47  ;;  %v5221_v5 = vsel %vm5194_vm6, %v5060_v42, %v1662_v29 }
 0x1ae   : > { %v1760_v28 = vsel %vm1759_vm10, 1, %v4104_v47  ;;  %v1784_v26 = vadd.s32 %v1782_v0, %v1780_v51  ;;  %v1505_v29 = vadd.s32 %v5045_v31, %v5216_v44  ;;  %v5235_v14 = vmul.f32 %v5221_v5, %v5221_v5 }
 0x1af   : > { %v1762_v25 = vadd.s32 %v1760_v28, %v1758_v62  ;;  %v1787_v48 = vmul.u32 %v5164_v56, %v1733_v57  ;;  %v1663_v16 = vsub.s32 4, %v5133_v60 }
 0x1b0   : > { %v1785_v37 = vadd.s32 %v1784_v26, %v1774_v33  ;;  %vm1510_vm12 = vcmp.lt.s32.totalorder %v1505_v29, 0  ;;  %v1675_v55 = vmul.f32 -0.00019511016, %v5235_v14 }
 0x1b1   : > { %v1484_v59 = vpop.f32.mrf.mxu2  ;;  %v1763_v1 = vadd.s32 %v1762_v25, %v1752_v30  ;;  %v1664_v56 = vsel %vm1541_vm2, %v1663_v16, %v5133_v60  ;;  %v1668_v60 = vmul.f32 -0.001358992, %v5235_v14 }
 0x1b2   : > { %v1485_v22 = vadd.f32 %v1484_v59, %v1453_v20  ;;  %v1786_v7 = vadd.s32 %v1785_v37, %v1776_v43  ;;  %v5239_v59 = vadd.s32 %v1779_v27, %v1775_v36  ;;  %v1676_v33 = vadd.f32 0.008332121, %v1675_v55 }
 0x1b3   : > { %v5237_v61 = vadd.s32 %v1763_v1, %v1754_v9  ;;  %v1666_v26 = vsel %vm5194_vm6, 0, %v1664_v56  ;;  %v1669_v16 = vadd.f32 0.041655596, %v1668_v60 }
 0x1b4   : > { %v5223_v23 = vsel %vm1509_vm13, 0.0, %v1485_v22  ;;  %v1790_v12 = vadd.s32 1, %v1786_v7  ;;  %v5283_v55 = vadd.s32 3, %v1666_v26 }
 0x1b5   : > { %v5229_v18 = vmul.f32 %v5054_v34, %v5223_v23  ;;  %vm1789_vm11 = vc.u32 %v5237_v61, %v5239_v59  ;;  %v1788_v26 = vadd.s32 %v5239_v59, %v5237_v61 }
 0x1b6   : > { %v1791_v63 = vsel %vm1789_vm11, %v1790_v12, %v1786_v7 }
 0x1b7   : > { %v1852_v53 = vand.u32 2139095040, %v5229_v18  ;;  %v1792_v49 = vadd.s32 %v1791_v63, %v1787_v48  ;;  %v1849_v36 = vand.u32 2147483647, %v5229_v18 }
 0x1b9   : > { %v1853_v3 = vshrl.u32 %v1852_v53, 23  ;;  %v1793_v10 = vadd.s32 536870912, %v1792_v49  ;;  %v1856_v62 = vand.u32 8388607, %v1849_v36 }
 0x1bb   : > { %v3673_v27 = vadd.s32 4294967169, %v1853_v3  ;;  %v5253_v51 = vshrl.u32 %v1793_v10, 30  ;;  %v1857_v30 = vor.u32 8388608, %v1856_v62 }
 0x1bd   : > { %v1859_v38 = vadd.s32 1, %v3673_v27  ;;  %v1795_v20 = vshll.u32 %v5253_v51, 30 }
 0x1bf   : > { %vm1860_vm14 = vcmp.gt.s32.totalorder %v1859_v38, 0 }
 0x1c0   : > { %v1861_v28 = vsel %vm1860_vm14, %v1859_v38, 0  ;;  %v5287_v38 = vshll.u32 %v1857_v30, 8  ;;  %vm5351_vm14 = vcmp.le.f32.partialorder %v1694_v35, 0.7853982 }
 0x1c1   : > { %v1863_v24 = vand.u32 31, %v1861_v28  ;;  %v5266_v25 = vshrl.u32 %v1861_v28, 5 }
 0x1c3   : > { %v1864_v22 = vsub.s32 32, %v1863_v24  ;;  %v1866_v43 = vshll.u32 %v4098_v13, %v1863_v24  ;;  %v1869_v9 = vshll.u32 %v4099_v15, %v1863_v24  ;;  %v1872_v4 = vshll.u32 %v4100_v17, %v1863_v24 }
 0x1c4   : > { %v1875_v7 = vshll.u32 %v6537_v19, %v1863_v24  ;;  %v1878_v12 = vshll.u32 %v4102_v21, %v1863_v24  ;;  %vm1881_vm0 = vcmp.lt.s32.totalorder %v5266_v25, 1  ;;  %vm1884_vm1 = vcmp.lt.s32.totalorder %v5266_v25, 4 }
 0x1c5   : > { %v1867_v1 = vshrl.u32 %v4099_v15, %v1864_v22  ;;  %v1873_v57 = vshrl.u32 %v6537_v19, %v1864_v22  ;;  %v1876_v29 = vshrl.u32 %v4102_v21, %v1864_v22  ;;  %v1879_v53 = vshrl.u32 %v6535_v32, %v1864_v22 }
 0x1c6   : > { %vm1883_vm2 = vcmp.lt.s32.totalorder %v5266_v25, 3  ;;  %vm1882_vm7 = vcmp.lt.s32.totalorder %v5266_v25, 2 }
 0x1c7   : > { %v5281_v3 = vor.u32 %v1873_v57, %v1872_v4  ;;  %v1880_v27 = vor.u32 %v1879_v53, %v1878_v12  ;;  %v1899_v12 = vshrl.u32 %v5287_v38, 16 }
 0x1c9   : > { %v1894_v30 = vsel %vm1884_vm1, %v1880_v27, 1326507024 }
 0x1cc   : > { %v1455_v46 = vpop.f32.mrf.mxu1 }
 0x1cd   : > { %v1456_v41 = vadd.f32 %v1455_v46, %v1424_v8  ;;  %v1677_v8 = vmul.f32 %v1676_v33, %v5235_v14  ;;  %v1796_v46 = vsub.s32 %v1792_v49, %v1795_v20  ;;  %v1877_v49 = vor.u32 %v1876_v29, %v1875_v7 }
 0x1cf   : > { %vm1797_vm15 = vcmp.lt.s32.totalorder %v1796_v46, 0  ;;  %v1798_v37 = vsub.s32 0, %v1796_v46  ;;  %v1890_v33 = vsel %vm1884_vm1, %v1877_v49, 920167782  ;;  %v1678_v20 = vadd.f32 -0.16666654, %v1677_v8 }
 0x1d0   : > { %v1891_v28 = vsel %vm1883_vm2, %v5281_v3, %v1890_v33 }
 0x1d2   : > { %v1487_v52 = vpop.f32.mrf.mxu2 }
 0x1d3   : > { %v1488_v6 = vadd.f32 %v1487_v52, %v1456_v41  ;;  %v1870_v41 = vshrl.u32 %v4100_v17, %v1864_v22  ;;  %v1799_v52 = vsel %vm1797_vm15, %v1798_v37, %v1796_v46  ;;  %v1898_v37 = vand.u32 65535, %v5287_v38 }
 0x1d4   : > { %v1800_v48 = vclz %v1799_v52  ;;  %v1865_v52 = vshrl.u32 %v4098_v13, %v1864_v22 }
 0x1d5   : > { %v5248_v40 = vsel %vm1510_vm12, 0.0, %v1488_v6  ;;  %v1868_v6 = vor.u32 %v1867_v1, %v1866_v43  ;;  %v5279_v63 = vor.u32 %v1870_v41, %v1869_v9  ;;  %v1895_v9 = vsel %vm1883_vm2, %v1877_v49, %v1894_v30 }
 0x1d6   : > { %v5259_v0 = vmul.f32 %v5054_v34, %v5248_v40  ;;  %v3671_v10 = vadd.s32 4294967294, %v1800_v48  ;;  %v1670_v1 = vmul.f32 %v1669_v16, %v5235_v14  ;;  %vm1696_vm12 = vcmp.lt.s32.totalorder %v5146_v50, 0 }
 0x1d7   : > { %v1889_v56 = vsel %vm1881_vm0, %v1868_v6, %v5279_v63  ;;  %v1893_v8 = vsel %vm1881_vm0, %v5279_v63, %v5281_v3 }
 0x1d8   : > { %v2007_v34 = vand.u32 2139095040, %v5259_v0  ;;  %vm3672_vm6 = vcmp.lt.s32.totalorder %v3671_v10, 0  ;;  %v1892_v60 = vsel %vm1882_vm7, %v1889_v56, %v1891_v28  ;;  %v1896_v29 = vsel %vm1882_vm7, %v1893_v8, %v1895_v9 }
 0x1d9   : > { %v1803_v24 = vsel %vm3672_vm6, 0, %v3671_v10  ;;  %v1922_v61 = vand.u32 65535, %v1892_v60  ;;  %v1923_v59 = vshrl.u32 %v1892_v60, 16  ;;  %v1900_v10 = vand.u32 65535, %v1896_v29 }
 0x1da   : > { %v2008_v62 = vshrl.u32 %v2007_v34, 23  ;;  %v1804_v43 = vsub.s32 32, %v1803_v24  ;;  %v1808_v34 = vsub.s32 4294967266, %v1803_v24  ;;  %v1805_v41 = vshll.u32 %v1796_v46, %v1803_v24 }
 0x1db   : > { %v1925_v53 = vmul.u32 %v1923_v59, %v1898_v37  ;;  %v1901_v49 = vshrl.u32 %v1896_v29, 16  ;;  %v1679_v56 = vmul.f32 %v1678_v20, %v5235_v14  ;;  %v1926_v33 = vmul.u32 %v1922_v61, %v1899_v12 }
 0x1dc   : > { %v3676_v4 = vadd.s32 4294967169, %v2008_v62  ;;  %v1806_v57 = vshrl.u32 %v1788_v26, %v1804_v43  ;;  %v1809_v7 = vadd.s32 127, %v1808_v34  ;;  %v1885_v28 = vsel %vm1881_vm0, %v1865_v52, %v1868_v6 }
 0x1dd   : > { %v1928_v62 = vshll.u32 %v1925_v53, 16  ;;  %v1903_v22 = vmul.u32 %v1901_v49, %v1898_v37  ;;  %v1924_v26 = vmul.u32 %v1922_v61, %v1898_v37  ;;  %v1902_v60 = vmul.u32 %v1900_v10, %v1898_v37 }
 0x1de   : > { %v1807_v48 = vor.u32 %v1806_v57, %v1805_v41  ;;  %v1810_v27 = vshll.u32 %v1809_v7, 23  ;;  %v2014_v16 = vadd.s32 1, %v3676_v4  ;;  %v1904_v30 = vmul.u32 %v1900_v10, %v1899_v12 }
 0x1df   : > { %v1927_v43 = vmul.u32 %v1923_v59, %v1899_v12  ;;  %v1905_v8 = vmul.u32 %v1901_v49, %v1899_v12  ;;  %v1906_v9 = vshll.u32 %v1903_v22, 16  ;;  %vm1932_vm8 = vc.u32 %v1924_v26, %v1928_v62 }
 0x1e0   : > { %v1811_v46 = vor.u32 4788187, %v1810_v27  ;;  %v1814_v24 = vcvt.s32.f32 %v1807_v48  ;;  %v1908_v41 = vshll.u32 %v1904_v30, 16  ;;  %v1930_v57 = vshll.u32 %v1926_v33, 16 }
 0x1e1   : > { %v1933_v20 = vsel %vm1932_vm8, 1, %v4104_v47  ;;  %v1934_v7 = vadd.s32 %v1928_v62, %v1924_v26  ;;  %vm1910_vm9 = vc.u32 %v1902_v60, %v1906_v9  ;;  %v1912_v29 = vadd.s32 %v1906_v9, %v1902_v60 }
 0x1e2   : > { %v1812_v34 = vand.u32 2147483647, %v1811_v46  ;;  %v1935_v27 = vadd.s32 %v1933_v20, %v1927_v43  ;;  %v1886_v6 = vsel %vm1884_vm1, %v5281_v3, 2102212464  ;;  %v1911_v37 = vsel %vm1910_vm9, 1, %v4104_v47 }
 0x1e3   : > { %vm1936_vm10 = vc.u32 %v1934_v7, %v1930_v57  ;;  %vm2015_vm13 = vcmp.gt.s32.totalorder %v2014_v16, 0  ;;  %v1913_v61 = vadd.s32 %v1911_v37, %v1905_v8  ;;  %vm1914_vm11 = vc.u32 %v1912_v29, %v1908_v41 }
 0x1e4   : > { %v1815_v4 = vmul.f32 %v1814_v24, %v1812_v34  ;;  %v1929_v59 = vshrl.u32 %v1925_v53, 16  ;;  %v1937_v52 = vsel %vm1936_vm10, 1, %v4104_v47  ;;  %v1915_v48 = vsel %vm1914_vm11, 1, %v4104_v47 }
 0x1e5   : > { %v1939_v10 = vadd.s32 %v1937_v52, %v1935_v27  ;;  %v2016_v49 = vsel %vm2015_vm13, %v2014_v16, 0  ;;  %v1887_v62 = vsel %vm1883_vm2, %v5279_v63, %v1886_v6  ;;  %v1907_v46 = vshrl.u32 %v1903_v22, 16 }
 0x1e6   : > { %v1816_v12 = vxor.u32 2147483648, %v1815_v4  ;;  %v1917_v3 = vadd.s32 %v1915_v48, %v1913_v61  ;;  %v2018_v26 = vand.u32 31, %v2016_v49  ;;  %v1671_v24 = vadd.f32 -0.4999988, %v1670_v1 }
 0x1e7   : > { %v1680_v60 = vadd.f32 1.0, %v1679_v56  ;;  %v1931_v43 = vshrl.u32 %v1926_v33, 16  ;;  %v1940_v34 = vadd.s32 %v1939_v10, %v1929_v59  ;;  %v1909_v53 = vshrl.u32 %v1904_v30, 16 }
 0x1e8   : > { %v1918_v8 = vadd.s32 %v1917_v3, %v1907_v46  ;;  %v6534_v9 = vand.u32 2147483647, %v5259_v0  ;;  %v1817_v16 = vsel %vm1696_vm12, %v1816_v12, %v1815_v4  ;;  %v1888_v41 = vsel %vm1882_vm7, %v1885_v28, %v1887_v62 }
 0x1e9   : > { %v1941_v63 = vadd.s32 %v1940_v34, %v1931_v43  ;;  %v5336_v22 = vsub.s32 32, %v2018_v26  ;;  %v5339_v1 = vand.u32 3, %v5283_v55  ;;  %v5343_v33 = vadd.s32 %v1934_v7, %v1930_v57 }
 0x1ea   : > { %v5341_v56 = vadd.s32 %v1918_v8, %v1909_v53  ;;  %v1672_v30 = vmul.f32 %v1671_v24, %v5235_v14  ;;  %v5347_v20 = vmul.f32 %v1680_v60, %v5221_v5  ;;  %v5358_v55 = vsel %vm5351_vm14, %v5146_v50, %v1817_v16 }
 0x1eb   : > { %v1945_v28 = vadd.s32 1, %v1941_v63  ;;  %v1942_v57 = vmul.u32 %v5287_v38, %v1888_v41  ;;  %v2011_v5 = vand.u32 8388607, %v6534_v9  ;;  %v5365_v7 = vshrl.u32 %v2016_v49, 5 }
 0x1ec   : > { %vm1944_vm15 = vc.u32 %v5341_v56, %v5343_v33  ;;  %v2022_v35 = vshrl.u32 %v4099_v15, %v5336_v22  ;;  %v2030_v4 = vshll.u32 %v6537_v19, %v2018_v26  ;;  %v2025_v27 = vshrl.u32 %v4100_v17, %v5336_v22 }
 0x1ed   : > { %v1946_v14 = vsel %vm1944_vm15, %v1945_v28, %v1941_v63  ;;  %v2028_v38 = vshrl.u32 %v6537_v19, %v5336_v22  ;;  %v2031_v6 = vshrl.u32 %v4102_v21, %v5336_v22  ;;  %v5378_v37 = vmul.f32 %v5358_v55, %v5358_v55 }
 0x1ee   : > { %v1947_v29 = vadd.s32 %v1946_v14, %v1942_v57  ;;  %v2021_v61 = vshll.u32 %v4098_v13, %v2018_v26  ;;  %v2033_v59 = vshll.u32 %v4102_v21, %v2018_v26  ;;  %v2034_v52 = vshrl.u32 %v6535_v32, %v5336_v22 }
 0x1ef   : > { %v2024_v48 = vshll.u32 %v4099_v15, %v2018_v26  ;;  %v2027_v10 = vshll.u32 %v4100_v17, %v2018_v26  ;;  %v2032_v49 = vor.u32 %v2031_v6, %v2030_v4  ;;  %v2012_v62 = vor.u32 8388608, %v2011_v5 }
 0x1f0   : > { %v1948_v12 = vadd.s32 536870912, %v1947_v29  ;;  %v5386_v46 = vor.u32 %v2022_v35, %v2021_v61  ;;  %v2035_v3 = vor.u32 %v2034_v52, %v2033_v59  ;;  %vm2039_vm0 = vcmp.lt.s32.totalorder %v5365_v7, 4 }
 0x1f1   : > { %v5390_v60 = vor.u32 %v2025_v27, %v2024_v48  ;;  %v5392_v43 = vor.u32 %v2028_v38, %v2027_v10  ;;  %v1673_v34 = vadd.f32 1.0, %v1672_v30  ;;  %v1830_v53 = vmul.f32 -0.00019511016, %v5378_v37 }
 0x1f2   : > { %v5388_v24 = vshrl.u32 %v1948_v12, 30  ;;  %v2045_v8 = vsel %vm2039_vm0, %v2032_v49, 920167782  ;;  %vm1685_vm1 = vcmp.lt.s32.totalorder %v5339_v1, 2  ;;  %vm1686_vm2 = vcmp.eq.s32.totalorder %v5339_v1, 0 }
 0x1f3   : > { %v1687_v26 = vxor.u32 2147483648, %v5347_v20  ;;  %vm2036_vm6 = vcmp.lt.s32.totalorder %v5365_v7, 1  ;;  %vm2038_vm7 = vcmp.lt.s32.totalorder %v5365_v7, 3  ;;  %v2049_v41 = vsel %vm2039_vm0, %v2035_v3, 1326507024 }
 0x1f4   : > { %v1950_v16 = vshll.u32 %v5388_v24, 30  ;;  %v5406_v63 = vshll.u32 %v2012_v62, 8  ;;  %v2044_v28 = vsel %vm2036_vm6, %v5386_v46, %v5390_v60  ;;  %v2046_v57 = vsel %vm2038_vm7, %v5392_v43, %v2045_v8 }
 0x1f5   : > { %v2048_v5 = vsel %vm2036_vm6, %v5390_v60, %v5392_v43  ;;  %v1690_v14 = vxor.u32 2147483648, %v1673_v34  ;;  %v1823_v35 = vmul.f32 -0.001358992, %v5378_v37  ;;  %v1831_v4 = vadd.f32 0.008332121, %v1830_v53 }
 0x1f6   : > { %v5408_v30 = vsub.s32 %v1947_v29, %v1950_v16  ;;  %v2050_v29 = vsel %vm2038_vm7, %v2032_v49, %v2049_v41  ;;  %vm1689_vm8 = vcmp.eq.s32.totalorder %v5339_v1, 2  ;;  %vm2037_vm10 = vcmp.lt.s32.totalorder %v5365_v7, 2  ;;  %v1426_v49 = vpop.f32.mrf.mxu0 }
 0x1f7   : > { %v1688_v38 = vsel %vm1686_vm2, %v1673_v34, %v1687_v26  ;;  %v2047_v6 = vsel %vm2037_vm10, %v2044_v28, %v2046_v57  ;;  %v2051_v61 = vsel %vm2037_vm10, %v2048_v5, %v2050_v29  ;;  %v2053_v59 = vand.u32 65535, %v5406_v63  ;;  %v1458_v29 = vpop.f32.mrf.mxu1 }
 0x1f8   : > { %vm1952_vm9 = vcmp.lt.s32.totalorder %v5408_v30, 0  ;;  %v1953_v27 = vsub.s32 0, %v5408_v30  ;;  %v2054_v12 = vshrl.u32 %v5406_v63, 16  ;;  %v2055_v48 = vand.u32 65535, %v2051_v61 }
 0x1f9   : > { %v2056_v10 = vshrl.u32 %v2051_v61, 16  ;;  %v1691_v62 = vsel %vm1689_vm8, %v1690_v14, %v5347_v20  ;;  %v1824_v3 = vadd.f32 0.041655596, %v1823_v35  ;;  %v1832_v34 = vmul.f32 %v1831_v4, %v5378_v37 }
 0x1fa   : > { %v1954_v52 = vsel %vm1952_vm9, %v1953_v27, %v5408_v30  ;;  %v5441_v8 = vsel %vm1685_vm1, %v1688_v38, %v1691_v62  ;;  %v5443_v16 = vmul.u32 %v2055_v48, %v2054_v12  ;;  %v2078_v41 = vshrl.u32 %v2047_v6, 16 }
 0x1fb   : > { %v1955_v53 = vclz %v1954_v52  ;;  %v2058_v26 = vmul.u32 %v2056_v10, %v2053_v59  ;;  %v1818_v28 = vsub.s32 4, %v5253_v51  ;;  %v2020_v5 = vshrl.u32 %v4098_v13, %v5336_v22 }
 0x1fc   : > { %v1427_v20 = vadd.f32 %v5040_v11, %v1426_v49  ;;  %v1943_v14 = vadd.s32 %v5343_v33, %v5341_v56  ;;  %v2057_v35 = vmul.u32 %v2055_v48, %v2053_v59  ;;  %v2077_v1 = vand.u32 65535, %v2047_v6 }
 0x1fd   : > { %v3674_v57 = vadd.s32 4294967294, %v1955_v53  ;;  %v2061_v4 = vshll.u32 %v2058_v26, 16  ;;  %v1825_v27 = vmul.f32 %v1824_v3, %v5378_v37  ;;  %v1833_v38 = vadd.f32 -0.16666654, %v1832_v34 }
 0x1fe   : > { %v2063_v61 = vshll.u32 %v5443_v16, 16  ;;  %v2080_v53 = vmul.u32 %v2078_v41, %v2053_v59  ;;  %v2060_v11 = vmul.u32 %v2056_v10, %v2054_v12  ;;  %v1459_v49 = vadd.f32 %v1458_v29, %v1427_v20  ;;  %v1490_v10 = vpop.f32.mrf.mxu2 }
 0x1ff   : > { %vm3675_vm13 = vcmp.lt.s32.totalorder %v3674_v57, 0  ;;  %vm2065_vm11 = vc.u32 %v2057_v35, %v2061_v4  ;;  %v2067_v62 = vadd.s32 %v2061_v4, %v2057_v35  ;;  %v2081_v6 = vmul.u32 %v2077_v1, %v2054_v12 }
 0x200   : > { %v1958_v52 = vsel %vm3675_vm13, 0, %v3674_v57  ;;  %v2066_v33 = vsel %vm2065_vm11, 1, %v4104_v47  ;;  %v2040_v57 = vsel %vm2036_vm6, %v2020_v5, %v5386_v46  ;;  %v2062_v35 = vshrl.u32 %v2058_v26, 16 }
 0x201   : > { %v1959_v22 = vsub.s32 32, %v1958_v52  ;;  %v1963_v9 = vsub.s32 4294967266, %v1958_v52  ;;  %v1960_v56 = vshll.u32 %v5408_v30, %v1958_v52  ;;  %vm2069_vm15 = vc.u32 %v2067_v62, %v2063_v61 }
 0x202   : > { %v2068_v34 = vadd.s32 %v2066_v33, %v2060_v11  ;;  %v2070_v32 = vsel %vm2069_vm15, 1, %v4104_v47  ;;  %v2079_v4 = vmul.u32 %v2077_v1, %v2053_v59  ;;  %v2083_v19 = vshll.u32 %v2080_v53, 16 }
 0x203   : > { %v1961_v48 = vshrl.u32 %v1943_v14, %v1959_v22  ;;  %v1964_v3 = vadd.s32 127, %v1963_v9  ;;  %v2082_v52 = vmul.u32 %v2078_v41, %v2054_v12  ;;  %vm1851_vm1 = vcmp.lt.s32.totalorder %v5229_v18, 0 }
 0x204   : > { %v2072_v30 = vadd.s32 %v2070_v32, %v2068_v34  ;;  %v2085_v61 = vshll.u32 %v2081_v6, 16  ;;  %vm2087_vm2 = vc.u32 %v2079_v4, %v2083_v19  ;;  %v2089_v9 = vadd.s32 %v2083_v19, %v2079_v4 }
 0x205   : > { %v1962_v20 = vor.u32 %v1961_v48, %v1960_v56  ;;  %v1965_v29 = vshll.u32 %v1964_v3, 23  ;;  %v5461_v14 = vadd.s32 32, %v5048_v2  ;;  %v2088_v46 = vsel %vm2087_vm2, 1, %v4104_v47 }
 0x206   : > { %v2073_v22 = vadd.s32 %v2072_v30, %v2062_v35  ;;  %v1491_v26 = vadd.f32 %v1490_v10, %v1459_v49  ;;  %v2041_v59 = vsel %vm2039_vm0, %v5392_v43, 2102212464  ;;  %v2090_v5 = vadd.s32 %v2088_v46, %v2082_v52 }
 0x207   : > { %v1966_v62 = vor.u32 4788187, %v1965_v29  ;;  %vm2091_vm6 = vc.u32 %v2089_v9, %v2085_v61  ;;  %v1506_v32 = vadd.s32 %v5045_v31, %v5461_v14  ;;  %v1969_v41 = vcvt.s32.f32 %v1962_v20 }
 0x208   : > { %v2064_v19 = vshrl.u32 %v5443_v16, 16  ;;  %v2092_v1 = vsel %vm2091_vm6, 1, %v4104_v47  ;;  %v1834_v11 = vmul.f32 %v1833_v38, %v5378_v37  ;;  %v2084_v56 = vshrl.u32 %v2080_v53, 16  ;;  %v3859_v53 = vld [vmem:[#allocation6 + $0x1] ss:$0 sm:$0xff] }
 0x209   : > { %v1967_v12 = vand.u32 2147483647, %v1966_v62  ;;  %v2094_v33 = vadd.s32 %v2092_v1, %v2090_v5  ;;  %vm1511_vm8 = vcmp.lt.s32.totalorder %v1506_v32, 0  ;;  %v2042_v43 = vsel %vm2038_vm7, %v5390_v60, %v2041_v59  ;;  %v5524_v32 = vld [vmem:[#allocation8 + $0x1] ss:$0 sm:$0xff] }
 0x20a   : > { %v5475_v48 = vadd.s32 %v2073_v22, %v2064_v19  ;;  %v5477_v3 = vsel %vm1511_vm8, 0.0, %v1491_v26  ;;  %v1819_v31 = vsel %vm1696_vm12, %v1818_v28, %v5253_v51  ;;  %v2086_v16 = vshrl.u32 %v2081_v6, 16 }
 0x20b   : > { %v1970_v49 = vmul.f32 %v1969_v41, %v1967_v12  ;;  %v2095_v38 = vadd.s32 %v2094_v33, %v2084_v56  ;;  %v5485_v34 = vmul.f32 %v3859_v53, %v5477_v3  ;;  %v1826_v35 = vadd.f32 -0.4999988, %v1825_v27 }
 0x20c   : > { %vm5489_vm0 = vcmp.le.f32.partialorder %v1849_v36, 0.7853982  ;;  %v5493_v10 = vadd.s32 %v2089_v9, %v2085_v61  ;;  %v1835_v20 = vadd.f32 1.0, %v1834_v11  ;;  %v2043_v51 = vsel %vm2037_vm10, %v2040_v57, %v2042_v43 }
 0x20d   : > { %v1971_v4 = vxor.u32 2147483648, %v1970_v49  ;;  %v2096_v28 = vadd.s32 %v2095_v38, %v2086_v16  ;;  %v2162_v6 = vand.u32 2139095040, %v5485_v34  ;;  %v1821_v29 = vsel %vm5351_vm14, 0, %v1819_v31 }
 0x20e   : > { %v1973_v36 = vsub.s32 4, %v5388_v24  ;;  %vm2099_vm12 = vc.u32 %v5475_v48, %v5493_v10  ;;  %vm1682_vm7 = vweird.f32 %v5060_v42  ;;  %v1827_v52 = vmul.f32 %v1826_v35, %v5378_v37 }
 0x20f   : > { %v1972_v27 = vsel %vm1851_vm1, %v1971_v4, %v1970_v49  ;;  %v2100_v57 = vadd.s32 1, %v2096_v28  ;;  %v2163_v30 = vshrl.u32 %v2162_v6, 23  ;;  %v1693_v25 = vsel %vm1682_vm7, nan, %v5441_v8 }
 0x210   : > { %v5509_v7 = vsel %vm5489_vm0, %v5229_v18, %v1972_v27  ;;  %v2097_v9 = vmul.u32 %v5406_v63, %v2043_v51  ;;  %v1836_v62 = vmul.f32 %v1835_v20, %v5358_v55  ;;  %v1838_v42 = vadd.s32 3, %v1821_v29 }
 0x211   : > { %v5515_v61 = vmul.f32 %v5509_v7, %v5509_v7  ;;  %v2101_v22 = vsel %vm2099_vm12, %v2100_v57, %v2096_v28  ;;  %v3679_v46 = vadd.s32 4294967169, %v2163_v30  ;;  %v1974_v26 = vsel %vm1851_vm1, %v1973_v36, %v5388_v24 }
 0x212   : > { %v2102_v8 = vadd.s32 %v2101_v22, %v2097_v9  ;;  %v2159_v37 = vand.u32 2147483647, %v5485_v34  ;;  %v2314_v5 = vmul.f32 %v1693_v25, %v1693_v25  ;;  %v1828_v41 = vadd.f32 1.0, %v1827_v52 }
 0x213   : > { %v1985_v59 = vmul.f32 -0.00019511016, %v5515_v61  ;;  %v1978_v12 = vmul.f32 -0.001358992, %v5515_v61  ;;  %v2169_v63 = vadd.s32 1, %v3679_v46  ;;  %v1839_v19 = vand.u32 3, %v1838_v42 }
 0x214   : > { %v2103_v55 = vadd.s32 536870912, %v2102_v8  ;;  %v1976_v1 = vsel %vm5489_vm0, 0, %v1974_v26  ;;  %v1842_v24 = vxor.u32 2147483648, %v1836_v62  ;;  %v2166_v33 = vand.u32 8388607, %v2159_v37 }
 0x215   : > { %v1986_v11 = vadd.f32 0.008332121, %v1985_v59  ;;  %vm2170_vm14 = vcmp.gt.s32.totalorder %v2169_v63, 0  ;;  %v2322_v43 = vmul.f32 %v5524_v32, %v2314_v5  ;;  %v1979_v31 = vadd.f32 0.041655596, %v1978_v12 }
 0x216   : > { %v5529_v56 = vshrl.u32 %v2103_v55, 30  ;;  %v2171_v49 = vsel %vm2170_vm14, %v2169_v63, 0  ;;  %v1845_v38 = vxor.u32 2147483648, %v1828_v41  ;;  %vm1841_vm9 = vcmp.eq.s32.totalorder %v1839_v19, 0 }
 0x217   : > { %v2173_v16 = vand.u32 31, %v2171_v49  ;;  %v1987_v35 = vmul.f32 %v1986_v11, %v5515_v61  ;;  %v1993_v60 = vadd.s32 3, %v1976_v1  ;;  %v1843_v4 = vsel %vm1841_vm9, %v1828_v41, %v1842_v24 }
 0x218   : > { %v2105_v53 = vshll.u32 %v5529_v56, 30  ;;  %v2167_v51 = vor.u32 8388608, %v2166_v33  ;;  %v5541_v6 = vadd.f32 %v2322_v43, %v5056_v58  ;;  %vm1844_vm10 = vcmp.eq.s32.totalorder %v1839_v19, 2 }
 0x219   : > { %v5538_v28 = vsub.s32 32, %v2173_v16  ;;  %v1980_v29 = vmul.f32 %v1979_v31, %v5515_v61  ;;  %vm1840_vm13 = vcmp.lt.s32.totalorder %v1839_v19, 2  ;;  %v1846_v27 = vsel %vm1844_vm10, %v1845_v38, %v1836_v62  ;;  %v2382_v62 = vld [vmem:[#allocation9 + $0x1f8] sm:$0xff]  ;;  %v2381_v19 = vld [vmem:[#allocation9 + $0x1f0] sm:$0xff] }
 0x21a   : > { %v5536_v20 = vsub.s32 %v2102_v8, %v2105_v53  ;;  %vm1837_vm15 = vweird.f32 %v5146_v50  ;;  %v1847_v57 = vsel %vm1840_vm13, %v1843_v4, %v1846_v27  ;;  %v1988_v30 = vadd.f32 -0.16666654, %v1987_v35  ;;  %2420 = vmatpush.msra.mxu3 %v2382_v62  ;;  %v2380_v35 = vld [vmem:[#allocation9 + $0x1e8] sm:$0xff] }
 0x21b   : > { %v5547_v25 = vand.u32 3, %v1993_v60  ;;  %v2177_v58 = vshrl.u32 %v4099_v15, %v5538_v28  ;;  %v2180_v9 = vshrl.u32 %v4100_v17, %v5538_v28  ;;  %v5554_v42 = vshll.u32 %v2167_v51, 8 }
 0x21c   : > { %vm2107_vm11 = vcmp.lt.s32.totalorder %v5536_v20, 0  ;;  %v2108_v36 = vsub.s32 0, %v5536_v20  ;;  %v1981_v22 = vadd.f32 -0.4999988, %v1980_v29  ;;  %v2176_v26 = vshll.u32 %v4098_v13, %v2173_v16  ;;  %2421 = vmatpush.msra.mxu3 %v2381_v19  ;;  %v2414_v19 = vld [vmem:[#allocation9 + $0x2f8] sm:$0xff] }
 0x21d   : > { %v2186_v59 = vshrl.u32 %v4102_v21, %v5538_v28  ;;  %v2179_v8 = vshll.u32 %v4099_v15, %v2173_v16  ;;  %v6576_v5 = vmov 2102212464   ;;  %v6577_v41 = vmov 1326507024   ;;  %2484 = vmatpush.msrb.mxu1 %v2414_v19 }
 0x21e   : > { %v2109_v52 = vsel %vm2107_vm11, %v2108_v36, %v5536_v20  ;;  %v2183_v12 = vshrl.u32 %v6576_v5, %v5538_v28  ;;  %v2185_v63 = vshll.u32 %v6576_v5, %v2173_v16  ;;  %v2189_v55 = vshrl.u32 %v6577_v41, %v5538_v28  ;;  %2422 = vmatpush.msra.mxu3 %v2380_v35  ;;  %v2376_v35 = vld [vmem:[#allocation9 + $0x1c8] sm:$0xff] }
 0x21f   : > { %v2110_v46 = vclz %v2109_v52  ;;  %v1989_v1 = vmul.f32 %v1988_v30, %v5515_v61  ;;  %v5566_v24 = vshrl.u32 %v2171_v49, 5  ;;  %v2182_v33 = vshll.u32 %v4100_v17, %v2173_v16 }
 0x220   : > { %vm2006_vm1 = vcmp.lt.s32.totalorder %v5259_v0, 0  ;;  %v5570_v43 = vor.u32 %v2177_v58, %v2176_v26  ;;  %v5572_v31 = vor.u32 %v2180_v9, %v2179_v8  ;;  %v2187_v38 = vor.u32 %v2186_v59, %v2185_v63 }
 0x221   : > { %v3677_v11 = vadd.s32 4294967294, %v2110_v46  ;;  %v2188_v53 = vshll.u32 %v4102_v21, %v2173_v16  ;;  %v5577_v60 = vsel %vm1837_vm15, nan, %v1847_v57  ;;  %v2098_v49 = vadd.s32 %v5493_v10, %v5475_v48  ;;  %v2379_v16 = vld [vmem:[#allocation9 + $0x1e0] sm:$0xff]  ;;  %v2378_v57 = vld [vmem:[#allocation9 + $0x1d8] sm:$0xff] }
 0x222   : > { %v5582_v4 = vand.u32 65535, %v5554_v42  ;;  %v1982_v51 = vmul.f32 %v1981_v22, %v5515_v61  ;;  %v5585_v27 = vor.u32 %v2183_v12, %v2182_v33  ;;  %vm2191_vm6 = vcmp.lt.s32.totalorder %v5566_v24, 1  ;;  %2423 = vmatpush.msra.mxu3 %v2379_v16  ;;  %v2397_v16 = vld [vmem:[#allocation9 + $0x270] sm:$0xff] }
 0x223   : > { %vm3678_vm2 = vcmp.lt.s32.totalorder %v3677_v11, 0  ;;  %v2190_v36 = vor.u32 %v2189_v55, %v2188_v53  ;;  %vm2194_vm8 = vcmp.lt.s32.totalorder %v5566_v24, 4  ;;  %v1990_v50 = vadd.f32 1.0, %v1989_v1  ;;  %v2398_v55 = vld [vmem:[#allocation9 + $0x278] sm:$0xff] }
 0x224   : > { %v2113_v29 = vsel %vm3678_vm2, 0, %v3677_v11  ;;  %v2128_v48 = vsub.s32 4, %v5529_v56  ;;  %v2199_v10 = vsel %vm2191_vm6, %v5570_v43, %v5572_v31  ;;  %v2200_v61 = vsel %vm2194_vm8, %v2187_v38, 920167782  ;;  %2424 = vmatpush.msra.mxu3 %v2378_v57  ;;  %2452 = vmatpush.msrb.mxu0 %v2398_v55 }
 0x225   : > { %v2114_v30 = vsub.s32 32, %v2113_v29  ;;  %v2118_v52 = vsub.s32 4294967266, %v2113_v29  ;;  %v2115_v58 = vshll.u32 %v5536_v20, %v2113_v29  ;;  %vm2193_vm0 = vcmp.lt.s32.totalorder %v5566_v24, 3  ;;  %v2377_v20 = vld [vmem:[#allocation9 + $0x1d0] sm:$0xff] }
 0x226   : > { %vm2192_vm12 = vcmp.lt.s32.totalorder %v5566_v24, 2  ;;  %v2201_v22 = vsel %vm2193_vm0, %v5585_v27, %v2200_v61  ;;  %v2203_v46 = vsel %vm2191_vm6, %v5572_v31, %v5585_v27  ;;  %v2204_v26 = vsel %vm2194_vm8, %v2190_v36, 1326507024  ;;  %2425 = vmatpush.msra.mxu3 %v2377_v20  ;;  %2453 = vmatpush.msrb.mxu0 %v2397_v16  ;;  %v2373_v16 = vld [vmem:[#allocation9 + $0x1b0] sm:$0xff] }
 0x227   : > { %v2116_v9 = vshrl.u32 %v2098_v49, %v2114_v30  ;;  %v2119_v62 = vadd.s32 127, %v2118_v52  ;;  %v5608_v59 = vadd.f32 1.0, %v1982_v51  ;;  %v2202_v63 = vsel %vm2192_vm12, %v2199_v10, %v2201_v22  ;;  %v2413_v30 = vld [vmem:[#allocation9 + $0x2f0] sm:$0xff]  ;;  %v2412_v22 = vld [vmem:[#allocation9 + $0x2e8] sm:$0xff] }
 0x228   : > { %v5613_v1 = vmul.f32 %v1990_v50, %v5509_v7  ;;  %v2205_v11 = vsel %vm2193_vm0, %v2187_v38, %v2204_v26  ;;  %v2232_v33 = vand.u32 65535, %v2202_v63  ;;  %v2233_v53 = vshrl.u32 %v2202_v63, 16  ;;  %2426 = vmatpush.msra.mxu3 %v2376_v35  ;;  %2485 = vmatpush.msrb.mxu1 %v2413_v30 }
 0x229   : > { %v2117_v8 = vor.u32 %v2116_v9, %v2115_v58  ;;  %v2120_v12 = vshll.u32 %v2119_v62, 23  ;;  %v6578_v49 = vand.u32 2147483647, %v5259_v0  ;;  %v5626_v7 = vsel %vm2006_vm1, %v2128_v48, %v5529_v56  ;;  %v2375_v56 = vld [vmem:[#allocation9 + $0x1c0] sm:$0xff]  ;;  %v2396_v62 = vld [vmem:[#allocation9 + $0x268] sm:$0xff] }
 0x22a   : > { %v2206_v38 = vsel %vm2192_vm12, %v2203_v46, %v2205_v11  ;;  %v2209_v36 = vshrl.u32 %v5554_v42, 16  ;;  %v2175_v52 = vshrl.u32 %v4098_v13, %v5538_v28  ;;  %v5634_v61 = vmul.u32 %v2233_v53, %v5582_v4  ;;  %2427 = vmatpush.msra.mxu3 %v2375_v56  ;;  %2454 = vmatpush.msrb.mxu0 %v2396_v62  ;;  %v2411_v11 = vld [vmem:[#allocation9 + $0x2e0] sm:$0xff]  ;;  %v2410_v56 = vld [vmem:[#allocation9 + $0x2d8] sm:$0xff]  ;;  %v2393_v62 = vld [vmem:[#allocation9 + $0x250] sm:$0xff] }
 0x22b   : > { %vm5619_vm7 = vcmp.le.f32.partialorder %v6578_v49, 0.7853982  ;;  %v2121_v29 = vor.u32 4788187, %v2120_v12  ;;  %v2210_v50 = vand.u32 65535, %v2206_v38  ;;  %v2211_v10 = vshrl.u32 %v2206_v38, 16  ;;  %2486 = vmatpush.msrb.mxu1 %v2412_v22 }
 0x22c   : > { %v2000_v48 = vxor.u32 2147483648, %v5608_v59  ;;  %v2124_v58 = vcvt.s32.f32 %v2117_v8  ;;  %v5637_v9 = vmul.u32 %v2232_v33, %v2209_v36  ;;  %v1997_v46 = vxor.u32 2147483648, %v5613_v1  ;;  %v2374_v12 = vld [vmem:[#allocation9 + $0x1b8] sm:$0xff]  ;;  %v2409_v22 = vld [vmem:[#allocation9 + $0x2d0] sm:$0xff] }
 0x22d   : > { %v2122_v57 = vand.u32 2147483647, %v2121_v29  ;;  %v5643_v28 = vsel %vm2191_vm6, %v2175_v52, %v5570_v43  ;;  %v5646_v26 = vmul.u32 %v2211_v10, %v5582_v4  ;;  %v5648_v20 = vmul.u32 %v2210_v50, %v2209_v36  ;;  %v2395_v43 = vld [vmem:[#allocation9 + $0x260] sm:$0xff]  ;;  %2428 = vmatpush.msra.mxu3 %v2374_v12  ;;  %v2394_v52 = vld [vmem:[#allocation9 + $0x258] sm:$0xff]  ;;  %2487 = vmatpush.msrb.mxu1 %v2411_v11 }
 0x22e   : > { %vm1996_vm14 = vcmp.eq.s32.totalorder %v5547_v25, 0  ;;  %v2196_v63 = vsel %vm2194_vm8, %v5585_v27, 2102212464  ;;  %v2234_v55 = vmul.u32 %v2232_v33, %v5582_v4  ;;  %v2238_v19 = vshll.u32 %v5634_v61, 16  ;;  %2455 = vmatpush.msrb.mxu0 %v2395_v43 }
 0x22f   : > { %v2125_v8 = vmul.f32 %v2124_v58, %v2122_v57  ;;  %v2212_v35 = vmul.u32 %v2210_v50, %v5582_v4  ;;  %v2215_v49 = vmul.u32 %v2211_v10, %v2209_v36  ;;  %v2216_v29 = vshll.u32 %v5646_v26, 16  ;;  %2429 = vmatpush.msra.mxu3 %v2373_v16  ;;  %2488 = vmatpush.msrb.mxu1 %v2410_v56  ;;  %v2408_v16 = vld [vmem:[#allocation9 + $0x2c8] sm:$0xff] }
 0x230   : > { %v2237_v38 = vmul.u32 %v2233_v53, %v2209_v36  ;;  %vm1999_vm9 = vcmp.eq.s32.totalorder %v5547_v25, 2  ;;  %v2240_v27 = vshll.u32 %v5637_v9, 16  ;;  %vm2242_vm10 = vc.u32 %v2234_v55, %v2238_v19  ;;  %2456 = vmatpush.msrb.mxu0 %v2394_v52  ;;  %v2372_v36 = vld [vmem:[#allocation9 + $0x1a8] sm:$0xff] }
 0x231   : > { %v2126_v30 = vxor.u32 2147483648, %v2125_v8  ;;  %v5660_v33 = vadd.s32 %v2238_v19, %v2234_v55  ;;  %v2218_v4 = vshll.u32 %v5648_v20, 16  ;;  %vm2220_vm13 = vc.u32 %v2212_v35, %v2216_v29  ;;  %2430 = vmatpush.msra.mxu3 %v2372_v36  ;;  %v2371_v19 = vld [vmem:[#allocation9 + $0x1a0] sm:$0xff]  ;;  %2489 = vmatpush.msrb.mxu1 %v2409_v22 }
 0x232   : > { %v2222_v50 = vadd.s32 %v2216_v29, %v2212_v35  ;;  %v2243_v53 = vsel %vm2242_vm10, 1, %v4104_v47  ;;  %v2221_v57 = vsel %vm2220_vm13, 1, %v4104_v47  ;;  %2457 = vmatpush.msrb.mxu0 %v2393_v62  ;;  %v2239_v35 = vshrl.u32 %v5634_v61, 16 }
 0x233   : > { %v2127_v10 = vsel %vm2006_vm1, %v2126_v30, %v2125_v8  ;;  %v2245_v58 = vadd.s32 %v2243_v53, %v2237_v38  ;;  %vm2246_vm11 = vc.u32 %v5660_v33, %v2240_v27  ;;  %v2223_v55 = vadd.s32 %v2221_v57, %v2215_v49  ;;  %v2392_v38 = vld [vmem:[#allocation9 + $0x248] sm:$0xff]  ;;  %2431 = vmatpush.msra.mxu3 %v2371_v19  ;;  %v2407_v57 = vld [vmem:[#allocation9 + $0x2c0] sm:$0xff]  ;;  %v2390_v19 = vld [vmem:[#allocation9 + $0x238] sm:$0xff] }
 0x234   : > { %v5673_v12 = vsel %vm5619_vm7, %v5259_v0, %v2127_v10  ;;  %vm2224_vm15 = vc.u32 %v2222_v50, %v2218_v4  ;;  %v2247_v8 = vsel %vm2246_vm11, 1, %v4104_v47  ;;  %v2197_v49 = vsel %vm2193_vm0, %v5572_v31, %v2196_v63  ;;  %2458 = vmatpush.msrb.mxu0 %v2392_v38  ;;  %v2370_v4 = vld [vmem:[#allocation9 + $0x198] sm:$0xff]  ;;  %2490 = vmatpush.msrb.mxu1 %v2408_v16  ;;  %v2391_v10 = vld [vmem:[#allocation9 + $0x240] sm:$0xff]  ;;  %v2405_v38 = vld [vmem:[#allocation9 + $0x2b0] sm:$0xff] }
 0x235   : > { %v5678_v43 = vmul.f32 %v5673_v12, %v5673_v12  ;;  %v2225_v11 = vsel %vm2224_vm15, 1, %v4104_v47  ;;  %v2249_v29 = vadd.s32 %v2247_v8, %v2245_v58  ;;  %v2217_v30 = vshrl.u32 %v5646_v26, 16  ;;  %2432 = vmatpush.msra.mxu3 %v2370_v4  ;;  %v2369_v58 = vld [vmem:[#allocation9 + $0x190] sm:$0xff]  ;;  %v2388_v16 = vld [vmem:[#allocation9 + $0x228] sm:$0xff] }
 0x236   : > { %v2227_v52 = vadd.s32 %v2225_v11, %v2223_v55  ;;  %v2241_v56 = vshrl.u32 %v5637_v9, 16  ;;  %v2315_v50 = vmul.f32 %v5577_v60, %v5577_v60  ;;  %v1998_v31 = vsel %vm1996_vm14, %v5608_v59, %v1997_v46  ;;  %2459 = vmatpush.msrb.mxu0 %v2391_v10  ;;  %2491 = vmatpush.msrb.mxu1 %v2407_v57  ;;  %v2406_v11 = vld [vmem:[#allocation9 + $0x2b8] sm:$0xff]  ;;  %v2368_v46 = vld [vmem:[#allocation9 + $0x188] sm:$0xff]  ;;  %v2389_v59 = vld [vmem:[#allocation9 + $0x230] sm:$0xff] }
 0x237   : > { %v2133_v61 = vmul.f32 -0.001358992, %v5678_v43  ;;  %v2140_v53 = vmul.f32 -0.00019511016, %v5678_v43  ;;  %v2250_v36 = vadd.s32 %v2249_v29, %v2239_v35  ;;  %v2131_v26 = vsel %vm5619_vm7, 0, %v5626_v7  ;;  %2433 = vmatpush.msra.mxu3 %v2369_v58 }
 0x238   : > { %v2219_v60 = vshrl.u32 %v5648_v20, 16  ;;  %v2228_v63 = vadd.s32 %v2227_v52, %v2217_v30  ;;  %v2198_v55 = vsel %vm2192_vm12, %v5643_v28, %v2197_v49  ;;  %vm1995_vm1 = vcmp.lt.s32.totalorder %v5547_v25, 2  ;;  %2460 = vmatpush.msrb.mxu0 %v2390_v19  ;;  %2492 = vmatpush.msrb.mxu1 %v2406_v11  ;;  %v2404_v49 = vld [vmem:[#allocation9 + $0x2a8] sm:$0xff] }
 0x239   : > { %v2134_v62 = vadd.f32 0.041655596, %v2133_v61  ;;  %v2141_v22 = vadd.f32 0.008332121, %v2140_v53  ;;  %v2251_v8 = vadd.s32 %v2250_v36, %v2241_v56  ;;  %v2001_v51 = vsel %vm1999_vm9, %v2000_v48, %v5613_v1  ;;  %2434 = vmatpush.msra.mxu3 %v2368_v46  ;;  %v2367_v48 = vld [vmem:[#allocation9 + $0x180] sm:$0xff]  ;;  %v2384_v11 = vld [vmem:[#allocation9 + $0x208] sm:$0xff] }
 0x23a   : > { %v5709_v7 = vadd.s32 %v2228_v63, %v2219_v60  ;;  %v5714_v24 = vadd.s32 %v5660_v33, %v2240_v27  ;;  %v2002_v28 = vsel %vm1995_vm1, %v1998_v31, %v2001_v51  ;;  %v2148_v25 = vadd.s32 3, %v2131_v26  ;;  %2461 = vmatpush.msrb.mxu0 %v2389_v59  ;;  %2493 = vmatpush.msrb.mxu1 %v2405_v38  ;;  %v2403_v61 = vld [vmem:[#allocation9 + $0x2a0] sm:$0xff]  ;;  %v2386_v26 = vld [vmem:[#allocation9 + $0x218] sm:$0xff] }
 0x23b   : > { %v2135_v20 = vmul.f32 %v2134_v62, %v5678_v43  ;;  %v2142_v35 = vmul.f32 %v2141_v22, %v5678_v43  ;;  %v2255_v29 = vadd.s32 1, %v2251_v8  ;;  %v2252_v1 = vmul.u32 %v5554_v42, %v2198_v55  ;;  %2435 = vmatpush.msra.mxu3 %v2367_v48  ;;  %v2385_v62 = vld [vmem:[#allocation9 + $0x210] sm:$0xff]  ;;  %v2399_v59 = vld [vmem:[#allocation9 + $0x280] sm:$0xff] }
 0x23c   : > { %vm2254_vm2 = vc.u32 %v5709_v7, %v5714_v24  ;;  %vm1992_vm6 = vweird.f32 %v5229_v18  ;;  %v2323_v30 = vmul.f32 %v5524_v32, %v2315_v50  ;;  %2462 = vmatpush.msrb.mxu0 %v2388_v16  ;;  %2436 = vmatmul.f32.vlgmr.msra.gmra.mxu3 %v5541_v6  ;;  %v2387_v18 = vld [vmem:[#allocation9 + $0x220] sm:$0xff]  ;;  %v2149_v53 = vand.u32 3, %v2148_v25  ;;  %v2402_v50 = vld [vmem:[#allocation9 + $0x298] sm:$0xff]  ;;  %v2401_v22 = vld [vmem:[#allocation9 + $0x290] sm:$0xff] }
 0x23d   : > { %v2136_v9 = vadd.f32 -0.4999988, %v2135_v20  ;;  %v2143_v27 = vadd.f32 -0.16666654, %v2142_v35  ;;  %v2256_v33 = vsel %vm2254_vm2, %v2255_v29, %v2251_v8  ;;  %v2003_v52 = vsel %vm1992_vm6, nan, %v2002_v28  ;;  %2494 = vmatpush.msrb.mxu1 %v2404_v49  ;;  %v2383_v29 = vld [vmem:[#allocation9 + $0x200] sm:$0xff] }
 0x23e   : > { %v2257_v56 = vadd.s32 %v2256_v33, %v2252_v1  ;;  %2463 = vmatpush.msrb.mxu0 %v2387_v18  ;;  %v2316_v10 = vmul.f32 %v2003_v52, %v2003_v52  ;;  %v2328_v60 = vadd.f32 %v2323_v30, %v5142_v45  ;;  %vm2150_vm8 = vcmp.lt.s32.totalorder %v2149_v53, 2  ;;  %v2400_v45 = vld [vmem:[#allocation9 + $0x288] sm:$0xff] }
 0x23f   : > { %v2137_v42 = vmul.f32 %v2136_v9, %v5678_v43  ;;  %v2144_v4 = vmul.f32 %v2143_v27, %v5678_v43  ;;  %2495 = vmatpush.msrb.mxu1 %v2403_v61  ;;  %vm2151_vm0 = vcmp.eq.s32.totalorder %v2149_v53, 0  ;;  %vm2154_vm12 = vcmp.eq.s32.totalorder %v2149_v53, 2 }
 0x240   : > { %v2258_v36 = vadd.s32 536870912, %v2257_v56  ;;  %2464 = vmatpush.msrb.mxu0 %v2386_v26  ;;  %v2324_v8 = vmul.f32 %v5524_v32, %v2316_v10  ;;  %v2339_v46 = vrot.slane %v2328_v60, 3  ;;  %v2353_v28 = vrot.slane %v2328_v60, 6 }
 0x241   : > { %v2138_v57 = vadd.f32 1.0, %v2137_v42  ;;  %v2145_v31 = vadd.f32 1.0, %v2144_v4  ;;  %2496 = vmatpush.msrb.mxu1 %v2402_v50  ;;  %vm2337_vm7 = vcmask 1044480   ;;  %v2352_v38 = vrot.slane %v5541_v6, 6 }
 0x242   : > { %v5727_v63 = vshrl.u32 %v2258_v36, 30  ;;  %2465 = vmatpush.msrb.mxu0 %v2385_v62  ;;  %vm2147_vm14 = vweird.f32 %v5259_v0  ;;  %v2329_v33 = vadd.f32 %v2324_v8, %v5223_v23  ;;  %v2253_v23 = vadd.s32 %v5714_v24, %v5709_v7 }
 0x243   : > { %v2146_v58 = vmul.f32 %v2145_v31, %v5673_v12  ;;  %v2155_v43 = vxor.u32 2147483648, %v2138_v57  ;;  %2497 = vmatpush.msrb.mxu1 %v2401_v22  ;;  %v2338_v12 = vrot.slane %v5541_v6, 3  ;;  %v2354_v27 = vsel %vm331_vm5, %v2352_v38, %v2353_v28 }
 0x244   : > { %v2260_v55 = vshll.u32 %v5727_v63, 30  ;;  %2466 = vmatpush.msrb.mxu0 %v2384_v11  ;;  %2439 = vmatmul.f32.gmra.mxu3 %v2328_v60  ;;  %v2341_v52 = vrot.slane %v2329_v33, 3  ;;  %vm2161_vm13 = vcmp.lt.s32.totalorder %v5485_v34, 0  ;;  %vm2160_vm11 = vcmp.le.f32.partialorder %v2159_v37, 0.7853982 }
 0x245   : > { %v2152_v19 = vxor.u32 2147483648, %v2146_v58  ;;  %v2156_v35 = vsel %vm2154_vm12, %v2155_v43, %v2146_v58  ;;  %2498 = vmatpush.msrb.mxu1 %v2400_v45  ;;  %v2340_v9 = vsel %vm2337_vm7, %v2338_v12, %v2339_v46  ;;  %vm2302_vm6 = vweird.f32 %v5485_v34 }
 0x246   : > { %v2261_v51 = vsub.s32 %v2257_v56, %v2260_v55  ;;  %2467 = vmatpush.msrb.mxu0 %v2383_v29  ;;  %v2355_v56 = vrot.slane %v2329_v33, 6  ;;  %v2342_v4 = vsel %vm2337_vm7, %v2339_v46, %v2341_v52 }
 0x247   : > { %v2153_v20 = vsel %vm2151_vm0, %v2138_v57, %v2152_v19  ;;  %2499 = vmatpush.msrb.mxu1 %v2399_v59  ;;  %2468 = vmatmul.f32.vlgmr.msrb.gmra.mxu0 %v2340_v9  ;;  %v2283_v19 = vsub.s32 4, %v5727_v63 }
 0x248   : > { %v2157_v25 = vsel %vm2150_vm8, %v2153_v20, %v2156_v35  ;;  %vm2262_vm9 = vcmp.lt.s32.totalorder %v2261_v51, 0  ;;  %v2263_v1 = vsub.s32 0, %v2261_v51  ;;  %2500 = vmatmul.f32.vlgmr.msrb.gmra.mxu1 %v2354_v27  ;;  %v2356_v18 = vsel %vm331_vm5, %v2353_v28, %v2355_v56 }
 0x249   : > { %v2158_v48 = vsel %vm2147_vm14, nan, %v2157_v25  ;;  %v2284_v46 = vsel %vm2161_vm13, %v2283_v19, %v5727_v63 }
 0x24a   : > { %v2317_v16 = vmul.f32 %v2158_v48, %v2158_v48  ;;  %v2264_v49 = vsel %vm2262_vm9, %v2263_v1, %v2261_v51  ;;  %v2286_v35 = vsel %vm2160_vm11, 0, %v2284_v46 }
 0x24b   : > { %v2265_v6 = vclz %v2264_v49  ;;  %v2303_v1 = vadd.s32 3, %v2286_v35 }
 0x24c   : > { %v2325_v0 = vmul.f32 %v5524_v32, %v2317_v16  ;;  %2442 = vmatmul.f32.gmra.mxu3 %v2329_v33 }
 0x24d   : > { %v3680_v30 = vadd.s32 4294967294, %v2265_v6  ;;  %v2304_v33 = vand.u32 3, %v2303_v1 }
 0x24e   : > { %v2330_v36 = vadd.f32 %v2325_v0, %v5248_v40 }
 0x24f   : > { %vm3681_vm10 = vcmp.lt.s32.totalorder %v3680_v30, 0  ;;  %2471 = vmatmul.f32.gmra.mxu0 %v2342_v4  ;;  %vm2306_vm15 = vcmp.eq.s32.totalorder %v2304_v33, 0  ;;  %vm2309_vm1 = vcmp.eq.s32.totalorder %v2304_v33, 2  ;;  %vm2305_vm2 = vcmp.lt.s32.totalorder %v2304_v33, 2 }
 0x250   : > { %v2268_v42 = vsel %vm3681_vm10, 0, %v3680_v30  ;;  %2503 = vmatmul.f32.gmra.mxu1 %v2356_v18  ;;  %v2343_v60 = vrot.slane %v2330_v36, 3  ;;  %v2357_v58 = vrot.slane %v2330_v36, 6 }
 0x251   : > { %v2269_v61 = vsub.s32 32, %v2268_v42  ;;  %v2273_v53 = vsub.s32 4294967266, %v2268_v42  ;;  %v2270_v10 = vshll.u32 %v2261_v51, %v2268_v42 }
 0x252   : > { %v2344_v62 = vsel %vm2337_vm7, %v2341_v52, %v2343_v60  ;;  %v2358_v22 = vsel %vm331_vm5, %v2355_v56, %v2357_v58 }
 0x253   : > { %v2271_v57 = vshrl.u32 %v2253_v23, %v2269_v61  ;;  %v2274_v31 = vadd.s32 127, %v2273_v53 }
 0x254   : > { %2445 = vmatmul.f32.gmra.mxu3 %v2330_v36 }
 0x255   : > { %v2272_v26 = vor.u32 %v2271_v57, %v2270_v10  ;;  %v2275_v50 = vshll.u32 %v2274_v31, 23 }
 0x257   : > { %v2276_v43 = vor.u32 4788187, %v2275_v50  ;;  %v2279_v24 = vcvt.s32.f32 %v2272_v26  ;;  %2474 = vmatmul.f32.gmra.mxu0 %v2344_v62  ;;  %v5770_v50 = vld [vmem:[#allocation6 + $0x2] ss:$0 sm:$0xff] }
 0x258   : > { %2506 = vmatmul.f32.gmra.mxu1 %v2358_v22 }
 0x259   : > { %v2277_v7 = vand.u32 2147483647, %v2276_v43 }
 0x25b   : > { %v2280_v40 = vmul.f32 %v2279_v24, %v2277_v7 }
 0x25d   : > { %v2281_v55 = vxor.u32 2147483648, %v2280_v40 }
 0x25f   : > { %v2282_v8 = vsel %vm2161_vm13, %v2281_v55, %v2280_v40 }
 0x260   : > { %v2285_v11 = vsel %vm2160_vm11, %v5485_v34, %v2282_v8 }
 0x261   : > { %v2287_v45 = vmul.f32 %v2285_v11, %v2285_v11 }
 0x263   : > { %v2288_v51 = vmul.f32 -0.001358992, %v2287_v45  ;;  %v2295_v12 = vmul.f32 -0.00019511016, %v2287_v45 }
 0x265   : > { %v2289_v28 = vadd.f32 0.041655596, %v2288_v51  ;;  %v2296_v20 = vadd.f32 0.008332121, %v2295_v12 }
 0x267   : > { %v2290_v29 = vmul.f32 %v2289_v28, %v2287_v45  ;;  %v2297_v59 = vmul.f32 %v2296_v20, %v2287_v45 }
 0x269   : > { %v2291_v38 = vadd.f32 -0.4999988, %v2290_v29  ;;  %v2298_v25 = vadd.f32 -0.16666654, %v2297_v59 }
 0x26b   : > { %v2292_v48 = vmul.f32 %v2291_v38, %v2287_v45  ;;  %v2299_v37 = vmul.f32 %v2298_v25, %v2287_v45 }
 0x26d   : > { %v2293_v9 = vadd.f32 1.0, %v2292_v48  ;;  %v2300_v27 = vadd.f32 1.0, %v2299_v37 }
 0x26f   : > { %v2301_v16 = vmul.f32 %v2300_v27, %v2285_v11  ;;  %v2310_v49 = vxor.u32 2147483648, %v2293_v9 }
 0x271   : > { %v2307_v6 = vxor.u32 2147483648, %v2301_v16  ;;  %v2311_v30 = vsel %vm2309_vm1, %v2310_v49, %v2301_v16 }
 0x273   : > { %v2308_v63 = vsel %vm2306_vm15, %v2293_v9, %v2307_v6 }
 0x274   : > { %v2312_v0 = vsel %vm2305_vm2, %v2308_v63, %v2311_v30 }
 0x275   : > { %v2313_v52 = vsel %vm2302_vm6, nan, %v2312_v0 }
 0x276   : > { %v2318_v56 = vmul.f32 %v2313_v52, %v2313_v52 }
 0x278   : > { %v2326_v42 = vmul.f32 %v5524_v32, %v2318_v56  ;;  %v5763_v32 = vld [vmem:[%s6523_s4 + $0x1] ss:$0 sm:$0xff] }
 0x27a   : > { %v2331_v4 = vadd.f32 %v2326_v42, %v5477_v3  ;;  %v5765_v3 = vstv %s3683_s27 }
 0x27b   : > { %v2518_v36 = vadd.s32 %v5765_v3, %v5048_v2  ;;  %v2520_v28 = vadd.s32 %v5765_v3, %v5206_v39 }
 0x27c   : > { %2448 = vmatmul.f32.gmra.mxu3 %v2331_v4  ;;  %v2345_v18 = vrot.slane %v2331_v4, 3  ;;  %v2359_v23 = vrot.slane %v2331_v4, 6 }
 0x27d   : > { %vm2525_vm0 = vcmp.lt.s32.totalorder %v2520_v28, 0 }
 0x27e   : > { %v2346_v61 = vsel %vm2337_vm7, %v2343_v60, %v2345_v18  ;;  %v2360_v53 = vsel %vm331_vm5, %v2357_v58, %v2359_v23  ;;  %vm2523_vm5 = vcmp.lt.s32.totalorder %v2518_v36, 0 }
 0x27f   : > { %2477 = vmatmul.f32.gmra.mxu0 %v2346_v61  ;;  %2509 = vmatmul.f32.gmra.mxu1 %v2360_v53 }
 0x287   : > { %2480 = vmatmul.f32.gmra.mxu0 %v2345_v18  ;;  %2512 = vmatmul.f32.gmra.mxu1 %v2359_v23 }
 0x2bf   : > { %v2437_v34 = vpop.f32.mrf.mxu3 }
 0x2c0   : > { %v2438_v10 = vadd.f32 %v5763_v32, %v2437_v34 }
 0x2c4   : > { %v2469_v57 = vpop.f32.mrf.mxu0 }
 0x2c5   : > { %v2501_v31 = vpop.f32.mrf.mxu1  ;;  %v2470_v26 = vadd.f32 %v2469_v57, %v2438_v10 }
 0x2c7   : > { %v5772_v60 = vpop.f32.mrf.mxu3  ;;  %v2502_v58 = vadd.f32 %v2501_v31, %v2470_v26 }
 0x2c9   : > { %v5774_v43 = vsel %vm2523_vm5, 0.0, %v2502_v58 }
 0x2ca   : > { %v5778_v62 = vmul.f32 %v5770_v50, %v5774_v43 }
 0x2cc   : > { %v2558_v22 = vand.u32 2139095040, %v5778_v62  ;;  %v5781_v2 = vpop.f32.mrf.mxu0  ;;  %v2555_v40 = vand.u32 2147483647, %v5778_v62 }
 0x2cd   : > { %v5783_v24 = vpop.f32.mrf.mxu1 }
 0x2ce   : > { %v2559_v7 = vshrl.u32 %v2558_v22, 23  ;;  %v2562_v45 = vand.u32 8388607, %v2555_v40 }
 0x2cf   : > { %v2443_v8 = vpop.f32.mrf.mxu3 }
 0x2d0   : > { %v3684_v55 = vadd.s32 4294967169, %v2559_v7  ;;  %v2444_v11 = vadd.f32 %v5763_v32, %v2443_v8  ;;  %v2563_v35 = vor.u32 8388608, %v2562_v45 }
 0x2d2   : > { %v2565_v19 = vadd.s32 1, %v3684_v55  ;;  %v5803_v52 = vshll.u32 %v2563_v35, 8 }
 0x2d4   : > { %vm2566_vm8 = vcmp.gt.s32.totalorder %v2565_v19, 0  ;;  %v2475_v51 = vpop.f32.mrf.mxu0  ;;  %v2604_v26 = vand.u32 65535, %v5803_v52  ;;  %v2605_v58 = vshrl.u32 %v5803_v52, 16 }
 0x2d5   : > { %v2567_v12 = vsel %vm2566_vm8, %v2565_v19, 0  ;;  %v2476_v46 = vadd.f32 %v2475_v51, %v2444_v11  ;;  %v2507_v38 = vpop.f32.mrf.mxu1 }
 0x2d6   : > { %v2569_v20 = vand.u32 31, %v2567_v12  ;;  %v5791_v29 = vshrl.u32 %v2567_v12, 5 }
 0x2d7   : > { %v2508_v48 = vadd.f32 %v2507_v38, %v2476_v46 }
 0x2d8   : > { %v2570_v59 = vsub.s32 32, %v2569_v20  ;;  %v2572_v25 = vshll.u32 %v4098_v13, %v2569_v20  ;;  %v2575_v1 = vshll.u32 %v4099_v15, %v2569_v20  ;;  %v2578_v27 = vshll.u32 %v4100_v17, %v2569_v20 }
 0x2d9   : > { %v2581_v33 = vshll.u32 %v6576_v5, %v2569_v20  ;;  %v2584_v49 = vshll.u32 %v4102_v21, %v2569_v20  ;;  %vm2587_vm12 = vcmp.lt.s32.totalorder %v5791_v29, 1  ;;  %v5807_v4 = vsel %vm2525_vm0, 0.0, %v2508_v48 }
 0x2da   : > { %v2573_v37 = vshrl.u32 %v4099_v15, %v2570_v59  ;;  %v2576_v9 = vshrl.u32 %v4100_v17, %v2570_v59  ;;  %v2579_v39 = vshrl.u32 %v6576_v5, %v2570_v59  ;;  %v2582_v16 = vshrl.u32 %v4102_v21, %v2570_v59 }
 0x2db   : > { %v2585_v6 = vshrl.u32 %v6577_v41, %v2570_v59  ;;  %vm2590_vm7 = vcmp.lt.s32.totalorder %v5791_v29, 4  ;;  %vm2589_vm14 = vcmp.lt.s32.totalorder %v5791_v29, 3  ;;  %vm2588_vm9 = vcmp.lt.s32.totalorder %v5791_v29, 2 }
 0x2dc   : > { %v2574_v63 = vor.u32 %v2573_v37, %v2572_v25  ;;  %v2577_v30 = vor.u32 %v2576_v9, %v2575_v1  ;;  %v2580_v0 = vor.u32 %v2579_v39, %v2578_v27  ;;  %v2583_v56 = vor.u32 %v2582_v16, %v2581_v33 }
 0x2dd   : > { %v2586_v42 = vor.u32 %v2585_v6, %v2584_v49  ;;  %v5826_v10 = vmul.f32 %v5770_v50, %v5807_v4  ;;  %v2571_v46 = vshrl.u32 %v4098_v13, %v2570_v59 }
 0x2de   : > { %v2595_v18 = vsel %vm2587_vm12, %v2574_v63, %v2577_v30  ;;  %v2599_v23 = vsel %vm2587_vm12, %v2577_v30, %v2580_v0  ;;  %v2596_v61 = vsel %vm2590_vm7, %v2583_v56, 920167782  ;;  %v2592_v6 = vsel %vm2590_vm7, %v2580_v0, 2102212464 }
 0x2df   : > { %v2600_v53 = vsel %vm2590_vm7, %v2586_v42, 1326507024  ;;  %v2597_v34 = vsel %vm2589_vm14, %v2580_v0, %v2596_v61  ;;  %v2868_v45 = vand.u32 2139095040, %v5826_v10  ;;  %v2865_v29 = vand.u32 2147483647, %v5826_v10 }
 0x2e0   : > { %v2601_v36 = vsel %vm2589_vm14, %v2583_v56, %v2600_v53  ;;  %v2598_v57 = vsel %vm2588_vm9, %v2595_v18, %v2597_v34  ;;  %v2591_v34 = vsel %vm2587_vm12, %v2571_v46, %v2574_v63 }
 0x2e1   : > { %v2602_v31 = vsel %vm2588_vm9, %v2599_v23, %v2601_v36  ;;  %v2628_v55 = vand.u32 65535, %v2598_v57  ;;  %v2629_v8 = vshrl.u32 %v2598_v57, 16  ;;  %v2869_v9 = vshrl.u32 %v2868_v45, 23 }
 0x2e2   : > { %v2606_v22 = vand.u32 65535, %v2602_v31  ;;  %v2607_v7 = vshrl.u32 %v2602_v31, 16  ;;  %v2593_v31 = vsel %vm2589_vm14, %v2577_v30, %v2592_v6 }
 0x2e3   : > { %v2631_v51 = vmul.u32 %v2629_v8, %v2604_v26  ;;  %v2632_v12 = vmul.u32 %v2628_v55, %v2605_v58  ;;  %v2630_v38 = vmul.u32 %v2628_v55, %v2604_v26  ;;  %v2633_v25 = vmul.u32 %v2629_v8, %v2605_v58 }
 0x2e4   : > { %v2609_v19 = vmul.u32 %v2607_v7, %v2604_v26  ;;  %v2610_v11 = vmul.u32 %v2606_v22, %v2605_v58  ;;  %v2608_v28 = vmul.u32 %v2606_v22, %v2604_v26  ;;  %v2611_v35 = vmul.u32 %v2607_v7, %v2605_v58 }
 0x2e5   : > { %v2634_v1 = vshll.u32 %v2631_v51, 16  ;;  %v2636_v39 = vshll.u32 %v2632_v12, 16  ;;  %v3690_v59 = vadd.s32 4294967169, %v2869_v9  ;;  %v2635_v36 = vshrl.u32 %v2631_v51, 16 }
 0x2e6   : > { %v2612_v20 = vshll.u32 %v2609_v19, 16  ;;  %v2614_v48 = vshll.u32 %v2610_v11, 16  ;;  %v2613_v18 = vshrl.u32 %v2609_v19, 16  ;;  %v2615_v26 = vshrl.u32 %v2610_v11, 16 }
 0x2e7   : > { %vm2638_vm13 = vc.u32 %v2630_v38, %v2634_v1  ;;  %v2640_v33 = vadd.s32 %v2634_v1, %v2630_v38  ;;  %v2875_v53 = vadd.s32 1, %v3690_v59  ;;  %v2637_v0 = vshrl.u32 %v2632_v12, 16 }
 0x2e8   : > { %vm2616_vm10 = vc.u32 %v2608_v28, %v2612_v20  ;;  %v2618_v37 = vadd.s32 %v2612_v20, %v2608_v28  ;;  %v2639_v49 = vsel %vm2638_vm13, 1, %v4104_v47  ;;  %v2594_v45 = vsel %vm2588_vm9, %v2591_v34, %v2593_v31 }
 0x2e9   : > { %v2617_v27 = vsel %vm2616_vm10, 1, %v4104_v47  ;;  %v2641_v42 = vadd.s32 %v2639_v49, %v2633_v25  ;;  %vm2642_vm15 = vc.u32 %v2640_v33, %v2636_v39  ;;  %vm2876_vm1 = vcmp.gt.s32.totalorder %v2875_v53, 0 }
 0x2ea   : > { %v2619_v16 = vadd.s32 %v2617_v27, %v2611_v35  ;;  %vm2620_vm11 = vc.u32 %v2618_v37, %v2614_v48  ;;  %v2643_v61 = vsel %vm2642_vm15, 1, %v4104_v47  ;;  %v2877_v7 = vsel %vm2876_vm1, %v2875_v53, 0 }
 0x2eb   : > { %v2621_v56 = vsel %vm2620_vm11, 1, %v4104_v47  ;;  %v2645_v57 = vadd.s32 %v2643_v61, %v2641_v42  ;;  %v5848_v8 = vadd.s32 %v2640_v33, %v2636_v39  ;;  %v2879_v19 = vand.u32 31, %v2877_v7 }
 0x2ec   : > { %v2623_v23 = vadd.s32 %v2621_v56, %v2619_v16  ;;  %v2648_v11 = vmul.u32 %v5803_v52, %v2594_v45  ;;  %v5864_v1 = vshrl.u32 %v2877_v7, 5  ;;  %v2872_v33 = vand.u32 8388607, %v2865_v29  ;;  %v2446_v56 = vpop.f32.mrf.mxu3 }
 0x2ed   : > { %v2646_v22 = vadd.s32 %v2645_v57, %v2635_v36  ;;  %v5854_v51 = vsub.s32 32, %v2879_v19  ;;  %v2891_v38 = vshll.u32 %v6576_v5, %v2879_v19  ;;  %v2894_v25 = vshll.u32 %v4102_v21, %v2879_v19 }
 0x2ee   : > { %v2624_v58 = vadd.s32 %v2623_v23, %v2613_v18  ;;  %v2882_v16 = vshll.u32 %v4098_v13, %v2879_v19  ;;  %v2885_v49 = vshll.u32 %v4099_v15, %v2879_v19  ;;  %v2888_v59 = vshll.u32 %v4100_v17, %v2879_v19 }
 0x2ef   : > { %v2647_v63 = vadd.s32 %v2646_v22, %v2637_v0  ;;  %v2892_v28 = vshrl.u32 %v4102_v21, %v5854_v51  ;;  %v2895_v20 = vshrl.u32 %v6577_v41, %v5854_v51  ;;  %v2883_v52 = vshrl.u32 %v4099_v15, %v5854_v51 }
 0x2f0   : > { %v5846_v55 = vadd.s32 %v2624_v58, %v2615_v26  ;;  %v2886_v48 = vshrl.u32 %v4100_v17, %v5854_v51  ;;  %v2889_v37 = vshrl.u32 %v6576_v5, %v5854_v51  ;;  %vm2900_vm6 = vcmp.lt.s32.totalorder %v5864_v1, 4 }
 0x2f1   : > { %v2651_v30 = vadd.s32 1, %v2647_v63  ;;  %v2893_v27 = vor.u32 %v2892_v28, %v2891_v38  ;;  %v2896_v39 = vor.u32 %v2895_v20, %v2894_v25  ;;  %v5880_v42 = vor.u32 %v2883_v52, %v2882_v16 }
 0x2f2   : > { %vm2650_vm2 = vc.u32 %v5846_v55, %v5848_v8  ;;  %v5882_v18 = vor.u32 %v2886_v48, %v2885_v49  ;;  %v5884_v23 = vor.u32 %v2889_v37, %v2888_v59  ;;  %v2873_v36 = vor.u32 8388608, %v2872_v33 }
 0x2f3   : > { %v2652_v12 = vsel %vm2650_vm2, %v2651_v30, %v2647_v63  ;;  %v2906_v53 = vsel %vm2900_vm6, %v2893_v27, 920167782  ;;  %v2910_v34 = vsel %vm2900_vm6, %v2896_v39, 1326507024  ;;  %v2447_v57 = vadd.f32 %v5763_v32, %v2446_v56 }
 0x2f4   : > { %v2653_v46 = vadd.s32 %v2652_v12, %v2648_v11  ;;  %v2521_v26 = vadd.s32 %v5765_v3, %v5216_v44  ;;  %vm2897_vm8 = vcmp.lt.s32.totalorder %v5864_v1, 1  ;;  %vm2899_vm0 = vcmp.lt.s32.totalorder %v5864_v1, 3 }
 0x2f5   : > { %v2905_v0 = vsel %vm2897_vm8, %v5880_v42, %v5882_v18  ;;  %v2907_v22 = vsel %vm2899_vm0, %v5884_v23, %v2906_v53  ;;  %v2909_v44 = vsel %vm2897_vm8, %v5882_v18, %v5884_v23  ;;  %v2911_v7 = vsel %vm2899_vm0, %v2893_v27, %v2910_v34 }
 0x2f6   : > { %v2654_v35 = vadd.s32 536870912, %v2653_v46  ;;  %vm2898_vm12 = vcmp.lt.s32.totalorder %v5864_v1, 2  ;;  %vm2526_vm7 = vcmp.lt.s32.totalorder %v2521_v26, 0  ;;  %v2649_v39 = vadd.s32 %v5848_v8, %v5846_v55 }
 0x2f7   : > { %v2908_v30 = vsel %vm2898_vm12, %v2905_v0, %v2907_v22  ;;  %v2912_v11 = vsel %vm2898_vm12, %v2909_v44, %v2911_v7  ;;  %vm5954_vm1 = vcmp.le.f32.partialorder %v2555_v40, 0.7853982  ;;  %vm2557_vm2 = vcmp.lt.s32.totalorder %v5778_v62, 0 }
 0x2f8   : > { %v5872_v9 = vshrl.u32 %v2654_v35, 30  ;;  %v2917_v35 = vshrl.u32 %v2912_v11, 16  ;;  %v2939_v38 = vshrl.u32 %v2908_v30, 16  ;;  %v2916_v34 = vand.u32 65535, %v2912_v11 }
 0x2fa   : > { %v2656_v6 = vshll.u32 %v5872_v9, 30 }
 0x2fc   : > { %v2657_v61 = vsub.s32 %v2653_v46, %v2656_v6  ;;  %v2478_v31 = vpop.f32.mrf.mxu0  ;;  %v5914_v46 = vshll.u32 %v2873_v36, 8  ;;  %v2510_v28 = vpop.f32.mrf.mxu1  ;;  %v2938_v36 = vand.u32 65535, %v2908_v30 }
 0x2fd   : > { %v2479_v45 = vadd.f32 %v2478_v31, %v2447_v57 }
 0x2fe   : > { %vm2658_vm5 = vcmp.lt.s32.totalorder %v2657_v61, 0  ;;  %v2659_v58 = vsub.s32 0, %v2657_v61  ;;  %v2914_v27 = vand.u32 65535, %v5914_v46  ;;  %v2915_v55 = vshrl.u32 %v5914_v46, 16 }
 0x2ff   : > { %v2511_v20 = vadd.f32 %v2510_v28, %v2479_v45 }
 0x300   : > { %v2660_v19 = vsel %vm2658_vm5, %v2659_v58, %v2657_v61  ;;  %v5925_v49 = vmul.u32 %v2917_v35, %v2914_v27  ;;  %v5927_v59 = vmul.u32 %v2939_v38, %v2914_v27  ;;  %v2918_v44 = vmul.u32 %v2916_v34, %v2914_v27 }
 0x301   : > { %v2661_v63 = vclz %v2660_v19  ;;  %v5916_v52 = vsel %vm2526_vm7, 0.0, %v2511_v20  ;;  %v5933_v7 = vmul.u32 %v2916_v34, %v2915_v55  ;;  %v2940_v19 = vmul.u32 %v2938_v36, %v2914_v27 }
 0x302   : > { %v5923_v33 = vmul.f32 %v5770_v50, %v5916_v52  ;;  %v2922_v8 = vshll.u32 %v5925_v49, 16  ;;  %v2944_v58 = vshll.u32 %v5927_v59, 16  ;;  %v5935_v45 = vmul.u32 %v2938_v36, %v2915_v55 }
 0x303   : > { %v3685_v12 = vadd.s32 4294967294, %v2661_v63  ;;  %v2924_v28 = vshll.u32 %v5933_v7, 16 }
 0x304   : > { %v3023_v56 = vand.u32 2139095040, %v5923_v33  ;;  %vm2926_vm9 = vc.u32 %v2918_v44, %v2922_v8  ;;  %vm2948_vm10 = vc.u32 %v2940_v19, %v2944_v58  ;;  %v5937_v30 = vadd.s32 %v2944_v58, %v2940_v19  ;;  %v2449_v58 = vpop.f32.mrf.mxu3 }
 0x305   : > { %vm3686_vm14 = vcmp.lt.s32.totalorder %v3685_v12, 0  ;;  %v2946_v20 = vshll.u32 %v5935_v45, 16  ;;  %v2949_v27 = vsel %vm2948_vm10, 1, %v4104_v47 }
 0x306   : > { %v2664_v25 = vsel %vm3686_vm14, 0, %v3685_v12  ;;  %v3024_v31 = vshrl.u32 %v3023_v56, 23 }
 0x307   : > { %v2665_v48 = vsub.s32 32, %v2664_v25  ;;  %v2669_v37 = vsub.s32 4294967266, %v2664_v25  ;;  %v2666_v57 = vshll.u32 %v2657_v61, %v2664_v25  ;;  %v2928_v61 = vadd.s32 %v2922_v8, %v2918_v44 }
 0x308   : > { %v3693_v22 = vadd.s32 4294967169, %v3024_v31  ;;  %vm2952_vm15 = vc.u32 %v5937_v30, %v2946_v20 }
 0x309   : > { %v2670_v16 = vadd.s32 127, %v2669_v37  ;;  %v2667_v6 = vshrl.u32 %v2649_v39, %v2665_v48  ;;  %v2927_v37 = vsel %vm2926_vm9, 1, %v4104_v47  ;;  %vm2930_vm11 = vc.u32 %v2928_v61, %v2924_v28 }
 0x30a   : > { %v3030_v11 = vadd.s32 1, %v3693_v22  ;;  %v2931_v31 = vsel %vm2930_vm11, 1, %v4104_v47  ;;  %v2945_v22 = vshrl.u32 %v5927_v59, 16  ;;  %v2450_v28 = vadd.f32 %v5763_v32, %v2449_v58 }
 0x30b   : > { %v2671_v53 = vshll.u32 %v2670_v16, 23  ;;  %v2668_v0 = vor.u32 %v2667_v6, %v2666_v57  ;;  %v2921_v16 = vmul.u32 %v2917_v35, %v2915_v55  ;;  %v2943_v6 = vmul.u32 %v2939_v38, %v2915_v55 }
 0x30c   : > { %vm3031_vm13 = vcmp.gt.s32.totalorder %v3030_v11, 0  ;;  %v2881_v57 = vshrl.u32 %v4098_v13, %v5854_v51  ;;  %v3020_v38 = vand.u32 2147483647, %v5923_v33  ;;  %v2902_v51 = vsel %vm2900_vm6, %v5884_v23, 2102212464 }
 0x30d   : > { %v2672_v26 = vor.u32 4788187, %v2671_v53  ;;  %v2675_v12 = vcvt.s32.f32 %v2668_v0  ;;  %v3032_v25 = vsel %vm3031_vm13, %v3030_v11, 0  ;;  %v2929_v53 = vadd.s32 %v2927_v37, %v2921_v16  ;;  %v2481_v37 = vpop.f32.mrf.mxu0 }
 0x30e   : > { %v3034_v39 = vand.u32 31, %v3032_v25  ;;  %v2951_v34 = vadd.s32 %v2949_v27, %v2943_v6  ;;  %v2901_v55 = vsel %vm2897_vm8, %v2881_v57, %v5880_v42  ;;  %v3027_v61 = vand.u32 8388607, %v3020_v38 }
 0x30f   : > { %v2673_v63 = vand.u32 2147483647, %v2672_v26  ;;  %v2953_v26 = vsel %vm2952_vm15, 1, %v4104_v47  ;;  %v2933_v0 = vadd.s32 %v2931_v31, %v2929_v53 }
 0x310   : > { %v5946_v56 = vsub.s32 32, %v3034_v39  ;;  %v2955_v44 = vadd.s32 %v2953_v26, %v2951_v34  ;;  %v3040_v23 = vshll.u32 %v4099_v15, %v3034_v39  ;;  %v3046_v59 = vshll.u32 %v6576_v5, %v3034_v39 }
 0x311   : > { %v2676_v48 = vmul.f32 %v2675_v12, %v2673_v63  ;;  %v3037_v63 = vshll.u32 %v4098_v13, %v3034_v39  ;;  %v5981_v12 = vshrl.u32 %v3032_v25, 5  ;;  %v3043_v16 = vshll.u32 %v4100_v17, %v3034_v39 }
 0x312   : > { %v3038_v8 = vshrl.u32 %v4099_v15, %v5946_v56  ;;  %v3041_v40 = vshrl.u32 %v4100_v17, %v5946_v56  ;;  %v3047_v19 = vshrl.u32 %v4102_v21, %v5946_v56  ;;  %v3044_v11 = vshrl.u32 %v6576_v5, %v5946_v56 }
 0x313   : > { %v2677_v36 = vxor.u32 2147483648, %v2676_v48  ;;  %v3050_v6 = vshrl.u32 %v6577_v41, %v5946_v56  ;;  %v2923_v25 = vshrl.u32 %v5925_v49, 16  ;;  %v2947_v34 = vshrl.u32 %v5935_v45, 16 }
 0x314   : > { %v5985_v27 = vor.u32 %v3038_v8, %v3037_v63  ;;  %v2956_v57 = vadd.s32 %v2955_v44, %v2945_v22  ;;  %v5999_v31 = vor.u32 %v3044_v11, %v3043_v16  ;;  %v3049_v26 = vshll.u32 %v4102_v21, %v3034_v39  ;;  %v2513_v44 = vpop.f32.mrf.mxu1 }
 0x315   : > { %v2678_v42 = vsel %vm2557_vm2, %v2677_v36, %v2676_v48  ;;  %v5987_v48 = vor.u32 %v3041_v40, %v3040_v23  ;;  %v3048_v36 = vor.u32 %v3047_v19, %v3046_v59  ;;  %v2482_v8 = vadd.f32 %v2481_v37, %v2450_v28 }
 0x316   : > { %v5995_v53 = vsel %vm5954_vm1, %v5778_v62, %v2678_v42  ;;  %v2934_v40 = vadd.s32 %v2933_v0, %v2923_v25  ;;  %v3028_v58 = vor.u32 8388608, %v3027_v61  ;;  %vm3052_vm6 = vcmp.lt.s32.totalorder %v5981_v12, 1 }
 0x317   : > { %v2522_v63 = vadd.s32 %v5765_v3, %v5461_v14  ;;  %v6007_v42 = vmul.f32 %v5995_v53, %v5995_v53  ;;  %v3051_v49 = vor.u32 %v3050_v6, %v3049_v26  ;;  %vm3055_vm5 = vcmp.lt.s32.totalorder %v5981_v12, 4 }
 0x318   : > { %v3060_v39 = vsel %vm3052_vm6, %v5985_v27, %v5987_v48  ;;  %v2903_v0 = vsel %vm2899_vm0, %v5882_v18, %v2902_v51  ;;  %v2925_v22 = vshrl.u32 %v5933_v7, 16  ;;  %vm3054_vm8 = vcmp.lt.s32.totalorder %v5981_v12, 3 }
 0x319   : > { %v3061_v14 = vsel %vm3055_vm5, %v3048_v36, 920167782  ;;  %v2957_v19 = vadd.s32 %v2956_v57, %v2947_v34  ;;  %vm3053_vm7 = vcmp.lt.s32.totalorder %v5981_v12, 2  ;;  %v2514_v11 = vadd.f32 %v2513_v44, %v2482_v8 }
 0x31a   : > { %v3062_v23 = vsel %vm3054_vm8, %v5999_v31, %v3061_v14  ;;  %v3064_v18 = vsel %vm3052_vm6, %v5987_v48, %v5999_v31  ;;  %v6031_v7 = vshll.u32 %v3028_v58, 8  ;;  %vm2527_vm0 = vcmp.lt.s32.totalorder %v2522_v63, 0 }
 0x31b   : > { %v3063_v61 = vsel %vm3053_vm7, %v3060_v39, %v3062_v23  ;;  %v2679_v51 = vsub.s32 4, %v5872_v9  ;;  %v2691_v59 = vmul.f32 -0.00019511016, %v6007_v42  ;;  %v6035_v28 = vadd.s32 %v2934_v40, %v2925_v22 }
 0x31c   : > { %v3065_v37 = vsel %vm3055_vm5, %v3051_v49, 1326507024  ;;  %v2904_v16 = vsel %vm2898_vm12, %v2901_v55, %v2903_v0  ;;  %v6044_v6 = vadd.s32 %v5937_v30, %v2946_v20  ;;  %v2961_v34 = vadd.s32 1, %v2957_v19 }
 0x31d   : > { %v3066_v25 = vsel %vm3054_vm8, %v3048_v36, %v3065_v37  ;;  %v3094_v26 = vshrl.u32 %v3063_v61, 16  ;;  %v6050_v8 = vsel %vm2527_vm0, 0.0, %v2514_v11  ;;  %v3069_v40 = vand.u32 65535, %v6031_v7 }
 0x31e   : > { %v3067_v57 = vsel %vm3053_vm7, %v3064_v18, %v3066_v25  ;;  %v3070_v1 = vshrl.u32 %v6031_v7, 16  ;;  %v2680_v45 = vsel %vm2557_vm2, %v2679_v51, %v5872_v9  ;;  %v2692_v30 = vadd.f32 0.008332121, %v2691_v59 }
 0x31f   : > { %v3071_v55 = vand.u32 65535, %v3067_v57  ;;  %v3072_v58 = vshrl.u32 %v3067_v57, 16  ;;  %vm2960_vm12 = vc.u32 %v6035_v28, %v6044_v6  ;;  %v3093_v20 = vand.u32 65535, %v3063_v61 }
 0x320   : > { %v3096_v49 = vmul.u32 %v3094_v26, %v3069_v40  ;;  %v2684_v39 = vmul.f32 -0.001358992, %v6007_v42  ;;  %v2441_v0 = vadd.f32 %v5763_v32, %v5772_v60  ;;  %v2958_v22 = vmul.u32 %v5914_v46, %v2904_v16 }
 0x321   : > { %v3074_v36 = vmul.u32 %v3072_v58, %v3069_v40  ;;  %v3075_v63 = vmul.u32 %v3071_v55, %v3070_v1  ;;  %v6065_v14 = vmul.f32 %v5770_v50, %v6050_v8  ;;  %v2682_v9 = vsel %vm5954_vm1, 0, %v2680_v45 }
 0x322   : > { %v2962_v44 = vsel %vm2960_vm12, %v2961_v34, %v2957_v19  ;;  %v3073_v23 = vmul.u32 %v3071_v55, %v3069_v40  ;;  %v2693_v61 = vmul.f32 %v2692_v30, %v6007_v42  ;;  %v3076_v18 = vmul.u32 %v3072_v58, %v3070_v1 }
 0x323   : > { %v3077_v11 = vshll.u32 %v3074_v36, 16  ;;  %v3095_v51 = vmul.u32 %v3093_v20, %v3069_v40  ;;  %v3097_v59 = vmul.u32 %v3093_v20, %v3070_v1  ;;  %v3079_v37 = vshll.u32 %v3075_v63, 16 }
 0x324   : > { %v3099_v60 = vshll.u32 %v3096_v49, 16  ;;  %v2685_v46 = vadd.f32 0.041655596, %v2684_v39  ;;  %v6070_v16 = vadd.s32 %v2962_v44, %v2958_v22  ;;  %v3178_v35 = vand.u32 2139095040, %v6065_v14 }
 0x325   : > { %vm3081_vm14 = vc.u32 %v3073_v23, %v3077_v11  ;;  %v3083_v32 = vadd.s32 %v3077_v11, %v3073_v23  ;;  %v3098_v19 = vmul.u32 %v3094_v26, %v3070_v1  ;;  %v3101_v55 = vshll.u32 %v3097_v59, 16 }
 0x326   : > { %v3082_v25 = vsel %vm3081_vm14, 1, %v4104_v47  ;;  %vm3103_vm10 = vc.u32 %v3095_v51, %v3099_v60  ;;  %v3105_v58 = vadd.s32 %v3099_v60, %v3095_v51  ;;  %v2694_v45 = vadd.f32 -0.16666654, %v2693_v61 }
 0x327   : > { %v3084_v57 = vadd.s32 %v3082_v25, %v3076_v18  ;;  %vm3085_vm9 = vc.u32 %v3083_v32, %v3079_v37  ;;  %v3104_v40 = vsel %vm3103_vm10, 1, %v4104_v47  ;;  %v3078_v30 = vshrl.u32 %v3074_v36, 16 }
 0x328   : > { %v3086_v34 = vsel %vm3085_vm9, 1, %v4104_v47  ;;  %v3106_v39 = vadd.s32 %v3104_v40, %v3098_v19  ;;  %v2686_v22 = vmul.f32 %v2685_v46, %v6007_v42  ;;  %v3057_v44 = vsel %vm3055_vm5, %v5999_v31, 2102212464 }
 0x329   : > { %v3088_v20 = vadd.s32 %v3086_v34, %v3084_v57  ;;  %vm3107_vm13 = vc.u32 %v3105_v58, %v3101_v55  ;;  %v3179_v23 = vshrl.u32 %v3178_v35, 23  ;;  %v3036_v26 = vshrl.u32 %v4098_v13, %v5946_v56 }
 0x32a   : > { %v3080_v1 = vshrl.u32 %v3075_v63, 16  ;;  %v3108_v18 = vsel %vm3107_vm13, 1, %v4104_v47  ;;  %v2964_v61 = vadd.s32 536870912, %v6070_v16  ;;  %v3100_v36 = vshrl.u32 %v3096_v49, 16 }
 0x32b   : > { %v3089_v11 = vadd.s32 %v3088_v20, %v3078_v30  ;;  %v3110_v51 = vadd.s32 %v3108_v18, %v3106_v39  ;;  %v3696_v37 = vadd.s32 4294967169, %v3179_v23  ;;  %v2695_v32 = vmul.f32 %v2694_v45, %v6007_v42 }
 0x32c   : > { %v3056_v31 = vsel %vm3052_vm6, %v3036_v26, %v5985_v27  ;;  %v3058_v60 = vsel %vm3054_vm8, %v5987_v48, %v3057_v44  ;;  %v2687_v63 = vadd.f32 -0.4999988, %v2686_v22  ;;  %v3102_v46 = vshrl.u32 %v3097_v59, 16  ;;  %v3382_v44 = vld [vmem:[#allocation9 + $0x378] sm:$0xff] }
 0x32d   : > { %v6091_v56 = vadd.s32 %v3089_v11, %v3080_v1  ;;  %v3111_v25 = vadd.s32 %v3110_v51, %v3100_v36  ;;  %v3185_v35 = vadd.s32 1, %v3696_v37  ;;  %v2699_v57 = vadd.s32 3, %v2682_v9  ;;  %3420 = vmatpush.msrb.mxu2 %v3382_v44  ;;  %v3381_v37 = vld [vmem:[#allocation9 + $0x370] sm:$0xff] }
 0x32e   : > { %v2473_v49 = vadd.f32 %v5781_v2, %v2441_v0  ;;  %v6094_v19 = vadd.s32 %v3105_v58, %v3101_v55  ;;  %v3059_v34 = vsel %vm3053_vm7, %v3056_v31, %v3058_v60  ;;  %v2519_v27 = vadd.s32 %v5765_v3, %v5137_v54  ;;  %v3377_v44 = vld [vmem:[#allocation9 + $0x350] sm:$0xff] }
 0x32f   : > { %v3112_v40 = vadd.s32 %v3111_v25, %v3102_v46  ;;  %vm3186_vm11 = vcmp.gt.s32.totalorder %v3185_v35, 0  ;;  %v2696_v48 = vadd.f32 1.0, %v2695_v32  ;;  %v6100_v45 = vshrl.u32 %v2964_v61, 30  ;;  %3421 = vmatpush.msrb.mxu2 %v3381_v37  ;;  %v3396_v37 = vld [vmem:[#allocation9 + $0x3e8] sm:$0xff] }
 0x330   : > { %vm3115_vm15 = vc.u32 %v6091_v56, %v6094_v19  ;;  %v3187_v59 = vsel %vm3186_vm11, %v3185_v35, 0  ;;  %v2688_v9 = vmul.f32 %v2687_v63, %v6007_v42  ;;  %v2700_v0 = vand.u32 3, %v2699_v57  ;;  %v3380_v57 = vld [vmem:[#allocation9 + $0x368] sm:$0xff] }
 0x331   : > { %v3116_v2 = vadd.s32 1, %v3112_v40  ;;  %v3113_v55 = vmul.u32 %v6031_v7, %v3059_v34  ;;  %v3189_v12 = vand.u32 31, %v3187_v59  ;;  %v2505_v58 = vadd.f32 %v5783_v24, %v2473_v49  ;;  %3422 = vmatpush.msrb.mxu2 %v3380_v57  ;;  %v3375_v57 = vld [vmem:[#allocation9 + $0x340] sm:$0xff] }
 0x332   : > { %vm2524_vm1 = vcmp.lt.s32.totalorder %v2519_v27, 0  ;;  %v2697_v54 = vmul.f32 %v2696_v48, %v5995_v53  ;;  %v2966_v3 = vshll.u32 %v6100_v45, 30  ;;  %v2689_v22 = vadd.f32 1.0, %v2688_v9 }
 0x333   : > { %v3117_v30 = vsel %vm3115_vm15, %v3116_v2, %v3112_v40  ;;  %v6111_v39 = vsub.s32 32, %v3189_v12  ;;  %v3175_v42 = vand.u32 2147483647, %v6065_v14  ;;  %vm2701_vm2 = vcmp.lt.s32.totalorder %v2700_v0, 2 }
 0x334   : > { %v6109_v20 = vadd.s32 %v3117_v30, %v3113_v55  ;;  %vm2702_vm6 = vcmp.eq.s32.totalorder %v2700_v0, 0  ;;  %v6117_v23 = vsel %vm2524_vm1, 0.0, %v2505_v58  ;;  %v2703_v53 = vxor.u32 2147483648, %v2697_v54 }
 0x335   : > { %v3202_v24 = vshrl.u32 %v4102_v21, %v6111_v39  ;;  %v6120_v26 = vsub.s32 %v6070_v16, %v2966_v3  ;;  %v3193_v1 = vshrl.u32 %v4099_v15, %v6111_v39  ;;  %v3196_v11 = vshrl.u32 %v4100_v17, %v6111_v39 }
 0x336   : > { %v3119_v7 = vadd.s32 536870912, %v6109_v20  ;;  %v2706_v18 = vxor.u32 2147483648, %v2689_v22  ;;  %v3182_v61 = vand.u32 8388607, %v3175_v42  ;;  %v3199_v36 = vshrl.u32 %v6576_v5, %v6111_v39 }
 0x337   : > { %v3201_v51 = vshll.u32 %v6576_v5, %v3189_v12  ;;  %v6131_v32 = vshrl.u32 %v3187_v59, 5  ;;  %v3192_v16 = vshll.u32 %v4098_v13, %v3189_v12  ;;  %v3195_v31 = vshll.u32 %v4099_v15, %v3189_v12  ;;  %v3379_v59 = vld [vmem:[#allocation9 + $0x360] sm:$0xff] }
 0x338   : > { %v3205_v60 = vshrl.u32 %v6577_v41, %v6111_v39  ;;  %v6137_v63 = vshrl.u32 %v3119_v7, 30  ;;  %v3198_v46 = vshll.u32 %v4100_v17, %v3189_v12  ;;  %v3204_v35 = vshll.u32 %v4102_v21, %v3189_v12  ;;  %3423 = vmatpush.msrb.mxu2 %v3379_v59  ;;  %v3398_v7 = vld [vmem:[#allocation9 + $0x3f8] sm:$0xff] }
 0x339   : > { %v3203_v25 = vor.u32 %v3202_v24, %v3201_v51  ;;  %v2704_v49 = vsel %vm2702_vm6, %v2689_v22, %v2703_v53  ;;  %vm2705_vm5 = vcmp.eq.s32.totalorder %v2700_v0, 2  ;;  %v6142_v34 = vor.u32 %v3193_v1, %v3192_v16  ;;  %v3378_v22 = vld [vmem:[#allocation9 + $0x358] sm:$0xff]  ;;  %3443 = vmatpush.msrb.mxu3 %v3398_v7  ;;  %v3397_v53 = vld [vmem:[#allocation9 + $0x3f0] sm:$0xff]  ;;  %v3376_v51 = vld [vmem:[#allocation9 + $0x348] sm:$0xff] }
 0x33a   : > { %v6144_v40 = vor.u32 %v3196_v11, %v3195_v31  ;;  %vm2968_vm8 = vcmp.lt.s32.totalorder %v6120_v26, 0  ;;  %v6147_v27 = vor.u32 %v3199_v36, %v3198_v46  ;;  %v3206_v48 = vor.u32 %v3205_v60, %v3204_v35  ;;  %3424 = vmatpush.msrb.mxu2 %v3378_v22  ;;  %v6191_v59 = vld [vmem:[#allocation8 + $0x2] ss:$0 sm:$0xff] }
 0x33b   : > { %v6151_v9 = vmul.f32 %v5770_v50, %v6117_v23  ;;  %v2707_v2 = vsel %vm2705_vm5, %v2706_v18, %v2697_v54  ;;  %v2969_v55 = vsub.s32 0, %v6120_v26  ;;  %v3183_v12 = vor.u32 8388608, %v3182_v61  ;;  %3444 = vmatpush.msrb.mxu3 %v3397_v53 }
 0x33c   : > { %vm3210_vm7 = vcmp.lt.s32.totalorder %v6131_v32, 4  ;;  %v2708_v58 = vsel %vm2701_vm2, %v2704_v49, %v2707_v2  ;;  %v3121_v30 = vshll.u32 %v6137_v63, 30  ;;  %vm3207_vm0 = vcmp.lt.s32.totalorder %v6131_v32, 1  ;;  %3425 = vmatpush.msrb.mxu2 %v3377_v44  ;;  %v3395_v49 = vld [vmem:[#allocation9 + $0x3e0] sm:$0xff] }
 0x33d   : > { %v3216_v3 = vsel %vm3210_vm7, %v3203_v25, 920167782  ;;  %vm3209_vm12 = vcmp.lt.s32.totalorder %v6131_v32, 3  ;;  %v3215_v50 = vsel %vm3207_vm0, %v6142_v34, %v6144_v40  ;;  %vm2698_vm14 = vweird.f32 %v5778_v62  ;;  %3445 = vmatpush.msrb.mxu3 %v3396_v37  ;;  %v3372_v37 = vld [vmem:[#allocation9 + $0x328] sm:$0xff] }
 0x33e   : > { %v3217_v0 = vsel %vm3209_vm12, %v6147_v27, %v3216_v3  ;;  %v3219_v54 = vsel %vm3207_vm0, %v6144_v40, %v6147_v27  ;;  %v3220_v24 = vsel %vm3210_vm7, %v3206_v48, 1326507024  ;;  %v2709_v1 = vsel %vm2698_vm14, nan, %v2708_v58  ;;  %3426 = vmatpush.msrb.mxu2 %v3376_v51  ;;  %v3374_v58 = vld [vmem:[#allocation9 + $0x338] sm:$0xff] }
 0x33f   : > { %v2970_v11 = vsel %vm2968_vm8, %v2969_v55, %v6120_v26  ;;  %vm3208_vm9 = vcmp.lt.s32.totalorder %v6131_v32, 2  ;;  %v6179_v62 = vshll.u32 %v3183_v12, 8  ;;  %v6182_v18 = vsub.s32 %v6109_v20, %v3121_v30  ;;  %3446 = vmatpush.msrb.mxu3 %v3395_v49  ;;  %v3394_v30 = vld [vmem:[#allocation9 + $0x3d8] sm:$0xff] }
 0x340   : > { %v3218_v61 = vsel %vm3208_vm9, %v3215_v50, %v3217_v0  ;;  %v3221_v36 = vsel %vm3209_vm12, %v3203_v25, %v3220_v24  ;;  %v2713_v16 = vand.u32 2139095040, %v6151_v9  ;;  %v3330_v48 = vmul.f32 %v2709_v1, %v2709_v1  ;;  %3427 = vmatpush.msrb.mxu2 %v3375_v57  ;;  %v3393_v24 = vld [vmem:[#allocation9 + $0x3d0] sm:$0xff] }
 0x341   : > { %v3222_v31 = vsel %vm3208_vm9, %v3219_v54, %v3221_v36  ;;  %v3249_v60 = vshrl.u32 %v3218_v61, 16  ;;  %v3248_v20 = vand.u32 65535, %v3218_v61  ;;  %v2971_v2 = vclz %v2970_v11  ;;  %3447 = vmatpush.msrb.mxu3 %v3394_v30  ;;  %v3373_v54 = vld [vmem:[#allocation9 + $0x330] sm:$0xff] }
 0x342   : > { %v3226_v46 = vand.u32 65535, %v3222_v31  ;;  %v3227_v35 = vshrl.u32 %v3222_v31, 16  ;;  %v3224_v25 = vand.u32 65535, %v6179_v62  ;;  %v3225_v55 = vshrl.u32 %v6179_v62, 16  ;;  %3428 = vmatpush.msrb.mxu2 %v3374_v58 }
 0x343   : > { %v3124_v12 = vsub.s32 0, %v6182_v18  ;;  %v2714_v3 = vshrl.u32 %v2713_v16, 23  ;;  %vm3123_vm10 = vcmp.lt.s32.totalorder %v6182_v18, 0  ;;  %v3338_v44 = vmul.f32 %v6191_v59, %v3330_v48  ;;  %3448 = vmatpush.msrb.mxu3 %v3393_v24  ;;  %v3392_v16 = vld [vmem:[#allocation9 + $0x3c8] sm:$0xff] }
 0x344   : > { %v3229_v22 = vmul.u32 %v3227_v35, %v3224_v25  ;;  %v6197_v7 = vmul.u32 %v3226_v46, %v3225_v55  ;;  %v6199_v50 = vmul.u32 %v3249_v60, %v3224_v25  ;;  %v6201_v0 = vmul.u32 %v3248_v20, %v3225_v55  ;;  %3429 = vmatpush.msrb.mxu2 %v3373_v54 }
 0x345   : > { %v6204_v53 = vadd.s32 4294967294, %v2971_v2  ;;  %v3228_v1 = vmul.u32 %v3226_v46, %v3224_v25  ;;  %v3125_v61 = vsel %vm3123_vm10, %v3124_v12, %v6182_v18  ;;  %v3250_v36 = vmul.u32 %v3248_v20, %v3224_v25  ;;  %3449 = vmatpush.msrb.mxu3 %v3392_v16  ;;  %v3371_v20 = vld [vmem:[#allocation9 + $0x320] sm:$0xff] }
 0x346   : > { %v3232_v11 = vshll.u32 %v3229_v22, 16  ;;  %v3254_v51 = vshll.u32 %v6199_v50, 16  ;;  %v3687_v31 = vadd.s32 4294967169, %v2714_v3  ;;  %v3231_v57 = vmul.u32 %v3227_v35, %v3225_v55  ;;  %3430 = vmatpush.msrb.mxu2 %v3372_v37  ;;  %v3391_v25 = vld [vmem:[#allocation9 + $0x3c0] sm:$0xff] }
 0x347   : > { %v3234_v49 = vshll.u32 %v6197_v7, 16  ;;  %v3253_v46 = vmul.u32 %v3249_v60, %v3225_v55  ;;  %v3256_v2 = vshll.u32 %v6201_v0, 16  ;;  %v3191_v35 = vshrl.u32 %v4098_v13, %v6111_v39  ;;  %3450 = vmatpush.msrb.mxu3 %v3391_v25  ;;  %v3370_v60 = vld [vmem:[#allocation9 + $0x318] sm:$0xff] }
 0x348   : > { %vm3236_vm13 = vc.u32 %v3228_v1, %v3232_v11  ;;  %v3238_v58 = vadd.s32 %v3232_v11, %v3228_v1  ;;  %vm3258_vm11 = vc.u32 %v3250_v36, %v3254_v51  ;;  %v3260_v3 = vadd.s32 %v3254_v51, %v3250_v36  ;;  %3431 = vmatpush.msrb.mxu2 %v3371_v20  ;;  %v3390_v55 = vld [vmem:[#allocation9 + $0x3b8] sm:$0xff]  ;;  %v3388_v20 = vld [vmem:[#allocation9 + $0x3a8] sm:$0xff] }
 0x349   : > { %v3237_v48 = vsel %vm3236_vm13, 1, %v4104_v47  ;;  %v3259_v30 = vsel %vm3258_vm11, 1, %v4104_v47  ;;  %v2720_v1 = vadd.s32 1, %v3687_v31  ;;  %v3212_v11 = vsel %vm3210_vm7, %v6147_v27, 2102212464  ;;  %3451 = vmatpush.msrb.mxu3 %v3390_v55  ;;  %v3414_v55 = vld [vmem:[#allocation9 + $0x478] sm:$0xff] }
 0x34a   : > { %v3239_v12 = vadd.s32 %v3237_v48, %v3231_v57  ;;  %vm3240_vm15 = vc.u32 %v3238_v58, %v3234_v49  ;;  %v3261_v24 = vadd.s32 %v3259_v30, %v3253_v46  ;;  %v3233_v37 = vshrl.u32 %v3229_v22, 16  ;;  %3432 = vmatpush.msrb.mxu2 %v3370_v60  ;;  %v3369_v57 = vld [vmem:[#allocation9 + $0x310] sm:$0xff] }
 0x34b   : > { %v3241_v54 = vsel %vm3240_vm15, 1, %v4104_v47  ;;  %vm3262_vm1 = vc.u32 %v3260_v3, %v3256_v2  ;;  %v3126_v36 = vclz %v3125_v61  ;;  %v3235_v51 = vshrl.u32 %v6197_v7, 16  ;;  %v3389_v49 = vld [vmem:[#allocation9 + $0x3b0] sm:$0xff]  ;;  %v3368_v61 = vld [vmem:[#allocation9 + $0x308] sm:$0xff] }
 0x34c   : > { %v3243_v16 = vadd.s32 %v3241_v54, %v3239_v12  ;;  %v3263_v39 = vsel %vm3262_vm1, 1, %v4104_v47  ;;  %vm2721_vm2 = vcmp.gt.s32.totalorder %v2720_v1, 0  ;;  %v3255_v31 = vshrl.u32 %v6199_v50, 16  ;;  %3433 = vmatpush.msrb.mxu2 %v3369_v57  ;;  %3452 = vmatpush.msrb.mxu3 %v3389_v49 }
 0x34d   : > { %v3265_v48 = vadd.s32 %v3263_v39, %v3261_v24  ;;  %v2722_v46 = vsel %vm2721_vm2, %v2720_v1, 0  ;;  %v3343_v27 = vadd.f32 %v3338_v44, %v5774_v43  ;;  %v3211_v22 = vsel %vm3207_vm0, %v3191_v35, %v6142_v34  ;;  %v3367_v34 = vld [vmem:[#allocation9 + $0x300] sm:$0xff] }
 0x34e   : > { %v3244_v58 = vadd.s32 %v3243_v16, %v3233_v37  ;;  %v3213_v7 = vsel %vm3209_vm12, %v6144_v40, %v3212_v11  ;;  %v2724_v25 = vand.u32 31, %v2722_v46  ;;  %v3257_v50 = vshrl.u32 %v6201_v0, 16  ;;  %3434 = vmatpush.msrb.mxu2 %v3368_v61  ;;  %3453 = vmatpush.msrb.mxu3 %v3388_v20  ;;  %v3387_v35 = vld [vmem:[#allocation9 + $0x3a0] sm:$0xff]  ;;  %v3386_v0 = vld [vmem:[#allocation9 + $0x398] sm:$0xff]  ;;  %v3385_v11 = vld [vmem:[#allocation9 + $0x390] sm:$0xff] }
 0x34f   : > { %v3266_v30 = vadd.s32 %v3265_v48, %v3255_v31  ;;  %v2710_v43 = vand.u32 2147483647, %v6151_v9  ;;  %v3694_v44 = vadd.s32 4294967294, %v3126_v36  ;;  %v6232_v54 = vadd.s32 %v3260_v3, %v3256_v2  ;;  %v3413_v3 = vld [vmem:[#allocation9 + $0x470] sm:$0xff] }
 0x350   : > { %v6228_v12 = vadd.s32 %v3244_v58, %v3235_v51  ;;  %v6234_v24 = vsub.s32 32, %v2724_v25  ;;  %v3214_v40 = vsel %vm3208_vm9, %v3211_v22, %v3213_v7  ;;  %3435 = vmatpush.msrb.mxu2 %v3367_v34  ;;  %3454 = vmatpush.msrb.mxu3 %v3387_v35  ;;  %vm3692_vm5 = vcmp.lt.s32.totalorder %v6204_v53, 0  ;;  %v3412_v51 = vld [vmem:[#allocation9 + $0x468] sm:$0xff]  ;;  %v3410_v34 = vld [vmem:[#allocation9 + $0x458] sm:$0xff] }
 0x351   : > { %v3267_v60 = vadd.s32 %v3266_v30, %v3257_v50  ;;  %3436 = vmatmul.f32.vlgmr.msrb.gmra.mxu2 %v3343_v27  ;;  %v2717_v1 = vand.u32 8388607, %v2710_v43  ;;  %vm3695_vm8 = vcmp.lt.s32.totalorder %v3694_v44, 0  ;;  %v3268_v32 = vmul.u32 %v6179_v62, %v3214_v40  ;;  %v3384_v58 = vld [vmem:[#allocation9 + $0x388] sm:$0xff] }
 0x352   : > { %vm3270_vm6 = vc.u32 %v6228_v12, %v6232_v54  ;;  %3466 = vmatpush.msra.mxu2 %v3414_v55  ;;  %3455 = vmatpush.msrb.mxu3 %v3386_v0  ;;  %v2731_v37 = vshrl.u32 %v4100_v17, %v6234_v24  ;;  %v2734_v16 = vshrl.u32 %v6576_v5, %v6234_v24  ;;  %v6255_v31 = vshrl.u32 %v2722_v46, 5  ;;  %v3383_v46 = vld [vmem:[#allocation9 + $0x380] sm:$0xff] }
 0x353   : > { %v3271_v2 = vadd.s32 1, %v3267_v60  ;;  %v2730_v39 = vshll.u32 %v4099_v15, %v2724_v25  ;;  %v2736_v57 = vshll.u32 %v6576_v5, %v2724_v25  ;;  %v2737_v62 = vshrl.u32 %v4102_v21, %v6234_v24  ;;  %v3411_v5 = vld [vmem:[#allocation9 + $0x460] sm:$0xff] }
 0x354   : > { %3467 = vmatpush.msra.mxu2 %v3413_v3  ;;  %3456 = vmatpush.msrb.mxu3 %v3385_v11  ;;  %v2728_v48 = vshrl.u32 %v4099_v15, %v6234_v24  ;;  %v2733_v27 = vshll.u32 %v4100_v17, %v2724_v25  ;;  %v6263_v22 = vsel %vm3692_vm5, 0, %v6204_v53  ;;  %v2739_v61 = vshll.u32 %v4102_v21, %v2724_v25 }
 0x355   : > { %v3272_v36 = vsel %vm3270_vm6, %v3271_v2, %v3267_v60  ;;  %v2738_v7 = vor.u32 %v2737_v62, %v2736_v57  ;;  %v2740_v20 = vshrl.u32 %v6577_v41, %v6234_v24  ;;  %v2727_v15 = vshll.u32 %v4098_v13, %v2724_v25  ;;  %v3409_v25 = vld [vmem:[#allocation9 + $0x450] sm:$0xff] }
 0x356   : > { %v3273_v49 = vadd.s32 %v3272_v36, %v3268_v32  ;;  %3468 = vmatpush.msra.mxu2 %v3412_v51  ;;  %3457 = vmatpush.msrb.mxu3 %v3384_v58  ;;  %v6269_v30 = vor.u32 %v2731_v37, %v2730_v39  ;;  %v6271_v17 = vor.u32 %v2734_v16, %v2733_v27  ;;  %v6274_v53 = vsel %vm3695_vm8, 0, %v3694_v44 }
 0x357   : > { %v2718_v35 = vor.u32 8388608, %v2717_v1  ;;  %v2741_v40 = vor.u32 %v2740_v20, %v2739_v61  ;;  %v2979_v21 = vsub.s32 4294967266, %v6263_v22  ;;  %v6279_v41 = vor.u32 %v2728_v48, %v2727_v15 }
 0x358   : > { %v3274_v50 = vadd.s32 536870912, %v3273_v49  ;;  %3469 = vmatpush.msra.mxu2 %v3411_v5  ;;  %3458 = vmatpush.msrb.mxu3 %v3383_v46  ;;  %vm2745_vm7 = vcmp.lt.s32.totalorder %v6255_v31, 4  ;;  %vm2742_vm0 = vcmp.lt.s32.totalorder %v6255_v31, 1  ;;  %v3134_v2 = vsub.s32 4294967266, %v6274_v53 }
 0x359   : > { %v2751_v44 = vsel %vm2745_vm7, %v2738_v7, 920167782  ;;  %v2755_v0 = vsel %vm2745_vm7, %v2741_v40, 1326507024  ;;  %vm2744_vm12 = vcmp.lt.s32.totalorder %v6255_v31, 3  ;;  %v2975_v32 = vsub.s32 32, %v6263_v22 }
 0x35a   : > { %v6277_v60 = vshrl.u32 %v3274_v50, 30  ;;  %3470 = vmatpush.msra.mxu2 %v3410_v34  ;;  %3705 = vmatpush.msra.mxu3 %v3414_v55  ;;  %v2754_v55 = vsel %vm2742_vm0, %v6269_v30, %v6271_v17  ;;  %v2756_v11 = vsel %vm2744_vm12, %v2738_v7, %v2755_v0  ;;  %v6297_v37 = vshll.u32 %v2718_v35, 8 }
 0x35b   : > { %vm2743_vm14 = vcmp.lt.s32.totalorder %v6255_v31, 2  ;;  %v2750_v36 = vsel %vm2742_vm0, %v6279_v41, %v6269_v30  ;;  %v2752_v39 = vsel %vm2744_vm12, %v6271_v17, %v2751_v44  ;;  %v2980_v57 = vadd.s32 127, %v2979_v21 }
 0x35c   : > { %v3276_v1 = vshll.u32 %v6277_v60, 30  ;;  %3471 = vmatpush.msra.mxu2 %v3409_v25  ;;  %3706 = vmatpush.msra.mxu3 %v3413_v3  ;;  %v2757_v3 = vsel %vm2743_vm14, %v2754_v55, %v2756_v11  ;;  %v2959_v62 = vadd.s32 %v6044_v6, %v6035_v28  ;;  %v2753_v48 = vsel %vm2743_vm14, %v2750_v36, %v2752_v39 }
 0x35d   : > { %v2759_v27 = vand.u32 65535, %v6297_v37  ;;  %v2761_v7 = vand.u32 65535, %v2757_v3  ;;  %v2762_v61 = vshrl.u32 %v2757_v3, 16  ;;  %v2981_v46 = vshll.u32 %v2980_v57, 23 }
 0x35e   : > { %v6299_v16 = vsub.s32 %v3273_v49, %v3276_v1  ;;  %3707 = vmatpush.msra.mxu3 %v3412_v51  ;;  %v3135_v49 = vadd.s32 127, %v3134_v2  ;;  %v2977_v20 = vshrl.u32 %v2959_v62, %v2975_v32  ;;  %v2760_v51 = vshrl.u32 %v6297_v37, 16 }
 0x35f   : > { %v3130_v28 = vsub.s32 32, %v6274_v53  ;;  %v2764_v15 = vmul.u32 %v2762_v61, %v2759_v27  ;;  %v2976_v35 = vshll.u32 %v6120_v26, %v6263_v22  ;;  %v2784_v21 = vshrl.u32 %v2753_v48, 16 }
 0x360   : > { %vm3278_vm9 = vcmp.lt.s32.totalorder %v6299_v16, 0  ;;  %v3279_v58 = vsub.s32 0, %v6299_v16  ;;  %3708 = vmatpush.msra.mxu3 %v3411_v5  ;;  %v2765_v40 = vmul.u32 %v2761_v7, %v2760_v51  ;;  %v3114_v44 = vadd.s32 %v6094_v19, %v6091_v56 }
 0x361   : > { %v3136_v5 = vshll.u32 %v3135_v49, 23  ;;  %v2978_v2 = vor.u32 %v2977_v20, %v2976_v35  ;;  %v2763_v1 = vmul.u32 %v2761_v7, %v2759_v27  ;;  %v2767_v55 = vshll.u32 %v2764_v15, 16 }
 0x362   : > { %v3280_v50 = vsel %vm3278_vm9, %v3279_v58, %v6299_v16  ;;  %3709 = vmatpush.msra.mxu3 %v3410_v34  ;;  %v2783_v32 = vand.u32 65535, %v2753_v48  ;;  %v2982_v11 = vor.u32 4788187, %v2981_v46  ;;  %v3132_v36 = vshrl.u32 %v3114_v44, %v3130_v28 }
 0x363   : > { %v3281_v6 = vclz %v3280_v50  ;;  %v2769_v39 = vshll.u32 %v2765_v40, 16  ;;  %vm2771_vm13 = vc.u32 %v2763_v1, %v2767_v55  ;;  %v2773_v57 = vadd.s32 %v2767_v55, %v2763_v1 }
 0x364   : > { %3710 = vmatpush.msra.mxu3 %v3409_v25  ;;  %v2786_v26 = vmul.u32 %v2784_v21, %v2759_v27  ;;  %v3131_v22 = vshll.u32 %v6182_v18, %v6274_v53  ;;  %v3137_v3 = vor.u32 4788187, %v3136_v5  ;;  %v2766_v56 = vmul.u32 %v2762_v61, %v2760_v51 }
 0x365   : > { %v3697_v0 = vadd.s32 4294967294, %v3281_v6  ;;  %v2772_v25 = vsel %vm2771_vm13, 1, %v4104_v47  ;;  %vm2775_vm11 = vc.u32 %v2773_v57, %v2769_v39  ;;  %v2787_v62 = vmul.u32 %v2783_v32, %v2760_v51 }
 0x366   : > { %v2983_v49 = vand.u32 2147483647, %v2982_v11  ;;  %v3133_v58 = vor.u32 %v3132_v36, %v3131_v22  ;;  %v2774_v48 = vadd.s32 %v2772_v25, %v2766_v56  ;;  %v2985_v7 = vcvt.s32.f32 %v2978_v2 }
 0x367   : > { %vm3698_vm10 = vcmp.lt.s32.totalorder %v3697_v0, 0  ;;  %v2776_v20 = vsel %vm2775_vm11, 1, %v4104_v47  ;;  %v2785_v50 = vmul.u32 %v2783_v32, %v2759_v27  ;;  %v2789_v46 = vshll.u32 %v2786_v26, 16 }
 0x368   : > { %v3284_v34 = vsel %vm3698_vm10, 0, %v3697_v0  ;;  %v3138_v28 = vand.u32 2147483647, %v3137_v3  ;;  %v2768_v6 = vshrl.u32 %v2764_v15, 16  ;;  %v2778_v35 = vadd.s32 %v2776_v20, %v2774_v48 }
 0x369   : > { %v3289_v19 = vsub.s32 4294967266, %v3284_v34  ;;  %v2788_v44 = vmul.u32 %v2784_v21, %v2760_v51  ;;  %v2791_v53 = vshll.u32 %v2787_v62, 16  ;;  %vm2793_vm15 = vc.u32 %v2785_v50, %v2789_v46 }
 0x36a   : > { %v2795_v61 = vadd.s32 %v2789_v46, %v2785_v50  ;;  %v2986_v5 = vmul.f32 %v2985_v7, %v2983_v49  ;;  %v3140_v0 = vcvt.s32.f32 %v3133_v58  ;;  %v2779_v1 = vadd.s32 %v2778_v35, %v2768_v6 }
 0x36b   : > { %v3290_v18 = vadd.s32 127, %v3289_v19  ;;  %v2794_v55 = vsel %vm2793_vm15, 1, %v4104_v47  ;;  %v3285_v11 = vsub.s32 32, %v3284_v34  ;;  %v2747_v2 = vsel %vm2745_vm7, %v6271_v17, 2102212464 }
 0x36c   : > { %v2796_v27 = vadd.s32 %v2794_v55, %v2788_v44  ;;  %vm2797_vm1 = vc.u32 %v2795_v61, %v2791_v53  ;;  %v3141_v32 = vmul.f32 %v3140_v0, %v3138_v28  ;;  %v2726_v51 = vshrl.u32 %v4098_v13, %v6234_v24 }
 0x36d   : > { %v2770_v15 = vshrl.u32 %v2765_v40, 16  ;;  %v2798_v21 = vsel %vm2797_vm1, 1, %v4104_v47  ;;  %v3269_v36 = vadd.s32 %v6232_v54, %v6228_v12  ;;  %v3291_v39 = vshll.u32 %v3290_v18, 23 }
 0x36e   : > { %v2790_v57 = vshrl.u32 %v2786_v26, 16  ;;  %v2800_v22 = vadd.s32 %v2798_v21, %v2796_v27  ;;  %v2987_v3 = vxor.u32 2147483648, %v2986_v5  ;;  %v2746_v17 = vsel %vm2742_vm0, %v2726_v51, %v6279_v41 }
 0x36f   : > { %v2748_v56 = vsel %vm2744_vm12, %v6269_v30, %v2747_v2  ;;  %v2780_v19 = vadd.s32 %v2779_v1, %v2770_v15  ;;  %v3287_v13 = vshrl.u32 %v3269_v36, %v3285_v11  ;;  %v2792_v24 = vshrl.u32 %v2787_v62, 16 }
 0x370   : > { %v2801_v40 = vadd.s32 %v2800_v22, %v2790_v57  ;;  %vm2867_vm2 = vcmp.lt.s32.totalorder %v5826_v10, 0  ;;  %v3142_v47 = vxor.u32 2147483648, %v3141_v32  ;;  %v2799_v12 = vadd.s32 %v2795_v61, %v2791_v53 }
 0x371   : > { %v3286_v54 = vshll.u32 %v6299_v16, %v3284_v34  ;;  %v3292_v26 = vor.u32 4788187, %v3291_v39  ;;  %v2749_v25 = vsel %vm2743_vm14, %v2746_v17, %v2748_v56  ;;  %v2988_v41 = vsel %vm2867_vm2, %v2987_v3, %v2986_v5 }
 0x372   : > { %v2802_v49 = vadd.s32 %v2801_v40, %v2792_v24  ;;  %vm2805_vm6 = vc.u32 %v2780_v19, %v2799_v12  ;;  %vm3022_vm5 = vcmp.lt.s32.totalorder %v5923_v33, 0  ;;  %vm6353_vm8 = vcmp.le.f32.partialorder %v2865_v29, 0.7853982 }
 0x373   : > { %v3288_v30 = vor.u32 %v3287_v13, %v3286_v54  ;;  %v3143_v16 = vsel %vm3022_vm5, %v3142_v47, %v3141_v32  ;;  %v2803_v31 = vmul.u32 %v6297_v37, %v2749_v25  ;;  %v6363_v34 = vsel %vm6353_vm8, %v5826_v10, %v2988_v41 }
 0x374   : > { %v2806_v62 = vadd.s32 1, %v2802_v49  ;;  %v3293_v48 = vand.u32 2147483647, %v3292_v26  ;;  %vm6367_vm7 = vcmp.le.f32.partialorder %v3020_v38, 0.7853982  ;;  %v2993_v46 = vmul.f32 %v6363_v34, %v6363_v34 }
 0x375   : > { %v6374_v50 = vsel %vm6367_vm7, %v5923_v33, %v3143_v16  ;;  %v3295_v37 = vcvt.s32.f32 %v3288_v30  ;;  %vm3177_vm0 = vcmp.lt.s32.totalorder %v6065_v14, 0  ;;  %vm6388_vm14 = vcmp.le.f32.partialorder %v3175_v42, 0.7853982 }
 0x376   : > { %v2807_v7 = vsel %vm2805_vm6, %v2806_v62, %v2802_v49  ;;  %v3148_v35 = vmul.f32 %v6374_v50, %v6374_v50  ;;  %v3001_v38 = vmul.f32 -0.00019511016, %v2993_v46  ;;  %v2994_v11 = vmul.f32 -0.001358992, %v2993_v46 }
 0x377   : > { %v2808_v29 = vadd.s32 %v2807_v7, %v2803_v31  ;;  %v3296_v6 = vmul.f32 %v3295_v37, %v3293_v48  ;;  %v2989_v42 = vsub.s32 4, %v6100_v45  ;;  %v2804_v24 = vadd.s32 %v2799_v12, %v2780_v19 }
 0x378   : > { %v3156_v61 = vmul.f32 -0.00019511016, %v3148_v35  ;;  %v3002_v0 = vadd.f32 0.008332121, %v3001_v38  ;;  %v3149_v21 = vmul.f32 -0.001358992, %v3148_v35 }
 0x379   : > { %v2809_v28 = vadd.s32 536870912, %v2808_v29  ;;  %v3297_v53 = vxor.u32 2147483648, %v3296_v6  ;;  %v2995_v57 = vadd.f32 0.041655596, %v2994_v11  ;;  %v3144_v26 = vsub.s32 4, %v6137_v63 }
 0x37a   : > { %v3157_v2 = vadd.f32 0.008332121, %v3156_v61  ;;  %v3003_v15 = vmul.f32 %v3002_v0, %v2993_v46  ;;  %v3150_v56 = vadd.f32 0.041655596, %v3149_v21  ;;  %v2990_v16 = vsel %vm2867_vm2, %v2989_v42, %v6100_v45 }
 0x37b   : > { %v6380_v44 = vshrl.u32 %v2809_v28, 30  ;;  %v3298_v55 = vsel %vm3177_vm0, %v3297_v53, %v3296_v6  ;;  %v2996_v54 = vmul.f32 %v2995_v57, %v2993_v46  ;;  %v3145_v12 = vsel %vm3022_vm5, %v3144_v26, %v6137_v63 }
 0x37c   : > { %v6395_v36 = vsel %vm6388_vm14, %v6065_v14, %v3298_v55  ;;  %v3158_v22 = vmul.f32 %v3157_v2, %v3148_v35  ;;  %v3004_v17 = vadd.f32 -0.16666654, %v3003_v15  ;;  %v3151_v48 = vmul.f32 %v3150_v56, %v3148_v35  ;;  %v3407_v15 = vld [vmem:[#allocation9 + $0x440] sm:$0xff] }
 0x37d   : > { %v2811_v18 = vshll.u32 %v6380_v44, 30  ;;  %v6399_v3 = vmul.f32 %v6395_v36, %v6395_v36  ;;  %v2997_v19 = vadd.f32 -0.4999988, %v2996_v54  ;;  %v2992_v28 = vsel %vm6353_vm8, 0, %v2990_v16 }
 0x37e   : > { %v3159_v25 = vadd.f32 -0.16666654, %v3158_v22  ;;  %v3005_v31 = vmul.f32 %v3004_v17, %v2993_v46  ;;  %v3152_v53 = vadd.f32 -0.4999988, %v3151_v48  ;;  %v3147_v45 = vsel %vm6367_vm7, 0, %v3145_v12 }
 0x37f   : > { %v2812_v5 = vsub.s32 %v2808_v29, %v2811_v18  ;;  %v3311_v49 = vmul.f32 -0.00019511016, %v6399_v3  ;;  %v3304_v61 = vmul.f32 -0.001358992, %v6399_v3  ;;  %v3009_v55 = vadd.s32 3, %v2992_v28 }
 0x380   : > { %v3160_v37 = vmul.f32 %v3159_v25, %v3148_v35  ;;  %v3006_v18 = vadd.f32 1.0, %v3005_v31  ;;  %v3164_v58 = vadd.s32 3, %v3147_v45  ;;  %vm2712_vm10 = vcmp.lt.s32.totalorder %v6151_v9, 0 }
 0x381   : > { %vm2813_vm12 = vcmp.lt.s32.totalorder %v2812_v5, 0  ;;  %v2814_v1 = vsub.s32 0, %v2812_v5  ;;  %v3312_v6 = vadd.f32 0.008332121, %v3311_v49  ;;  %v3010_v22 = vand.u32 3, %v3009_v55 }
 0x382   : > { %v3161_v11 = vadd.f32 1.0, %v3160_v37  ;;  %v3007_v21 = vmul.f32 %v3006_v18, %v6363_v34  ;;  %v3299_v17 = vsub.s32 4, %v6277_v60  ;;  %vm6422_vm13 = vcmp.le.f32.partialorder %v2710_v43, 0.7853982  ;;  %v3402_v18 = vld [vmem:[#allocation9 + $0x418] sm:$0xff] }
 0x383   : > { %v2815_v27 = vsel %vm2813_vm12, %v2814_v1, %v2812_v5  ;;  %v2998_v1 = vmul.f32 %v2997_v19, %v2993_v46  ;;  %v3313_v63 = vmul.f32 %v3312_v6, %v6399_v3  ;;  %v3406_v46 = vld [vmem:[#allocation9 + $0x438] sm:$0xff]  ;;  %vm3012_vm11 = vcmp.eq.s32.totalorder %v3010_v22, 0 }
 0x384   : > { %v2816_v51 = vclz %v2815_v27  ;;  %v3153_v27 = vmul.f32 %v3152_v53, %v3148_v35  ;;  %v3162_v42 = vmul.f32 %v3161_v11, %v6374_v50  ;;  %v2834_v50 = vsub.s32 4, %v6380_v44 }
 0x385   : > { %v2999_v20 = vadd.f32 1.0, %v2998_v1  ;;  %v3314_v56 = vadd.f32 -0.16666654, %v3313_v63  ;;  %v3013_v54 = vxor.u32 2147483648, %v3007_v21  ;;  %vm3015_vm15 = vcmp.eq.s32.totalorder %v3010_v22, 2 }
 0x386   : > { %v3688_v39 = vadd.s32 4294967294, %v2816_v51  ;;  %v3408_v51 = vld [vmem:[#allocation9 + $0x448] sm:$0xff]  ;;  %v3168_v49 = vxor.u32 2147483648, %v3162_v42  ;;  %vm3011_vm2 = vcmp.lt.s32.totalorder %v3010_v22, 2  ;;  %vm3008_vm8 = vweird.f32 %v5826_v10 }
 0x387   : > { %3472 = vmatpush.msra.mxu2 %v3408_v51  ;;  %3711 = vmatpush.msra.mxu3 %v3408_v51  ;;  %v3016_v25 = vxor.u32 2147483648, %v2999_v20  ;;  %v3014_v19 = vsel %vm3012_vm11, %v2999_v20, %v3013_v54  ;;  %vm3163_vm7 = vweird.f32 %v5923_v33 }
 0x388   : > { %vm3689_vm9 = vcmp.lt.s32.totalorder %v3688_v39, 0 }
 0x389   : > { %v2819_v13 = vsel %vm3689_vm9, 0, %v3688_v39  ;;  %v3305_v39 = vadd.f32 0.041655596, %v3304_v61  ;;  %3473 = vmatpush.msra.mxu2 %v3407_v15  ;;  %3712 = vmatpush.msra.mxu3 %v3407_v15 }
 0x38a   : > { %v2820_v40 = vsub.s32 32, %v2819_v13  ;;  %v2824_v47 = vsub.s32 4294967266, %v2819_v13  ;;  %v2821_v41 = vshll.u32 %v2812_v5, %v2819_v13  ;;  %v3154_v13 = vadd.f32 1.0, %v3153_v27 }
 0x38b   : > { %v3306_v43 = vmul.f32 %v3305_v39, %v6399_v3  ;;  %3474 = vmatpush.msra.mxu2 %v3406_v46  ;;  %3713 = vmatpush.msra.mxu3 %v3406_v46 }
 0x38c   : > { %v2822_v30 = vshrl.u32 %v2804_v24, %v2820_v40  ;;  %v2825_v62 = vadd.s32 127, %v2824_v47  ;;  %v3165_v24 = vand.u32 3, %v3164_v58  ;;  %v3405_v47 = vld [vmem:[#allocation9 + $0x430] sm:$0xff]  ;;  %v3171_v48 = vxor.u32 2147483648, %v3154_v13  ;;  %v3400_v58 = vld [vmem:[#allocation9 + $0x408] sm:$0xff] }
 0x38d   : > { %3475 = vmatpush.msra.mxu2 %v3405_v47  ;;  %3714 = vmatpush.msra.mxu3 %v3405_v47  ;;  %v3307_v12 = vadd.f32 -0.4999988, %v3306_v43 }
 0x38e   : > { %v2823_v7 = vor.u32 %v2822_v30, %v2821_v41  ;;  %v2826_v29 = vshll.u32 %v2825_v62, 23  ;;  %v3404_v41 = vld [vmem:[#allocation9 + $0x428] sm:$0xff]  ;;  %v3300_v30 = vsel %vm3177_vm0, %v3299_v17, %v6277_v60  ;;  %v3315_v62 = vmul.f32 %v3314_v56, %v6399_v3 }
 0x38f   : > { %vm3167_vm1 = vcmp.eq.s32.totalorder %v3165_v24, 0  ;;  %3476 = vmatpush.msra.mxu2 %v3404_v41  ;;  %3715 = vmatpush.msra.mxu3 %v3404_v41  ;;  %v3017_v60 = vsel %vm3015_vm15, %v3016_v25, %v3007_v21  ;;  %vm3166_vm6 = vcmp.lt.s32.totalorder %v3165_v24, 2  ;;  %vm3170_vm5 = vcmp.eq.s32.totalorder %v3165_v24, 2 }
 0x390   : > { %v2827_v38 = vor.u32 4788187, %v2826_v29  ;;  %v2830_v0 = vcvt.s32.f32 %v2823_v7  ;;  %v2835_v7 = vsel %vm2712_vm10, %v2834_v50, %v6380_v44  ;;  %v3403_v29 = vld [vmem:[#allocation9 + $0x420] sm:$0xff]  ;;  %v3169_v6 = vsel %vm3167_vm1, %v3154_v13, %v3168_v49 }
 0x391   : > { %v3316_v53 = vadd.f32 1.0, %v3315_v62  ;;  %v2837_v45 = vsel %vm6422_vm13, 0, %v2835_v7  ;;  %3477 = vmatpush.msra.mxu2 %v3403_v29  ;;  %3716 = vmatpush.msra.mxu3 %v3403_v29  ;;  %v3172_v1 = vsel %vm3170_vm5, %v3171_v48, %v3162_v42  ;;  %v3308_v55 = vmul.f32 %v3307_v12, %v6399_v3 }
 0x392   : > { %v2828_v5 = vand.u32 2147483647, %v2827_v38  ;;  %v3302_v38 = vsel %vm6388_vm14, 0, %v3300_v30  ;;  %v3173_v32 = vsel %vm3166_vm6, %v3169_v6, %v3172_v1  ;;  %v2854_v27 = vadd.s32 3, %v2837_v45 }
 0x393   : > { %3478 = vmatpush.msra.mxu2 %v3402_v18  ;;  %3717 = vmatpush.msra.mxu3 %v3402_v18  ;;  %v3317_v15 = vmul.f32 %v3316_v53, %v6395_v36  ;;  %v3309_v3 = vadd.f32 1.0, %v3308_v55  ;;  %v3174_v42 = vsel %vm3163_vm7, nan, %v3173_v32  ;;  %vm3318_vm15 = vweird.f32 %v6065_v14 }
 0x394   : > { %v2831_v2 = vmul.f32 %v2830_v0, %v2828_v5  ;;  %v3018_v5 = vsel %vm3011_vm2, %v3014_v19, %v3017_v60  ;;  %v3401_v0 = vld [vmem:[#allocation9 + $0x410] sm:$0xff]  ;;  %v2855_v17 = vand.u32 3, %v2854_v27 }
 0x395   : > { %v3019_v51 = vsel %vm3008_vm8, nan, %v3018_v5  ;;  %3479 = vmatpush.msra.mxu2 %v3401_v0  ;;  %3718 = vmatpush.msra.mxu3 %v3401_v0  ;;  %v3323_v56 = vxor.u32 2147483648, %v3317_v15  ;;  %v3326_v13 = vxor.u32 2147483648, %v3309_v3  ;;  %v3860_v0 = vld [vmem:[%s4278_s30] sm:$0xff] }
 0x396   : > { %v2832_v57 = vxor.u32 2147483648, %v2831_v2  ;;  %v3332_v10 = vmul.f32 %v3019_v51, %v3019_v51  ;;  %vm2857_vm12 = vcmp.eq.s32.totalorder %v2855_v17, 0  ;;  %vm2860_vm14 = vcmp.eq.s32.totalorder %v2855_v17, 2 }
 0x397   : > { %3480 = vmatpush.msra.mxu2 %v3400_v58  ;;  %3719 = vmatpush.msra.mxu3 %v3400_v58  ;;  %vm2856_vm9 = vcmp.lt.s32.totalorder %v2855_v17, 2 }
 0x398   : > { %v2833_v34 = vsel %vm2712_vm10, %v2832_v57, %v2831_v2  ;;  %v3319_v2 = vadd.s32 3, %v3302_v38  ;;  %v3399_v57 = vld [vmem:[#allocation9 + $0x400] sm:$0xff]  ;;  %v3340_v33 = vmul.f32 %v6191_v59, %v3332_v10 }
 0x399   : > { %v6432_v40 = vsel %vm6422_vm13, %v6151_v9, %v2833_v34  ;;  %3481 = vmatpush.msra.mxu2 %v3399_v57  ;;  %3720 = vmatpush.msra.mxu3 %v3399_v57  ;;  %v3333_v34 = vmul.f32 %v3174_v42, %v3174_v42  ;;  %vm2853_vm13 = vweird.f32 %v6151_v9 }
 0x39a   : > { %v2838_v26 = vmul.f32 %v6432_v40, %v6432_v40  ;;  %v3320_v46 = vand.u32 3, %v3319_v2  ;;  %v3345_v49 = vadd.f32 %v3340_v33, %v5807_v4  ;;  %v3861_v2 = vld [vmem:[%s4278_s30 + $0x8] sm:$0xff] }
 0x39c   : > { %v2839_v16 = vmul.f32 -0.001358992, %v2838_v26  ;;  %v2846_v31 = vmul.f32 -0.00019511016, %v2838_v26  ;;  %vm3322_vm0 = vcmp.eq.s32.totalorder %v3320_v46, 0  ;;  %vm3325_vm10 = vcmp.eq.s32.totalorder %v3320_v46, 2 }
 0x39d   : > { %v3324_v50 = vsel %vm3322_vm0, %v3309_v3, %v3323_v56  ;;  %vm3321_vm11 = vcmp.lt.s32.totalorder %v3320_v46, 2  ;;  %v3352_v48 = vrot.slane %v3345_v49, 1 }
 0x39e   : > { %v2840_v37 = vadd.f32 0.041655596, %v2839_v16  ;;  %v2847_v28 = vadd.f32 0.008332121, %v2846_v31 }
 0x3a0   : > { %v2841_v61 = vmul.f32 %v2840_v37, %v2838_v26  ;;  %v2848_v44 = vmul.f32 %v2847_v28, %v2838_v26  ;;  %v3359_v37 = vrot.slane %v3345_v49, 2 }
 0x3a2   : > { %v2842_v11 = vadd.f32 -0.4999988, %v2841_v61  ;;  %v2849_v63 = vadd.f32 -0.16666654, %v2848_v44 }
 0x3a4   : > { %v2843_v21 = vmul.f32 %v2842_v11, %v2838_v26  ;;  %v2850_v39 = vmul.f32 %v2849_v63, %v2838_v26  ;;  %v3327_v26 = vsel %vm3325_vm10, %v3326_v13, %v3317_v15 }
 0x3a5   : > { %v3328_v41 = vsel %vm3321_vm11, %v3324_v50, %v3327_v26 }
 0x3a6   : > { %v2844_v20 = vadd.f32 1.0, %v2843_v21  ;;  %v2851_v22 = vadd.f32 1.0, %v2850_v39  ;;  %v3329_v31 = vsel %vm3318_vm15, nan, %v3328_v41 }
 0x3a7   : > { %v3334_v7 = vmul.f32 %v3329_v31, %v3329_v31 }
 0x3a8   : > { %v2852_v35 = vmul.f32 %v2851_v22, %v6432_v40  ;;  %v2861_v36 = vxor.u32 2147483648, %v2844_v20  ;;  %v3341_v40 = vmul.f32 %v6191_v59, %v3333_v34 }
 0x3a9   : > { %v3342_v4 = vmul.f32 %v6191_v59, %v3334_v7 }
 0x3aa   : > { %v2858_v24 = vxor.u32 2147483648, %v2852_v35  ;;  %v2862_v54 = vsel %vm2860_vm14, %v2861_v36, %v2852_v35  ;;  %v3346_v16 = vadd.f32 %v3341_v40, %v5916_v52 }
 0x3ab   : > { %v3347_v52 = vadd.f32 %v3342_v4, %v6050_v8 }
 0x3ac   : > { %v2859_v47 = vsel %vm2857_vm12, %v2844_v20, %v2858_v24  ;;  %v3360_v19 = vrot.slane %v3346_v16, 2  ;;  %v3354_v14 = vrot.slane %v3346_v16, 1 }
 0x3ad   : > { %v2863_v43 = vsel %vm2856_vm9, %v2859_v47, %v2862_v54 }
 0x3ae   : > { %v2864_v25 = vsel %vm2853_vm13, nan, %v2863_v43  ;;  %v3361_v28 = vsel %vm1328_vm3, %v3359_v37, %v3360_v19  ;;  %v3355_v60 = vsel %vm1311_vm4, %v3352_v48, %v3354_v14 }
 0x3af   : > { %v3331_v30 = vmul.f32 %v2864_v25, %v2864_v25 }
 0x3b1   : > { %v3339_v62 = vmul.f32 %v6191_v59, %v3331_v30  ;;  %v3854_v59 = vld [vmem:[%s6523_s4 + $0x2] ss:$0 sm:$0xff] }
 0x3b3   : > { %v3344_v9 = vadd.f32 %v3339_v62, %v6117_v23  ;;  %v3362_v23 = vrot.slane %v3347_v52, 2 }
 0x3b5   : > { %v3351_v29 = vrot.slane %v3344_v9, 1  ;;  %3439 = vmatmul.f32.gmra.mxu2 %v3344_v9  ;;  %v3363_v6 = vsel %vm1328_vm3, %v3360_v19, %v3362_v23 }
 0x3b7   : > { %v3353_v12 = vsel %vm1311_vm4, %v3351_v29, %v3352_v48 }
 0x3b8   : > { %3459 = vmatmul.f32.vlgmr.msrb.gmra.mxu3 %v3353_v12 }
 0x3bd   : > { %3482 = vmatmul.f32.vlgmr.msra.gmra.mxu2 %v3361_v28 }
 0x3c0   : > { %3462 = vmatmul.f32.gmra.mxu3 %v3355_v60 }
 0x3c8   : > { %3485 = vmatmul.f32.vlgmr.msra.gmra.mxu3 %v3363_v6 }
 0x3d4   : > { %v3437_v38 = vpop.f32.mrf.mxu2 }
 0x3d5   : > { %v3438_v45 = vadd.f32 %v3854_v59, %v3437_v38 }
 0x438   : > { %v3440_v18 = vpop.f32.mrf.mxu2 }
 0x439   : > { %v3441_v55 = vadd.f32 %v3854_v59, %v3440_v18 }
 0x43b   : > { %v3460_v53 = vpop.f32.mrf.mxu3 }
 0x43c   : > { %v3461_v8 = vadd.f32 %v3460_v53, %v3438_v45 }
 0x440   : > { %v3483_v61 = vpop.f32.mrf.mxu2 }
 0x441   : > { %v3484_v44 = vadd.f32 %v3483_v61, %v3461_v8 }
 0x443   : > { %v3463_v5 = vpop.f32.mrf.mxu3  ;;  %v3489_v1 = vadd.f32 %v3860_v0, %v3484_v44 }
 0x444   : > { %v3464_v11 = vadd.f32 %v3463_v5, %v3441_v55 }
 0x445   : > { %3491 = vst [vmem:[%s4292_s1] sm:$0xff] %v3489_v1 }
 0x44b   : > { %v3486_v63 = vpop.f32.mrf.mxu3 }
 0x44c   : > { %v3487_v32 = vadd.f32 %v3486_v63, %v3464_v11 }
 0x44e   : > { %v3490_v27 = vadd.f32 %v3861_v2, %v3487_v32 }
 0x450   : > { %3492 = vst [vmem:[%s4292_s1 + $0x8] sm:$0xff] %v3490_v27 }
 0x451   : > { %4009 = shalt.err (!%p4006_p0)
}
 0x452   : > { %s4105_s3 = smov 128   ;;  %s4106_s30 = smov 8  }
 0x453   : > { %3737 = dma.vmem_to_hbm [thread:$0]  (%p4240_p2), %s3509_s22, 256, %s3511_s21, %s3494_s28, %s4105_s3, %s4105_s3, %s4106_s30  }
 0x454 PF: > { %s6592_s1 = sld [smem:[#allocation16_spill]]  ;;  %p3764_p4 = scmp.ge.s32.totalorder %s4088_s25, 2 }
 0x456   : > { %p3754_p6 = pnand %p3764_p4, %p4194_p5 }
 0x458   : > { %p3755_p8 = pneg %p3754_p6 }
 0x45a   : > { %s3525_s17 = sand.u32 1, %s6592_s1  }
 0x45b   : > { %s3526_s13 = scalar_lea.sflag [#allocation5], %s3525_s17 }
 0x45c   : > { %4055 = dma.done.wait (%p3755_p8), %s3526_s13, 256  }
 0x45d   : > { %4057 = vsyncadd (%p3755_p8), %s3526_s13, 4294967040  ;;  %s23_s25 = sadd.s32 1, %s4088_s25   ;;  %s6594_s10 = sld [smem:[#allocation18_spill]] }
 0x45e   : > { %p20_p9 = scmp.ge.s32.totalorder %s23_s25, 8   ;;  %s6595_s15 = sld [smem:[#allocation20_spill]] }
 0x45f   : > { %s6596_s18 = smov %s4064_s19  ;;  %s6597_s19 = smov %s4068_s20 }
 0x460   : > { %s6598_s20 = smov %s4259_s2  ;;  %s6599_s21 = smov %s4080_s23 }
 0x461   : > { %s6600_s22 = smov %s4084_s24  ;;  %22 = sbr.rel (!%p20_p9) target bundleno = 13 (0xd), region = 109 }
 0x463   : > { %s6601_s23 = smov %s6594_s10 }
 0x464   : > { %s6602_s24 = smov %s6595_s15 }
 0x466   :  { %3532 = vsyncpa [#allocation4], 1 }
 0x467   :  { %3534 = vsyncpa [#allocation4 + $0x1], 1 }
 0x468   :  { %3535 = vsyncpa [#allocation7], 1 }
 0x469   :  { %3536 = vsyncpa [#allocation10], 1 }
 0x46a   :  { %3537 = vsyncpa [#allocation5], 1 }
 0x46b   :  { %3539 = vsyncpa [#allocation5 + $0x1], 1 }

</bundles_post_ra>
